<compile_context>
chip_gen: v7x
topology: tpu7x:2x2x1
jax: 0.10.0
libtpu: 0.0.40
codegen_flags: <defaults>
</compile_context>

<pallas_src>
from functools import partial

import jax
import jax.numpy as jnp
import numpy as np
from jax import lax
from jax.experimental import pallas as pl
from jax.experimental.pallas import tpu as pltpu

EPS = 1e-5                 # PyTorch BatchNorm2d default eps
LANE = 128                 # pad output channels to a multiple of the lane width


def _round_up(v, m):
    return (v + m - 1) // m * m


def _pad_last(a, c):
    pad = c - a.shape[-1]
    if pad == 0:
        return a
    widths = [(0, 0)] * (a.ndim - 1) + [(0, pad)]
    return jnp.pad(a, widths)


def _vmem_limit_bytes():
    """Generation-aware VMEM budget: ~3/4 of physical, capped at 100 MiB."""
    cap = 64 * 1024 * 1024
    try:
        info = pltpu.get_tpu_info()
        cap = int(getattr(info, "vmem_capacity_bytes", cap) or cap)
    except Exception:
        pass
    return int(min(cap * 3 // 4, 100 * 1024 * 1024))


def _pick_batch_tile(n, per_sample_bytes, fixed_bytes, vmem_limit):
    """Largest divisor of n whose per-step working set fits the VMEM budget."""
    budget = vmem_limit // 2 - fixed_bytes
    nb = 1
    for d in range(1, n + 1):
        if n % d == 0 and d * per_sample_bytes <= budget:
            nb = d
    return nb


# ----------------------------- kernels -------------------------------------

def _make_conv1_kernel(taps, sc_tap, n_src, has_sc, nb, ho, wo, cin, cp):
    """conv1 (+ fused 1x1 shortcut conv) with K-concat and per-step BN stats."""
    m = ho * wo
    M = nb * m

    def _partial_stats(acc):
        return jnp.concatenate(
            [jnp.sum(acc, axis=0, keepdims=True),
             jnp.sum(acc * acc, axis=0, keepdims=True)], axis=0).reshape(1, 2, cp)

    def kernel(*refs):
        x_refs = refs[:n_src]
        w1_ref = refs[n_src]
        if has_sc:
            wsc_ref, y1_ref, st1_ref, ysc_ref, stsc_ref, lhs_ref = refs[n_src + 1:]
        else:
            y1_ref, st1_ref, lhs_ref = refs[n_src + 1:]

        # In-VMEM im2col: pack the 9 shifted patches side by side so conv1 is
        # a single (M, 9*cin) @ (9*cin, cp) MXU matmul.
        for t, (src, dh, dw) in enumerate(taps):
            patch = x_refs[src][:, dh:dh + ho, dw:dw + wo, :]
            lhs_ref[:, t * cin:(t + 1) * cin] = patch.reshape(M, cin)
        acc = jnp.dot(lhs_ref[...], w1_ref[...],
                      preferred_element_type=jnp.float32)
        y1_ref[...] = acc.reshape(nb, m, cp).astype(y1_ref.dtype)
        st1_ref[...] = _partial_stats(acc)

        if has_sc:
            s_src, s_dh, s_dw = sc_tap
            sc_lhs = x_refs[s_src][:, s_dh:s_dh + ho,
                                   s_dw:s_dw + wo, :].reshape(M, cin)
            sacc = jnp.dot(sc_lhs, wsc_ref[...],
                           preferred_element_type=jnp.float32)
            ysc_ref[...] = sacc.reshape(nb, m, cp).astype(ysc_ref.dtype)
            stsc_ref[...] = _partial_stats(sacc)

    return kernel


def _make_mid_kernel(nb, ho, wo, wop, cp):
    """Fused bn1-apply + relu -> zero-padded VMEM tile -> conv2 (K-concat)
    + per-step bn2 stats."""
    m = ho * wo
    M = nb * m

    def kernel(y1_ref, s1_ref, b1_ref, w2_ref, y2_ref, st_ref, pad_ref):
        # bn1 apply (one FMA per element) + relu, in f32.
        out1 = jnp.maximum(
            y1_ref[...].astype(jnp.float32) * s1_ref[...] + b1_ref[...], 0.0)

        # Stage into a zero-padded scratch.  Unconditional init every step:
        # safe under "parallel" dimension semantics (v7x megacore).
        pad_ref[...] = jnp.zeros_like(pad_ref)
        pad_ref[:, 1:1 + ho, 1:1 + wo, :] = (
            out1.reshape(nb, ho, wo, cp).astype(pad_ref.dtype))

        # conv2: lane-aligned (cp-wide) K-concat of the 9 shifted patches ->
        # one (M, 9*cp) @ (9*cp, cp) MXU matmul.
        cols = [pad_ref[:, dh:dh + ho, dw:dw + wo, :].reshape(M, cp)
                for dh in range(3) for dw in range(3)]
        lhs = jnp.concatenate(cols, axis=-1)
        acc = jnp.dot(lhs, w2_ref[...], preferred_element_type=jnp.float32)

        y2_ref[...] = acc.reshape(nb, m, cp).astype(y2_ref.dtype)
        st_ref[...] = jnp.concatenate(
            [jnp.sum(acc, axis=0, keepdims=True),
             jnp.sum(acc * acc, axis=0, keepdims=True)], axis=0).reshape(1, 2, cp)

    return kernel


def _make_tail_kernel(nb, m, cp, c_sc):
    """bn2-apply + shortcut(-bn)-apply + residual add + relu."""

    def kernel(y2_ref, sc_ref, ssc_ref, bsc_ref, s2_ref, b2_ref, o_ref):
        y2n = y2_ref[...].astype(jnp.float32) * s2_ref[...] + b2_ref[...]
        scn = (sc_ref[...].astype(jnp.float32) * ssc_ref[...] + bsc_ref[...])
        scn = scn.reshape(nb, m, c_sc)
        if c_sc < cp:   # identity shortcut: channel-pad in-register only
            scn = jnp.concatenate(
                [scn, jnp.zeros((nb, m, cp - c_sc), jnp.float32)], axis=-1)
        o_ref[...] = jnp.maximum(y2n + scn, 0.0)

    return kernel


# -------------------------- pallas_call wrappers ----------------------------

def _conv1_call(sources, w1, wsc, taps, sc_tap, nb, ho, wo, cp,
                mxu_dtype, act_dtype, vmem_limit):
    n = sources[0].shape[0]
    cin = sources[0].shape[-1]
    m = ho * wo
    steps = n // nb
    has_sc = wsc is not None

    kernel = _make_conv1_kernel(taps, sc_tap, len(sources), has_sc,
                                nb, ho, wo, cin, cp)

    in_specs = [pl.BlockSpec((nb,) + s.shape[1:], lambda i: (i, 0, 0, 0))
                for s in sources]
    in_specs.append(pl.BlockSpec(w1.shape, lambda i: (0, 0)))
    operands = list(sources) + [w1]

    out_specs = [pl.BlockSpec((nb, m, cp), lambda i: (i, 0, 0)),
                 pl.BlockSpec((1, 2, cp), lambda i: (i, 0, 0))]
    out_shape = [jax.ShapeDtypeStruct((n, m, cp), act_dtype),
                 jax.ShapeDtypeStruct((steps, 2, cp), jnp.float32)]
    if has_sc:
        in_specs.append(pl.BlockSpec(wsc.shape, lambda i: (0, 0)))
        operands.append(wsc)
        out_specs += [pl.BlockSpec((nb, m, cp), lambda i: (i, 0, 0)),
                      pl.BlockSpec((1, 2, cp), lambda i: (i, 0, 0))]
        out_shape += [jax.ShapeDtypeStruct((n, m, cp), act_dtype),
                      jax.ShapeDtypeStruct((steps, 2, cp), jnp.float32)]

    res = pl.pallas_call(
        kernel,
        grid=(steps,),
        in_specs=in_specs,
        out_specs=tuple(out_specs),
        out_shape=tuple(out_shape),
        scratch_shapes=[pltpu.VMEM((nb * m, len(taps) * cin), mxu_dtype)],
        compiler_params=pltpu.CompilerParams(
            dimension_semantics=("parallel",),       # per-step partial stats
            vmem_limit_bytes=vmem_limit),
    )(*operands)
    if has_sc:
        return res
    return res[0], res[1], None, None


def _mid_call(y1, s1, b1, w2, nb, ho, wo, cp, mxu_dtype, act_dtype, vmem_limit):
    n, m, _ = y1.shape
    steps = n // nb
    wop = _round_up(wo + 2, 8)          # keep the scratch W dim sublane-aligned
    kernel = _make_mid_kernel(nb, ho, wo, wop, cp)
    return pl.pallas_call(
        kernel,
        grid=(steps,),
        in_specs=[pl.BlockSpec((nb, m, cp), lambda i: (i, 0, 0)),
                  pl.BlockSpec((1, cp), lambda i: (0, 0)),
                  pl.BlockSpec((1, cp), lambda i: (0, 0)),
                  pl.BlockSpec(w2.shape, lambda i: (0, 0))],
        out_specs=(pl.BlockSpec((nb, m, cp), lambda i: (i, 0, 0)),
                   pl.BlockSpec((1, 2, cp), lambda i: (i, 0, 0))),
        out_shape=(jax.ShapeDtypeStruct((n, m, cp), act_dtype),
                   jax.ShapeDtypeStruct((steps, 2, cp), jnp.float32)),
        scratch_shapes=[pltpu.VMEM((nb, ho + 2, wop, cp), mxu_dtype)],
        compiler_params=pltpu.CompilerParams(
            dimension_semantics=("parallel",),
            vmem_limit_bytes=vmem_limit),
    )(y1, s1, b1, w2)


def _tail_call(y2, sc, ssc, bsc, s2, b2, nb, m, cp, c_sc, vmem_limit):
    n = y2.shape[0]
    steps = n // nb
    kernel = _make_tail_kernel(nb, m, cp, c_sc)
    sc_block = (nb,) + sc.shape[1:]
    sc_idx = ((lambda i: (i, 0, 0, 0)) if sc.ndim == 4
              else (lambda i: (i, 0, 0)))
    return pl.pallas_call(
        kernel,
        grid=(steps,),
        in_specs=[pl.BlockSpec((nb, m, cp), lambda i: (i, 0, 0)),
                  pl.BlockSpec(sc_block, sc_idx),
                  pl.BlockSpec((1, c_sc), lambda i: (0, 0)),
                  pl.BlockSpec((1, c_sc), lambda i: (0, 0)),
                  pl.BlockSpec((1, cp), lambda i: (0, 0)),
                  pl.BlockSpec((1, cp), lambda i: (0, 0))],
        out_specs=pl.BlockSpec((nb, m, cp), lambda i: (i, 0, 0)),
        out_shape=jax.ShapeDtypeStruct((n, m, cp), jnp.float32),
        compiler_params=pltpu.CompilerParams(
            dimension_semantics=("parallel",),
            vmem_limit_bytes=vmem_limit),
    )(y2, sc, ssc, bsc, s2, b2)


# ----------------------------- module ---------------------------------------

def _scale_shift(stats, count, gamma, beta, cp):
    """Fold batch (sum, sumsq) + (gamma, beta) into per-channel scale/shift."""
    mean = stats[0] / count
    var = jnp.maximum(stats[1] / count - mean * mean, 0.0)
    g = _pad_last(gamma.reshape(1, -1), cp)[0]
    b = _pad_last(beta.reshape(1, -1), cp)[0]
    scale = g * lax.rsqrt(var + EPS)
    shift = b - mean * scale
    return scale.reshape(1, cp), shift.reshape(1, cp)


def init_params(key, in_planes, planes, stride):
    """Deterministic synthetic parameters matching BasicBlock2D.__init__ shapes."""
    k1, k2, k3 = jax.random.split(key, 3)
    p = {
        "w1": jax.random.normal(k1, (3, 3, in_planes, planes), jnp.float32) * 0.1,
        "g1": jnp.ones((1, planes), jnp.float32),
        "b1": jnp.zeros((1, planes), jnp.float32),
        "w2": jax.random.normal(k2, (3, 3, planes, planes), jnp.float32) * 0.1,
        "g2": jnp.ones((1, planes), jnp.float32),
        "b2": jnp.zeros((1, planes), jnp.float32),
    }
    if stride != 1 or in_planes != planes:
        p["wsc"] = jax.random.normal(k3, (1, 1, in_planes, planes),
                                     jnp.float32) * 0.1
        p["gsc"] = jnp.ones((1, planes), jnp.float32)
        p["bsc"] = jnp.zeros((1, planes), jnp.float32)
    return p


@partial(jax.jit, static_argnames=("stride", "mxu_dtype"))
def basic_block_2d(x_nchw, params, stride, mxu_dtype=jnp.bfloat16):
    """Forward pass of BasicBlock2D.  Input/output are NCHW like PyTorch."""
    n, cin, h, w = x_nchw.shape
    planes = params["w1"].shape[-1]
    cp = _round_up(planes, LANE)                 # lane-dense channel axis
    act_dtype = mxu_dtype                        # bf16 intermediates by default
    x = jnp.transpose(x_nchw, (0, 2, 3, 1)).astype(jnp.float32)   # NHWC

    has_sc_conv = (stride != 1) or (cin != planes)

    # --- conv1 tap sources (layout glue only; no HBM im2col) -----------------
    if stride == 1:
        ho, wo = h, w
        src = [jnp.pad(x, ((0, 0), (1, 1), (1, 1), (0, 0)))]
        taps = [(0, dh, dw) for dh in range(3) for dw in range(3)]
        sc_tap = (0, 1, 1)            # interior of the padded source == x
    elif stride == 2:
        # space-to-depth so every stride-2 tap becomes an un-strided slice
        ho, wo = (h - 1) // 2 + 1, (w - 1) // 2 + 1
        hp, wp = h + 2 + (h % 2), w + 2 + (w % 2)
        xpe = jnp.pad(x, ((0, 0), (1, hp - h - 1), (1, wp - w - 1), (0, 0)))
        src = [xpe[:, a::2, b::2, :] for a in range(2) for b in range(2)]
        taps = [((kh % 2) * 2 + (kw % 2), kh // 2, kw // 2)
                for kh in range(3) for kw in range(3)]
        sc_tap = (3, 0, 0)            # src[3][:ho,:wo] == x[::2, ::2]
    else:
        raise NotImplementedError("stride must be 1 or 2")
    m = ho * wo
    count = n * m
    src = [s.astype(mxu_dtype) for s in src]      # halve activation DMA (bf16)

    # Weights reshaped for the K-concat matmuls (row block t <-> tap t).
    w1t = _pad_last(params["w1"].reshape(9 * cin, planes), cp).astype(mxu_dtype)
    wsct = (_pad_last(params["wsc"].reshape(cin, planes), cp).astype(mxu_dtype)
            if has_sc_conv else None)
    w2t = jnp.pad(params["w2"].reshape(9, planes, planes),
                  ((0, 0), (0, cp - planes), (0, cp - planes))
                  ).reshape(9 * cp, cp).astype(mxu_dtype)

    # --- batch-tile size: fill the per-generation VMEM budget ---------------
    vmem_limit = _vmem_limit_bytes()
    mxu_b = jnp.dtype(mxu_dtype).itemsize
    act_b = jnp.dtype(act_dtype).itemsize
    src_bytes = sum(int(np.prod(s.shape[1:])) * mxu_b for s in src)
    wop = _round_up(wo + 2, 8)
    per_sample = int(2 * src_bytes                       # conv1 inputs (dbl-buf)
                     + 8 * m * cp * act_b                # y1/y2/ysc/out blocks
                     + (ho + 2) * wop * cp * mxu_b       # conv2 padded scratch
                     + m * (9 * cin + 9 * cp) * mxu_b    # im2col tiles
                     + 12 * m * cp * 4)                  # f32 temporaries headroom
    fixed = int((9 * cin + cin + 9 * cp) * cp * mxu_b)   # resident weights
    nb = _pick_batch_tile(n, per_sample, fixed, vmem_limit)

    # Pass 1: conv1 (+ fused 1x1 shortcut conv) + per-step BN partial stats.
    y1, st1p, ysc, stscp = _conv1_call(src, w1t, wsct, taps, sc_tap, nb, ho, wo,
                                       cp, mxu_dtype, act_dtype, vmem_limit)
    s1, b1 = _scale_shift(st1p.sum(axis=0), count, params["g1"], params["b1"], cp)

    # Pass 2: bn1-apply + relu + conv2 (K-concat) + bn2 partial stats, fused.
    y2, st2p = _mid_call(y1, s1, b1, w2t, nb, ho, wo, cp, mxu_dtype, act_dtype,
                         vmem_limit)
    s2, b2 = _scale_shift(st2p.sum(axis=0), count, params["g2"], params["b2"], cp)

    # Shortcut branch.
    if has_sc_conv:
        ssc, bsc = _scale_shift(stscp.sum(axis=0), count,
                                params["gsc"], params["bsc"], cp)
        sc_arr, c_sc = ysc, cp
    else:
        # identity shortcut: hand the raw (cin-wide) activation to the tail
        # kernel; pad/cast in-register there (no HBM channel-pad materialised).
        sc_arr, c_sc = x.astype(mxu_dtype), cin
        ssc = jnp.ones((1, cin), jnp.float32)
        bsc = jnp.zeros((1, cin), jnp.float32)

    # Pass 3: bn2-apply + shortcut(-bn)-apply + residual add + relu.
    out = _tail_call(y2, sc_arr, ssc, bsc, s2, b2, nb, m, cp, c_sc, vmem_limit)
    out = out.reshape(n, ho, wo, cp)[:, :, :, :planes]
    return jnp.transpose(out, (0, 3, 1, 2))               # back to NCHW


# --------------------------- pure-JAX reference ------------------------------

def _conv_ref(x, w, stride, pad):
    return lax.conv_general_dilated(
        x, w, (stride, stride), ((pad, pad), (pad, pad)),
        dimension_numbers=("NHWC", "HWIO", "NHWC"))


def _bn_ref(y, g, b):
    mu = jnp.mean(y, axis=(0, 1, 2), keepdims=True)
    var = jnp.var(y, axis=(0, 1, 2), keepdims=True)
    return (y - mu) / jnp.sqrt(var + EPS) * g.reshape(1, 1, 1, -1) \
        + b.reshape(1, 1, 1, -1)


def reference(x_nchw, params, stride):
    x = jnp.transpose(x_nchw, (0, 2, 3, 1)).astype(jnp.float32)
    out = jax.nn.relu(_bn_ref(_conv_ref(x, params["w1"], stride, 1),
                              params["g1"], params["b1"]))
    out = _bn_ref(_conv_ref(out, params["w2"], 1, 1),
                  params["g2"], params["b2"])
    if "wsc" in params:
        sc = _bn_ref(_conv_ref(x, params["wsc"], stride, 0),
                     params["gsc"], params["bsc"])
    else:
        sc = x
    out = jax.nn.relu(out + sc)
    return jnp.transpose(out, (0, 3, 1, 2))


# ------------------------------- main ----------------------------------------

if __name__ == "__main__":
    key = jax.random.PRNGKey(0)
    kx, kp, kx2, kp2 = jax.random.split(key, 4)

    # Case 1: downsampling block (in_planes=8 -> planes=16, stride=2).
    x = jax.random.normal(kx, (2, 8, 16, 16), jnp.float32)
    params = init_params(kp, 8, 16, 2)
    ref = reference(x, params, 2)
    out_f32 = jax.block_until_ready(
        basic_block_2d(x, params, stride=2, mxu_dtype=jnp.float32))
    np.testing.assert_allclose(np.asarray(out_f32), np.asarray(ref),
                               rtol=1e-3, atol=1e-3)
    out_bf = jax.block_until_ready(
        basic_block_2d(x, params, stride=2, mxu_dtype=jnp.bfloat16))
    np.testing.assert_allclose(np.asarray(out_bf), np.asarray(ref),
                               rtol=1e-1, atol=1e-1)

    # Case 2: identity-shortcut block (in_planes=planes=16, stride=1).
    x2 = jax.random.normal(kx2, (2, 16, 16, 16), jnp.float32)
    params2 = init_params(kp2, 16, 16, 1)
    ref2 = reference(x2, params2, 1)
    out2_f32 = jax.block_until_ready(
        basic_block_2d(x2, params2, stride=1, mxu_dtype=jnp.float32))
    np.testing.assert_allclose(np.asarray(out2_f32), np.asarray(ref2),
                               rtol=1e-3, atol=1e-3)
    out2_bf = jax.block_until_ready(
        basic_block_2d(x2, params2, stride=1, mxu_dtype=jnp.bfloat16))
    np.testing.assert_allclose(np.asarray(out2_bf), np.asarray(ref2),
                               rtol=1e-1, atol=1e-1)

    print("KERNEL_OK")
</pallas_src>

<mosaic_0001>
module attributes {stable_mosaic.version = 11 : i64} {
  func.func @kernel(%arg0: i32, %arg1: memref<2x9x9x8xf32, #tpu.memory_space<vmem>>, %arg2: memref<2x9x9x8xf32, #tpu.memory_space<vmem>>, %arg3: memref<2x9x9x8xf32, #tpu.memory_space<vmem>>, %arg4: memref<2x9x9x8xf32, #tpu.memory_space<vmem>>, %arg5: memref<72x128xf32, #tpu.memory_space<vmem>>, %arg6: memref<8x128xf32, #tpu.memory_space<vmem>>, %arg7: memref<2x64x128xf32, #tpu.memory_space<vmem>>, %arg8: memref<1x2x128xf32, #tpu.memory_space<vmem>>, %arg9: memref<2x64x128xf32, #tpu.memory_space<vmem>>, %arg10: memref<1x2x128xf32, #tpu.memory_space<vmem>>, %arg11: memref<128x72xf32, #tpu.memory_space<vmem>>) attributes {dimension_semantics = [#tpu.dimension_semantics<parallel>], iteration_bounds = array<i64: 1>, scalar_prefetch = 0 : i64, scratch_operands = 1 : i64, tpu.core_type = #tpu.core_type<tc>, window_params = [{transform_indices = @transform_0, window_bounds = array<i64: 2, 9, 9, 8>}, {transform_indices = @transform_1, window_bounds = array<i64: 2, 9, 9, 8>}, {transform_indices = @transform_2, window_bounds = array<i64: 2, 9, 9, 8>}, {transform_indices = @transform_3, window_bounds = array<i64: 2, 9, 9, 8>}, {pipeline_mode = #tpu.pipeline_mode<synchronous>, transform_indices = @transform_4, window_bounds = array<i64: 72, 128>}, {pipeline_mode = #tpu.pipeline_mode<synchronous>, transform_indices = @transform_5, window_bounds = array<i64: 8, 128>}, {transform_indices = @transform_6, window_bounds = array<i64: 2, 64, 128>}, {transform_indices = @transform_7, window_bounds = array<i64: 1, 2, 128>}, {transform_indices = @transform_8, window_bounds = array<i64: 2, 64, 128>}, {transform_indices = @transform_9, window_bounds = array<i64: 1, 2, 128>}]} {
    %c0 = arith.constant 0 : index
    %c0_0 = arith.constant 0 : index
    %c0_1 = arith.constant 0 : index
    %c0_2 = arith.constant 0 : index
    %0 = vector.load %arg1[%c0, %c0_0, %c0_1, %c0_2] : memref<2x9x9x8xf32, #tpu.memory_space<vmem>>, vector<2x8x8x8xf32>
    %1 = vector.shape_cast %0 : vector<2x8x8x8xf32> to vector<128x8xf32>
    %c0_3 = arith.constant 0 : index
    %c0_4 = arith.constant 0 : index
    %2 = vector.load %arg11[%c0_3, %c0_4] : memref<128x72xf32, #tpu.memory_space<vmem>>, vector<128x8xf32>
    tpu.vector_store %arg11[%c0_3, %c0_4], %1 {strides = array<i32>} : memref<128x72xf32, #tpu.memory_space<vmem>>, vector<128x8xf32>,
    %c0_5 = arith.constant 0 : index
    %c0_6 = arith.constant 0 : index
    %c0_7 = arith.constant 0 : index
    %c0_8 = arith.constant 0 : index
    %3 = vector.load %arg2[%c0_5, %c0_6, %c0_7, %c0_8] : memref<2x9x9x8xf32, #tpu.memory_space<vmem>>, vector<2x8x8x8xf32>
    %4 = vector.shape_cast %3 : vector<2x8x8x8xf32> to vector<128x8xf32>
    %c0_9 = arith.constant 0 : index
    %c8 = arith.constant 8 : index
    %5 = vector.load %arg11[%c0_9, %c8] : memref<128x72xf32, #tpu.memory_space<vmem>>, vector<128x8xf32>
    tpu.vector_store %arg11[%c0_9, %c8], %4 {strides = array<i32>} : memref<128x72xf32, #tpu.memory_space<vmem>>, vector<128x8xf32>,
    %c0_10 = arith.constant 0 : index
    %c0_11 = arith.constant 0 : index
    %c1 = arith.constant 1 : index
    %c0_12 = arith.constant 0 : index
    %6 = vector.load %arg1[%c0_10, %c0_11, %c1, %c0_12] : memref<2x9x9x8xf32, #tpu.memory_space<vmem>>, vector<2x8x8x8xf32>
    %7 = vector.shape_cast %6 : vector<2x8x8x8xf32> to vector<128x8xf32>
    %c0_13 = arith.constant 0 : index
    %c16 = arith.constant 16 : index
    %8 = vector.load %arg11[%c0_13, %c16] : memref<128x72xf32, #tpu.memory_space<vmem>>, vector<128x8xf32>
    tpu.vector_store %arg11[%c0_13, %c16], %7 {strides = array<i32>} : memref<128x72xf32, #tpu.memory_space<vmem>>, vector<128x8xf32>,
    %c0_14 = arith.constant 0 : index
    %c0_15 = arith.constant 0 : index
    %c0_16 = arith.constant 0 : index
    %c0_17 = arith.constant 0 : index
    %9 = vector.load %arg3[%c0_14, %c0_15, %c0_16, %c0_17] : memref<2x9x9x8xf32, #tpu.memory_space<vmem>>, vector<2x8x8x8xf32>
    %10 = vector.shape_cast %9 : vector<2x8x8x8xf32> to vector<128x8xf32>
    %c0_18 = arith.constant 0 : index
    %c24 = arith.constant 24 : index
    %11 = vector.load %arg11[%c0_18, %c24] : memref<128x72xf32, #tpu.memory_space<vmem>>, vector<128x8xf32>
    tpu.vector_store %arg11[%c0_18, %c24], %10 {strides = array<i32>} : memref<128x72xf32, #tpu.memory_space<vmem>>, vector<128x8xf32>,
    %c0_19 = arith.constant 0 : index
    %c0_20 = arith.constant 0 : index
    %c0_21 = arith.constant 0 : index
    %c0_22 = arith.constant 0 : index
    %12 = vector.load %arg4[%c0_19, %c0_20, %c0_21, %c0_22] : memref<2x9x9x8xf32, #tpu.memory_space<vmem>>, vector<2x8x8x8xf32>
    %13 = vector.shape_cast %12 : vector<2x8x8x8xf32> to vector<128x8xf32>
    %c0_23 = arith.constant 0 : index
    %c32 = arith.constant 32 : index
    %14 = vector.load %arg11[%c0_23, %c32] : memref<128x72xf32, #tpu.memory_space<vmem>>, vector<128x8xf32>
    tpu.vector_store %arg11[%c0_23, %c32], %13 {strides = array<i32>} : memref<128x72xf32, #tpu.memory_space<vmem>>, vector<128x8xf32>,
    %c0_24 = arith.constant 0 : index
    %c0_25 = arith.constant 0 : index
    %c1_26 = arith.constant 1 : index
    %c0_27 = arith.constant 0 : index
    %15 = vector.load %arg3[%c0_24, %c0_25, %c1_26, %c0_27] : memref<2x9x9x8xf32, #tpu.memory_space<vmem>>, vector<2x8x8x8xf32>
    %16 = vector.shape_cast %15 : vector<2x8x8x8xf32> to vector<128x8xf32>
    %c0_28 = arith.constant 0 : index
    %c40 = arith.constant 40 : index
    %17 = vector.load %arg11[%c0_28, %c40] : memref<128x72xf32, #tpu.memory_space<vmem>>, vector<128x8xf32>
    tpu.vector_store %arg11[%c0_28, %c40], %16 {strides = array<i32>} : memref<128x72xf32, #tpu.memory_space<vmem>>, vector<128x8xf32>,
    %c0_29 = arith.constant 0 : index
    %c1_30 = arith.constant 1 : index
    %c0_31 = arith.constant 0 : index
    %c0_32 = arith.constant 0 : index
    %18 = vector.load %arg1[%c0_29, %c1_30, %c0_31, %c0_32] : memref<2x9x9x8xf32, #tpu.memory_space<vmem>>, vector<2x8x8x8xf32>
    %19 = vector.shape_cast %18 : vector<2x8x8x8xf32> to vector<128x8xf32>
    %c0_33 = arith.constant 0 : index
    %c48 = arith.constant 48 : index
    %20 = vector.load %arg11[%c0_33, %c48] : memref<128x72xf32, #tpu.memory_space<vmem>>, vector<128x8xf32>
    tpu.vector_store %arg11[%c0_33, %c48], %19 {strides = array<i32>} : memref<128x72xf32, #tpu.memory_space<vmem>>, vector<128x8xf32>,
    %c0_34 = arith.constant 0 : index
    %c1_35 = arith.constant 1 : index
    %c0_36 = arith.constant 0 : index
    %c0_37 = arith.constant 0 : index
    %21 = vector.load %arg2[%c0_34, %c1_35, %c0_36, %c0_37] : memref<2x9x9x8xf32, #tpu.memory_space<vmem>>, vector<2x8x8x8xf32>
    %22 = vector.shape_cast %21 : vector<2x8x8x8xf32> to vector<128x8xf32>
    %c0_38 = arith.constant 0 : index
    %c56 = arith.constant 56 : index
    %23 = vector.load %arg11[%c0_38, %c56] : memref<128x72xf32, #tpu.memory_space<vmem>>, vector<128x8xf32>
    tpu.vector_store %arg11[%c0_38, %c56], %22 {strides = array<i32>} : memref<128x72xf32, #tpu.memory_space<vmem>>, vector<128x8xf32>,
    %c0_39 = arith.constant 0 : index
    %c1_40 = arith.constant 1 : index
    %c1_41 = arith.constant 1 : index
    %c0_42 = arith.constant 0 : index
    %24 = vector.load %arg1[%c0_39, %c1_40, %c1_41, %c0_42] : memref<2x9x9x8xf32, #tpu.memory_space<vmem>>, vector<2x8x8x8xf32>
    %25 = vector.shape_cast %24 : vector<2x8x8x8xf32> to vector<128x8xf32>
    %c0_43 = arith.constant 0 : index
    %c64 = arith.constant 64 : index
    %26 = vector.load %arg11[%c0_43, %c64] : memref<128x72xf32, #tpu.memory_space<vmem>>, vector<128x8xf32>
    tpu.vector_store %arg11[%c0_43, %c64], %25 {strides = array<i32>} : memref<128x72xf32, #tpu.memory_space<vmem>>, vector<128x8xf32>,
    %c0_44 = arith.constant 0 : index
    %c0_45 = arith.constant 0 : index
    %27 = vector.load %arg11[%c0_44, %c0_45] : memref<128x72xf32, #tpu.memory_space<vmem>>, vector<128x72xf32>
    %c0_46 = arith.constant 0 : index
    %c0_47 = arith.constant 0 : index
    %28 = vector.load %arg5[%c0_46, %c0_47] : memref<72x128xf32, #tpu.memory_space<vmem>>, vector<72x128xf32>
    %cst = arith.constant dense<0.000000e+00> : vector<128x128xf32>
    %29 = tpu.matmul %27, %28, %cst {dimension_numbers = #tpu.dot_dimension_numbers<[1], [0], [0], [1], [0, 0, 1, 1], [], []>} : vector<128x72xf32>, vector<72x128xf32>, vector<128x128xf32> -> vector<128x128xf32>
    %30 = vector.shape_cast %29 : vector<128x128xf32> to vector<2x64x128xf32>
    %c0_48 = arith.constant 0 : index
    %c0_49 = arith.constant 0 : index
    %c0_50 = arith.constant 0 : index
    %31 = vector.load %arg7[%c0_48, %c0_49, %c0_50] : memref<2x64x128xf32, #tpu.memory_space<vmem>>, vector<2x64x128xf32>
    tpu.vector_store %arg7[%c0_48, %c0_49, %c0_50], %30 {strides = array<i32>} : memref<2x64x128xf32, #tpu.memory_space<vmem>>, vector<2x64x128xf32>,
    %cst_51 = arith.constant dense<0.000000e+00> : vector<128xf32>
    %32 = vector.multi_reduction <add>, %29, %cst_51 [0] : vector<128x128xf32> to vector<128xf32>
    %33 = vector.shape_cast %32 : vector<128xf32> to vector<1x128xf32>
    %34 = arith.mulf %29, %29 : vector<128x128xf32>
    %cst_52 = arith.constant dense<0.000000e+00> : vector<128xf32>
    %35 = vector.multi_reduction <add>, %34, %cst_52 [0] : vector<128x128xf32> to vector<128xf32>
    %36 = vector.shape_cast %35 : vector<128xf32> to vector<1x128xf32>
    %37 = tpu.concatenate %33, %36 in 0 : vector<1x128xf32>, vector<1x128xf32> -> vector<2x128xf32>
    %38 = vector.shape_cast %37 : vector<2x128xf32> to vector<1x2x128xf32>
    %c0_53 = arith.constant 0 : index
    %c0_54 = arith.constant 0 : index
    %c0_55 = arith.constant 0 : index
    %39 = vector.load %arg8[%c0_53, %c0_54, %c0_55] : memref<1x2x128xf32, #tpu.memory_space<vmem>>, vector<1x2x128xf32>
    tpu.vector_store %arg8[%c0_53, %c0_54, %c0_55], %38 {strides = array<i32>} : memref<1x2x128xf32, #tpu.memory_space<vmem>>, vector<1x2x128xf32>,
    %c0_56 = arith.constant 0 : index
    %c0_57 = arith.constant 0 : index
    %c0_58 = arith.constant 0 : index
    %c0_59 = arith.constant 0 : index
    %40 = vector.load %arg4[%c0_56, %c0_57, %c0_58, %c0_59] : memref<2x9x9x8xf32, #tpu.memory_space<vmem>>, vector<2x8x8x8xf32>
    %41 = vector.shape_cast %40 : vector<2x8x8x8xf32> to vector<128x8xf32>
    %c0_60 = arith.constant 0 : index
    %c0_61 = arith.constant 0 : index
    %42 = vector.load %arg6[%c0_60, %c0_61] : memref<8x128xf32, #tpu.memory_space<vmem>>, vector<8x128xf32>
    %cst_62 = arith.constant dense<0.000000e+00> : vector<128x128xf32>
    %43 = tpu.matmul %41, %42, %cst_62 {dimension_numbers = #tpu.dot_dimension_numbers<[1], [0], [0], [1], [0, 0, 1, 1], [], []>} : vector<128x8xf32>, vector<8x128xf32>, vector<128x128xf32> -> vector<128x128xf32>
    %44 = vector.shape_cast %43 : vector<128x128xf32> to vector<2x64x128xf32>
    %c0_63 = arith.constant 0 : index
    %c0_64 = arith.constant 0 : index
    %c0_65 = arith.constant 0 : index
    %45 = vector.load %arg9[%c0_63, %c0_64, %c0_65] : memref<2x64x128xf32, #tpu.memory_space<vmem>>, vector<2x64x128xf32>
    tpu.vector_store %arg9[%c0_63, %c0_64, %c0_65], %44 {strides = array<i32>} : memref<2x64x128xf32, #tpu.memory_space<vmem>>, vector<2x64x128xf32>,
    %cst_66 = arith.constant dense<0.000000e+00> : vector<128xf32>
    %46 = vector.multi_reduction <add>, %43, %cst_66 [0] : vector<128x128xf32> to vector<128xf32>
    %47 = vector.shape_cast %46 : vector<128xf32> to vector<1x128xf32>
    %48 = arith.mulf %43, %43 : vector<128x128xf32>
    %cst_67 = arith.constant dense<0.000000e+00> : vector<128xf32>
    %49 = vector.multi_reduction <add>, %48, %cst_67 [0] : vector<128x128xf32> to vector<128xf32>
    %50 = vector.shape_cast %49 : vector<128xf32> to vector<1x128xf32>
    %51 = tpu.concatenate %47, %50 in 0 : vector<1x128xf32>, vector<1x128xf32> -> vector<2x128xf32>
    %52 = vector.shape_cast %51 : vector<2x128xf32> to vector<1x2x128xf32>
    %c0_68 = arith.constant 0 : index
    %c0_69 = arith.constant 0 : index
    %c0_70 = arith.constant 0 : index
    %53 = vector.load %arg10[%c0_68, %c0_69, %c0_70] : memref<1x2x128xf32, #tpu.memory_space<vmem>>, vector<1x2x128xf32>
    tpu.vector_store %arg10[%c0_68, %c0_69, %c0_70], %52 {strides = array<i32>} : memref<1x2x128xf32, #tpu.memory_space<vmem>>, vector<1x2x128xf32>,
    return
  }
  func.func @transform_0(%arg0: i32) -> (i32, i32, i32, i32) {
    %c0_i32 = arith.constant 0 : i32
    %c0_i32_0 = arith.constant 0 : i32
    %c0_i32_1 = arith.constant 0 : i32
    %c0_i32_2 = arith.constant 0 : i32
    return %arg0, %c0_i32, %c0_i32_0, %c0_i32_1 : i32, i32, i32, i32
  }
  func.func @transform_1(%arg0: i32) -> (i32, i32, i32, i32) {
    %c0_i32 = arith.constant 0 : i32
    %c0_i32_0 = arith.constant 0 : i32
    %c0_i32_1 = arith.constant 0 : i32
    %c0_i32_2 = arith.constant 0 : i32
    return %arg0, %c0_i32, %c0_i32_0, %c0_i32_1 : i32, i32, i32, i32
  }
  func.func @transform_2(%arg0: i32) -> (i32, i32, i32, i32) {
    %c0_i32 = arith.constant 0 : i32
    %c0_i32_0 = arith.constant 0 : i32
    %c0_i32_1 = arith.constant 0 : i32
    %c0_i32_2 = arith.constant 0 : i32
    return %arg0, %c0_i32, %c0_i32_0, %c0_i32_1 : i32, i32, i32, i32
  }
  func.func @transform_3(%arg0: i32) -> (i32, i32, i32, i32) {
    %c0_i32 = arith.constant 0 : i32
    %c0_i32_0 = arith.constant 0 : i32
    %c0_i32_1 = arith.constant 0 : i32
    %c0_i32_2 = arith.constant 0 : i32
    return %arg0, %c0_i32, %c0_i32_0, %c0_i32_1 : i32, i32, i32, i32
  }
  func.func @transform_4(%arg0: i32) -> (i32, i32) {
    %c0_i32 = arith.constant 0 : i32
    %c0_i32_0 = arith.constant 0 : i32
    %c0_i32_1 = arith.constant 0 : i32
    return %c0_i32, %c0_i32_0 : i32, i32
  }
  func.func @transform_5(%arg0: i32) -> (i32, i32) {
    %c0_i32 = arith.constant 0 : i32
    %c0_i32_0 = arith.constant 0 : i32
    %c0_i32_1 = arith.constant 0 : i32
    return %c0_i32, %c0_i32_0 : i32, i32
  }
  func.func @transform_6(%arg0: i32) -> (i32, i32, i32) {
    %c0_i32 = arith.constant 0 : i32
    %c0_i32_0 = arith.constant 0 : i32
    %c0_i32_1 = arith.constant 0 : i32
    return %arg0, %c0_i32, %c0_i32_0 : i32, i32, i32
  }
  func.func @transform_7(%arg0: i32) -> (i32, i32, i32) {
    %c0_i32 = arith.constant 0 : i32
    %c0_i32_0 = arith.constant 0 : i32
    %c0_i32_1 = arith.constant 0 : i32
    return %arg0, %c0_i32, %c0_i32_0 : i32, i32, i32
  }
  func.func @transform_8(%arg0: i32) -> (i32, i32, i32) {
    %c0_i32 = arith.constant 0 : i32
    %c0_i32_0 = arith.constant 0 : i32
    %c0_i32_1 = arith.constant 0 : i32
    return %arg0, %c0_i32, %c0_i32_0 : i32, i32, i32
  }
  func.func @transform_9(%arg0: i32) -> (i32, i32, i32) {
    %c0_i32 = arith.constant 0 : i32
    %c0_i32_0 = arith.constant 0 : i32
    %c0_i32_1 = arith.constant 0 : i32
    return %arg0, %c0_i32, %c0_i32_0 : i32, i32, i32
  }
}

module attributes {stable_mosaic.version = 11 : i64} {
  func.func @kernel(%arg0: i32, %arg1: memref<2x64x128xf32, #tpu.memory_space<vmem>>, %arg2: memref<1x128xf32, #tpu.memory_space<vmem>>, %arg3: memref<1x128xf32, #tpu.memory_space<vmem>>, %arg4: memref<1152x128xf32, #tpu.memory_space<vmem>>, %arg5: memref<2x64x128xf32, #tpu.memory_space<vmem>>, %arg6: memref<1x2x128xf32, #tpu.memory_space<vmem>>, %arg7: memref<2x10x16x128xf32, #tpu.memory_space<vmem>>) attributes {dimension_semantics = [#tpu.dimension_semantics<parallel>], iteration_bounds = array<i64: 1>, scalar_prefetch = 0 : i64, scratch_operands = 1 : i64, tpu.core_type = #tpu.core_type<tc>, window_params = [{transform_indices = @transform_0, window_bounds = array<i64: 2, 64, 128>}, {pipeline_mode = #tpu.pipeline_mode<synchronous>, transform_indices = @transform_1, window_bounds = array<i64: 1, 128>}, {pipeline_mode = #tpu.pipeline_mode<synchronous>, transform_indices = @transform_2, window_bounds = array<i64: 1, 128>}, {pipeline_mode = #tpu.pipeline_mode<synchronous>, transform_indices = @transform_3, window_bounds = array<i64: 1152, 128>}, {transform_indices = @transform_4, window_bounds = array<i64: 2, 64, 128>}, {transform_indices = @transform_5, window_bounds = array<i64: 1, 2, 128>}]} {
    %c0 = arith.constant 0 : index
    %c0_0 = arith.constant 0 : index
    %c0_1 = arith.constant 0 : index
    %0 = vector.load %arg1[%c0, %c0_0, %c0_1] : memref<2x64x128xf32, #tpu.memory_space<vmem>>, vector<2x64x128xf32>
    %c0_2 = arith.constant 0 : index
    %c0_3 = arith.constant 0 : index
    %1 = vector.load %arg2[%c0_2, %c0_3] : memref<1x128xf32, #tpu.memory_space<vmem>>, vector<1x128xf32>
    %2 = vector.shape_cast %1 : vector<1x128xf32> to vector<1x1x128xf32>
    %3 = vector.broadcast %2 : vector<1x1x128xf32> to vector<2x64x128xf32>
    %4 = arith.mulf %0, %3 : vector<2x64x128xf32>
    %c0_4 = arith.constant 0 : index
    %c0_5 = arith.constant 0 : index
    %5 = vector.load %arg3[%c0_4, %c0_5] : memref<1x128xf32, #tpu.memory_space<vmem>>, vector<1x128xf32>
    %6 = vector.shape_cast %5 : vector<1x128xf32> to vector<1x1x128xf32>
    %7 = vector.broadcast %6 : vector<1x1x128xf32> to vector<2x64x128xf32>
    %8 = arith.addf %4, %7 : vector<2x64x128xf32>
    %cst = arith.constant 0.000000e+00 : f32
    %9 = vector.broadcast %cst : f32 to vector<2x64x128xf32>
    %10 = arith.maximumf %8, %9 : vector<2x64x128xf32>
    %cst_6 = arith.constant 0.000000e+00 : f32
    %11 = vector.broadcast %cst_6 : f32 to vector<2x10x16x128xf32>
    %c0_7 = arith.constant 0 : index
    %c0_8 = arith.constant 0 : index
    %c0_9 = arith.constant 0 : index
    %c0_10 = arith.constant 0 : index
    %12 = vector.load %arg7[%c0_7, %c0_8, %c0_9, %c0_10] : memref<2x10x16x128xf32, #tpu.memory_space<vmem>>, vector<2x10x16x128xf32>
    tpu.vector_store %arg7[%c0_7, %c0_8, %c0_9, %c0_10], %11 {strides = array<i32>} : memref<2x10x16x128xf32, #tpu.memory_space<vmem>>, vector<2x10x16x128xf32>,
    %13 = vector.shape_cast %10 : vector<2x64x128xf32> to vector<2x8x8x128xf32>
    %c0_11 = arith.constant 0 : index
    %c1 = arith.constant 1 : index
    %c1_12 = arith.constant 1 : index
    %c0_13 = arith.constant 0 : index
    %14 = vector.load %arg7[%c0_11, %c1, %c1_12, %c0_13] : memref<2x10x16x128xf32, #tpu.memory_space<vmem>>, vector<2x8x8x128xf32>
    tpu.vector_store %arg7[%c0_11, %c1, %c1_12, %c0_13], %13 {strides = array<i32>} : memref<2x10x16x128xf32, #tpu.memory_space<vmem>>, vector<2x8x8x128xf32>,
    %c0_14 = arith.constant 0 : index
    %c0_15 = arith.constant 0 : index
    %c0_16 = arith.constant 0 : index
    %c0_17 = arith.constant 0 : index
    %15 = vector.load %arg7[%c0_14, %c0_15, %c0_16, %c0_17] : memref<2x10x16x128xf32, #tpu.memory_space<vmem>>, vector<2x8x8x128xf32>
    %16 = vector.shape_cast %15 : vector<2x8x8x128xf32> to vector<128x128xf32>
    %c0_18 = arith.constant 0 : index
    %c0_19 = arith.constant 0 : index
    %c1_20 = arith.constant 1 : index
    %c0_21 = arith.constant 0 : index
    %17 = vector.load %arg7[%c0_18, %c0_19, %c1_20, %c0_21] : memref<2x10x16x128xf32, #tpu.memory_space<vmem>>, vector<2x8x8x128xf32>
    %18 = vector.shape_cast %17 : vector<2x8x8x128xf32> to vector<128x128xf32>
    %c0_22 = arith.constant 0 : index
    %c0_23 = arith.constant 0 : index
    %c2 = arith.constant 2 : index
    %c0_24 = arith.constant 0 : index
    %19 = vector.load %arg7[%c0_22, %c0_23, %c2, %c0_24] : memref<2x10x16x128xf32, #tpu.memory_space<vmem>>, vector<2x8x8x128xf32>
    %20 = vector.shape_cast %19 : vector<2x8x8x128xf32> to vector<128x128xf32>
    %c0_25 = arith.constant 0 : index
    %c1_26 = arith.constant 1 : index
    %c0_27 = arith.constant 0 : index
    %c0_28 = arith.constant 0 : index
    %21 = vector.load %arg7[%c0_25, %c1_26, %c0_27, %c0_28] : memref<2x10x16x128xf32, #tpu.memory_space<vmem>>, vector<2x8x8x128xf32>
    %22 = vector.shape_cast %21 : vector<2x8x8x128xf32> to vector<128x128xf32>
    %c0_29 = arith.constant 0 : index
    %c1_30 = arith.constant 1 : index
    %c1_31 = arith.constant 1 : index
    %c0_32 = arith.constant 0 : index
    %23 = vector.load %arg7[%c0_29, %c1_30, %c1_31, %c0_32] : memref<2x10x16x128xf32, #tpu.memory_space<vmem>>, vector<2x8x8x128xf32>
    %24 = vector.shape_cast %23 : vector<2x8x8x128xf32> to vector<128x128xf32>
    %c0_33 = arith.constant 0 : index
    %c1_34 = arith.constant 1 : index
    %c2_35 = arith.constant 2 : index
    %c0_36 = arith.constant 0 : index
    %25 = vector.load %arg7[%c0_33, %c1_34, %c2_35, %c0_36] : memref<2x10x16x128xf32, #tpu.memory_space<vmem>>, vector<2x8x8x128xf32>
    %26 = vector.shape_cast %25 : vector<2x8x8x128xf32> to vector<128x128xf32>
    %c0_37 = arith.constant 0 : index
    %c2_38 = arith.constant 2 : index
    %c0_39 = arith.constant 0 : index
    %c0_40 = arith.constant 0 : index
    %27 = vector.load %arg7[%c0_37, %c2_38, %c0_39, %c0_40] : memref<2x10x16x128xf32, #tpu.memory_space<vmem>>, vector<2x8x8x128xf32>
    %28 = vector.shape_cast %27 : vector<2x8x8x128xf32> to vector<128x128xf32>
    %c0_41 = arith.constant 0 : index
    %c2_42 = arith.constant 2 : index
    %c1_43 = arith.constant 1 : index
    %c0_44 = arith.constant 0 : index
    %29 = vector.load %arg7[%c0_41, %c2_42, %c1_43, %c0_44] : memref<2x10x16x128xf32, #tpu.memory_space<vmem>>, vector<2x8x8x128xf32>
    %30 = vector.shape_cast %29 : vector<2x8x8x128xf32> to vector<128x128xf32>
    %c0_45 = arith.constant 0 : index
    %c2_46 = arith.constant 2 : index
    %c2_47 = arith.constant 2 : index
    %c0_48 = arith.constant 0 : index
    %31 = vector.load %arg7[%c0_45, %c2_46, %c2_47, %c0_48] : memref<2x10x16x128xf32, #tpu.memory_space<vmem>>, vector<2x8x8x128xf32>
    %32 = vector.shape_cast %31 : vector<2x8x8x128xf32> to vector<128x128xf32>
    %33 = tpu.concatenate %16, %18, %20, %22, %24, %26, %28, %30, %32 in 1 : vector<128x128xf32>, vector<128x128xf32>, vector<128x128xf32>, vector<128x128xf32>, vector<128x128xf32>, vector<128x128xf32>, vector<128x128xf32>, vector<128x128xf32>, vector<128x128xf32> -> vector<128x1152xf32>
    %c0_49 = arith.constant 0 : index
    %c0_50 = arith.constant 0 : index
    %34 = vector.load %arg4[%c0_49, %c0_50] : memref<1152x128xf32, #tpu.memory_space<vmem>>, vector<1152x128xf32>
    %cst_51 = arith.constant dense<0.000000e+00> : vector<128x128xf32>
    %35 = tpu.matmul %33, %34, %cst_51 {dimension_numbers = #tpu.dot_dimension_numbers<[1], [0], [0], [1], [0, 0, 1, 1], [], []>} : vector<128x1152xf32>, vector<1152x128xf32>, vector<128x128xf32> -> vector<128x128xf32>
    %36 = vector.shape_cast %35 : vector<128x128xf32> to vector<2x64x128xf32>
    %c0_52 = arith.constant 0 : index
    %c0_53 = arith.constant 0 : index
    %c0_54 = arith.constant 0 : index
    %37 = vector.load %arg5[%c0_52, %c0_53, %c0_54] : memref<2x64x128xf32, #tpu.memory_space<vmem>>, vector<2x64x128xf32>
    tpu.vector_store %arg5[%c0_52, %c0_53, %c0_54], %36 {strides = array<i32>} : memref<2x64x128xf32, #tpu.memory_space<vmem>>, vector<2x64x128xf32>,
    %cst_55 = arith.constant dense<0.000000e+00> : vector<128xf32>
    %38 = vector.multi_reduction <add>, %35, %cst_55 [0] : vector<128x128xf32> to vector<128xf32>
    %39 = vector.shape_cast %38 : vector<128xf32> to vector<1x128xf32>
    %40 = arith.mulf %35, %35 : vector<128x128xf32>
    %cst_56 = arith.constant dense<0.000000e+00> : vector<128xf32>
    %41 = vector.multi_reduction <add>, %40, %cst_56 [0] : vector<128x128xf32> to vector<128xf32>
    %42 = vector.shape_cast %41 : vector<128xf32> to vector<1x128xf32>
    %43 = tpu.concatenate %39, %42 in 0 : vector<1x128xf32>, vector<1x128xf32> -> vector<2x128xf32>
    %44 = vector.shape_cast %43 : vector<2x128xf32> to vector<1x2x128xf32>
    %c0_57 = arith.constant 0 : index
    %c0_58 = arith.constant 0 : index
    %c0_59 = arith.constant 0 : index
    %45 = vector.load %arg6[%c0_57, %c0_58, %c0_59] : memref<1x2x128xf32, #tpu.memory_space<vmem>>, vector<1x2x128xf32>
    tpu.vector_store %arg6[%c0_57, %c0_58, %c0_59], %44 {strides = array<i32>} : memref<1x2x128xf32, #tpu.memory_space<vmem>>, vector<1x2x128xf32>,
    return
  }
  func.func @transform_0(%arg0: i32) -> (i32, i32, i32) {
    %c0_i32 = arith.constant 0 : i32
    %c0_i32_0 = arith.constant 0 : i32
    %c0_i32_1 = arith.constant 0 : i32
    return %arg0, %c0_i32, %c0_i32_0 : i32, i32, i32
  }
  func.func @transform_1(%arg0: i32) -> (i32, i32) {
    %c0_i32 = arith.constant 0 : i32
    %c0_i32_0 = arith.constant 0 : i32
    %c0_i32_1 = arith.constant 0 : i32
    return %c0_i32, %c0_i32_0 : i32, i32
  }
  func.func @transform_2(%arg0: i32) -> (i32, i32) {
    %c0_i32 = arith.constant 0 : i32
    %c0_i32_0 = arith.constant 0 : i32
    %c0_i32_1 = arith.constant 0 : i32
    return %c0_i32, %c0_i32_0 : i32, i32
  }
  func.func @transform_3(%arg0: i32) -> (i32, i32) {
    %c0_i32 = arith.constant 0 : i32
    %c0_i32_0 = arith.constant 0 : i32
    %c0_i32_1 = arith.constant 0 : i32
    return %c0_i32, %c0_i32_0 : i32, i32
  }
  func.func @transform_4(%arg0: i32) -> (i32, i32, i32) {
    %c0_i32 = arith.constant 0 : i32
    %c0_i32_0 = arith.constant 0 : i32
    %c0_i32_1 = arith.constant 0 : i32
    return %arg0, %c0_i32, %c0_i32_0 : i32, i32, i32
  }
  func.func @transform_5(%arg0: i32) -> (i32, i32, i32) {
    %c0_i32 = arith.constant 0 : i32
    %c0_i32_0 = arith.constant 0 : i32
    %c0_i32_1 = arith.constant 0 : i32
    return %arg0, %c0_i32, %c0_i32_0 : i32, i32, i32
  }
}

module attributes {stable_mosaic.version = 11 : i64} {
  func.func @kernel(%arg0: i32, %arg1: memref<2x64x128xf32, #tpu.memory_space<vmem>>, %arg2: memref<2x64x128xf32, #tpu.memory_space<vmem>>, %arg3: memref<1x128xf32, #tpu.memory_space<vmem>>, %arg4: memref<1x128xf32, #tpu.memory_space<vmem>>, %arg5: memref<1x128xf32, #tpu.memory_space<vmem>>, %arg6: memref<1x128xf32, #tpu.memory_space<vmem>>, %arg7: memref<2x64x128xf32, #tpu.memory_space<vmem>>) attributes {dimension_semantics = [#tpu.dimension_semantics<parallel>], iteration_bounds = array<i64: 1>, scalar_prefetch = 0 : i64, scratch_operands = 0 : i64, tpu.core_type = #tpu.core_type<tc>, window_params = [{transform_indices = @transform_0, window_bounds = array<i64: 2, 64, 128>}, {transform_indices = @transform_1, window_bounds = array<i64: 2, 64, 128>}, {pipeline_mode = #tpu.pipeline_mode<synchronous>, transform_indices = @transform_2, window_bounds = array<i64: 1, 128>}, {pipeline_mode = #tpu.pipeline_mode<synchronous>, transform_indices = @transform_3, window_bounds = array<i64: 1, 128>}, {pipeline_mode = #tpu.pipeline_mode<synchronous>, transform_indices = @transform_4, window_bounds = array<i64: 1, 128>}, {pipeline_mode = #tpu.pipeline_mode<synchronous>, transform_indices = @transform_5, window_bounds = array<i64: 1, 128>}, {transform_indices = @transform_6, window_bounds = array<i64: 2, 64, 128>}]} {
    %c0 = arith.constant 0 : index
    %c0_0 = arith.constant 0 : index
    %c0_1 = arith.constant 0 : index
    %0 = vector.load %arg1[%c0, %c0_0, %c0_1] : memref<2x64x128xf32, #tpu.memory_space<vmem>>, vector<2x64x128xf32>
    %c0_2 = arith.constant 0 : index
    %c0_3 = arith.constant 0 : index
    %1 = vector.load %arg5[%c0_2, %c0_3] : memref<1x128xf32, #tpu.memory_space<vmem>>, vector<1x128xf32>
    %2 = vector.shape_cast %1 : vector<1x128xf32> to vector<1x1x128xf32>
    %3 = vector.broadcast %2 : vector<1x1x128xf32> to vector<2x64x128xf32>
    %4 = arith.mulf %0, %3 : vector<2x64x128xf32>
    %c0_4 = arith.constant 0 : index
    %c0_5 = arith.constant 0 : index
    %5 = vector.load %arg6[%c0_4, %c0_5] : memref<1x128xf32, #tpu.memory_space<vmem>>, vector<1x128xf32>
    %6 = vector.shape_cast %5 : vector<1x128xf32> to vector<1x1x128xf32>
    %7 = vector.broadcast %6 : vector<1x1x128xf32> to vector<2x64x128xf32>
    %8 = arith.addf %4, %7 : vector<2x64x128xf32>
    %c0_6 = arith.constant 0 : index
    %c0_7 = arith.constant 0 : index
    %c0_8 = arith.constant 0 : index
    %9 = vector.load %arg2[%c0_6, %c0_7, %c0_8] : memref<2x64x128xf32, #tpu.memory_space<vmem>>, vector<2x64x128xf32>
    %c0_9 = arith.constant 0 : index
    %c0_10 = arith.constant 0 : index
    %10 = vector.load %arg3[%c0_9, %c0_10] : memref<1x128xf32, #tpu.memory_space<vmem>>, vector<1x128xf32>
    %11 = vector.shape_cast %10 : vector<1x128xf32> to vector<1x1x128xf32>
    %12 = vector.broadcast %11 : vector<1x1x128xf32> to vector<2x64x128xf32>
    %13 = arith.mulf %9, %12 : vector<2x64x128xf32>
    %c0_11 = arith.constant 0 : index
    %c0_12 = arith.constant 0 : index
    %14 = vector.load %arg4[%c0_11, %c0_12] : memref<1x128xf32, #tpu.memory_space<vmem>>, vector<1x128xf32>
    %15 = vector.shape_cast %14 : vector<1x128xf32> to vector<1x1x128xf32>
    %16 = vector.broadcast %15 : vector<1x1x128xf32> to vector<2x64x128xf32>
    %17 = arith.addf %13, %16 : vector<2x64x128xf32>
    %18 = arith.addf %8, %17 : vector<2x64x128xf32>
    %cst = arith.constant 0.000000e+00 : f32
    %19 = vector.broadcast %cst : f32 to vector<2x64x128xf32>
    %20 = arith.maximumf %18, %19 : vector<2x64x128xf32>
    %c0_13 = arith.constant 0 : index
    %c0_14 = arith.constant 0 : index
    %c0_15 = arith.constant 0 : index
    %21 = vector.load %arg7[%c0_13, %c0_14, %c0_15] : memref<2x64x128xf32, #tpu.memory_space<vmem>>, vector<2x64x128xf32>
    tpu.vector_store %arg7[%c0_13, %c0_14, %c0_15], %20 {strides = array<i32>} : memref<2x64x128xf32, #tpu.memory_space<vmem>>, vector<2x64x128xf32>,
    return
  }
  func.func @transform_0(%arg0: i32) -> (i32, i32, i32) {
    %c0_i32 = arith.constant 0 : i32
    %c0_i32_0 = arith.constant 0 : i32
    %c0_i32_1 = arith.constant 0 : i32
    return %arg0, %c0_i32, %c0_i32_0 : i32, i32, i32
  }
  func.func @transform_1(%arg0: i32) -> (i32, i32, i32) {
    %c0_i32 = arith.constant 0 : i32
    %c0_i32_0 = arith.constant 0 : i32
    %c0_i32_1 = arith.constant 0 : i32
    return %arg0, %c0_i32, %c0_i32_0 : i32, i32, i32
  }
  func.func @transform_2(%arg0: i32) -> (i32, i32) {
    %c0_i32 = arith.constant 0 : i32
    %c0_i32_0 = arith.constant 0 : i32
    %c0_i32_1 = arith.constant 0 : i32
    return %c0_i32, %c0_i32_0 : i32, i32
  }
  func.func @transform_3(%arg0: i32) -> (i32, i32) {
    %c0_i32 = arith.constant 0 : i32
    %c0_i32_0 = arith.constant 0 : i32
    %c0_i32_1 = arith.constant 0 : i32
    return %c0_i32, %c0_i32_0 : i32, i32
  }
  func.func @transform_4(%arg0: i32) -> (i32, i32) {
    %c0_i32 = arith.constant 0 : i32
    %c0_i32_0 = arith.constant 0 : i32
    %c0_i32_1 = arith.constant 0 : i32
    return %c0_i32, %c0_i32_0 : i32, i32
  }
  func.func @transform_5(%arg0: i32) -> (i32, i32) {
    %c0_i32 = arith.constant 0 : i32
    %c0_i32_0 = arith.constant 0 : i32
    %c0_i32_1 = arith.constant 0 : i32
    return %c0_i32, %c0_i32_0 : i32, i32
  }
  func.func @transform_6(%arg0: i32) -> (i32, i32, i32) {
    %c0_i32 = arith.constant 0 : i32
    %c0_i32_0 = arith.constant 0 : i32
    %c0_i32_1 = arith.constant 0 : i32
    return %arg0, %c0_i32, %c0_i32_0 : i32, i32, i32
  }
}

</mosaic_0001>

<bundles_post_ra>
// kernel: basic_block_2d.5
= control target key start
LH: loop header
LB: loop body
LE: loop exit
PB: predicated region body
PF: predicated region fallthrough
CT: control target
= control target key end

     0   :  { %s466_s0 = inlined_call_operand.vmem [shape: f32[2,64,128], index: 0, kind: input, shape index: {}]   ;;  %s467_s1 = inlined_call_operand.vmem [shape: f32[2,64,128], index: 1, kind: input, shape index: {}]   ;;  %s468_s2 = inlined_call_operand.vmem [shape: f32[1,128], index: 2, kind: input, shape index: {}]   ;;  %s469_s3 = inlined_call_operand.vmem [shape: f32[1,128], index: 3, kind: input, shape index: {}]   ;;  %s470_s4 = inlined_call_operand.vmem [shape: f32[1,128], index: 4, kind: input, shape index: {}]   ;;  %s471_s5 = inlined_call_operand.vmem [shape: f32[1,128], index: 5, kind: input, shape index: {}]   ;;  %s472_s6 = inlined_call_operand.vmem [shape: f32[2,64,128], index: 6, kind: output, shape index: {}]  }
   0x1   :  { %v23_v0 = vld [vmem:[%s466_s0] sm:$0xff]  ;;  %v24_v8 = vld [vmem:[%s466_s0 + $0x8] sm:$0xff]  ;;  %v25_v10 = vld [vmem:[%s466_s0 + $0x10] sm:$0xff] }
   0x2   :  { %v244_v1 = vld [vmem:[%s470_s4] ss:$0 sm:$0xff]  ;;  %v86_v9 = vld [vmem:[%s467_s1 + $0x8] sm:$0xff]  ;;  %v87_v15 = vld [vmem:[%s467_s1 + $0x10] sm:$0xff] }
   0x3   :  { %v249_v2 = vld [vmem:[%s471_s5] ss:$0 sm:$0xff]  ;;  %v46_v3 = vmul.f32 %v244_v1, %v23_v0  ;;  %v47_v12 = vmul.f32 %v244_v1, %v24_v8  ;;  %v48_v14 = vmul.f32 %v244_v1, %v25_v10  ;;  %v26_v16 = vld [vmem:[%s466_s0 + $0x18] sm:$0xff]  ;;  %v28_v24 = vld [vmem:[%s466_s0 + $0x28] sm:$0xff] }
   0x4   :  { %v85_v4 = vld [vmem:[%s467_s1] sm:$0xff]  ;;  %v88_v17 = vld [vmem:[%s467_s1 + $0x18] sm:$0xff]  ;;  %v49_v20 = vmul.f32 %v244_v1, %v26_v16  ;;  %v90_v29 = vld [vmem:[%s467_s1 + $0x28] sm:$0xff]  ;;  %v51_v38 = vmul.f32 %v244_v1, %v28_v24 }
   0x5   :  { %v258_v5 = vld [vmem:[%s468_s2] ss:$0 sm:$0xff]  ;;  %v69_v11 = vadd.f32 %v249_v2, %v46_v3  ;;  %v70_v25 = vadd.f32 %v249_v2, %v47_v12  ;;  %v71_v27 = vadd.f32 %v249_v2, %v48_v14  ;;  %v29_v34 = vld [vmem:[%s466_s0 + $0x30] sm:$0xff]  ;;  %v30_v44 = vld [vmem:[%s466_s0 + $0x38] sm:$0xff] }
   0x6   :  { %v263_v6 = vld [vmem:[%s469_s3] ss:$0 sm:$0xff]  ;;  %v108_v7 = vmul.f32 %v258_v5, %v85_v4  ;;  %v109_v13 = vmul.f32 %v258_v5, %v86_v9  ;;  %v110_v19 = vmul.f32 %v258_v5, %v87_v15  ;;  %v111_v21 = vmul.f32 %v258_v5, %v88_v17  ;;  %v91_v39 = vld [vmem:[%s467_s1 + $0x30] sm:$0xff]  ;;  %v92_v45 = vld [vmem:[%s467_s1 + $0x38] sm:$0xff] }
   0x7   :  { %v27_v22 = vld [vmem:[%s466_s0 + $0x20] sm:$0xff]  ;;  %v72_v32 = vadd.f32 %v249_v2, %v49_v20  ;;  %v113_v43 = vmul.f32 %v258_v5, %v90_v29  ;;  %v74_v48 = vadd.f32 %v249_v2, %v51_v38  ;;  %v52_v49 = vmul.f32 %v244_v1, %v29_v34  ;;  %v32_v56 = vld [vmem:[%s466_s0 + $0x48] sm:$0xff]  ;;  %v33_v4 = vld [vmem:[%s466_s0 + $0x50] sm:$0xff] }
   0x8   :  { %v131_v18 = vadd.f32 %v263_v6, %v108_v7  ;;  %v89_v23 = vld [vmem:[%s467_s1 + $0x20] sm:$0xff]  ;;  %v132_v26 = vadd.f32 %v263_v6, %v109_v13  ;;  %v50_v28 = vmul.f32 %v244_v1, %v27_v22  ;;  %v133_v31 = vadd.f32 %v263_v6, %v110_v19  ;;  %v94_v3 = vld [vmem:[%s467_s1 + $0x48] sm:$0xff]  ;;  %v34_v12 = vld [vmem:[%s466_s0 + $0x58] sm:$0xff] }
   0x9   :  { %v134_v33 = vadd.f32 %v263_v6, %v111_v21  ;;  %v112_v37 = vmul.f32 %v258_v5, %v89_v23  ;;  %v31_v50 = vld [vmem:[%s466_s0 + $0x40] sm:$0xff]  ;;  %v136_v54 = vadd.f32 %v263_v6, %v113_v43  ;;  %v114_v55 = vmul.f32 %v258_v5, %v91_v39  ;;  %v96_v17 = vld [vmem:[%s467_s1 + $0x58] sm:$0xff]  ;;  %v37_v34 = vld [vmem:[%s466_s0 + $0x70] sm:$0xff] }
   0xa   :  { %v147_v30 = vadd.f32 %v131_v18, %v69_v11  ;;  %v148_v35 = vadd.f32 %v132_v26, %v70_v25  ;;  %v73_v36 = vadd.f32 %v249_v2, %v50_v28  ;;  %v149_v41 = vadd.f32 %v133_v31, %v71_v27  ;;  %v93_v51 = vld [vmem:[%s467_s1 + $0x40] sm:$0xff]  ;;  %v95_v11 = vld [vmem:[%s467_s1 + $0x50] sm:$0xff]  ;;  %v36_v28 = vld [vmem:[%s466_s0 + $0x68] sm:$0xff] }
   0xb   :  { %v150_v42 = vadd.f32 %v134_v33, %v72_v32  ;;  %v135_v47 = vadd.f32 %v263_v6, %v112_v37  ;;  %v75_v58 = vadd.f32 %v249_v2, %v52_v49  ;;  %v53_v59 = vmul.f32 %v244_v1, %v30_v44  ;;  %v35_v22 = vld [vmem:[%s466_s0 + $0x60] sm:$0xff]  ;;  %v98_v33 = vld [vmem:[%s467_s1 + $0x68] sm:$0xff]  ;;  %v99_v43 = vld [vmem:[%s467_s1 + $0x70] sm:$0xff] }
   0xc   :  { %v163_v40 = vmax.f32 %v147_v30, 0.0  ;;  %v164_v46 = vmax.f32 %v148_v35, 0.0  ;;  %v165_v52 = vmax.f32 %v149_v41, 0.0  ;;  %v115_v60 = vmul.f32 %v258_v5, %v92_v45  ;;  %v97_v27 = vld [vmem:[%s467_s1 + $0x60] sm:$0xff]  ;;  %v100_v49 = vld [vmem:[%s467_s1 + $0x78] sm:$0xff] }
   0xd   :  { %v166_v53 = vmax.f32 %v150_v42, 0.0  ;;  %v151_v57 = vadd.f32 %v135_v47, %v73_v36  ;;  %v152_v61 = vadd.f32 %v136_v54, %v74_v48  ;;  %v137_v62 = vadd.f32 %v263_v6, %v114_v55  ;;  %v38_v48 = vld [vmem:[%s466_s0 + $0x78] sm:$0xff] }
   0xe   :  { %179 = vst [vmem:[%s472_s6] sm:$0xff] %v163_v40  ;;  %180 = vst [vmem:[%s472_s6 + $0x8] sm:$0xff] %v164_v46  ;;  %v54_v63 = vmul.f32 %v244_v1, %v31_v50  ;;  %v116_v0 = vmul.f32 %v258_v5, %v93_v51  ;;  %v76_v8 = vadd.f32 %v249_v2, %v53_v59 }
   0xf   :  { %181 = vst [vmem:[%s472_s6 + $0x10] sm:$0xff] %v165_v52  ;;  %182 = vst [vmem:[%s472_s6 + $0x18] sm:$0xff] %v166_v53  ;;  %v167_v7 = vmax.f32 %v151_v57, 0.0  ;;  %v138_v9 = vadd.f32 %v263_v6, %v115_v60  ;;  %v55_v10 = vmul.f32 %v244_v1, %v32_v56  ;;  %v168_v13 = vmax.f32 %v152_v61, 0.0 }
  0x10   :  { %v153_v14 = vadd.f32 %v137_v62, %v75_v58  ;;  %v77_v15 = vadd.f32 %v249_v2, %v54_v63  ;;  %v139_v16 = vadd.f32 %v263_v6, %v116_v0  ;;  %v117_v20 = vmul.f32 %v258_v5, %v94_v3 }
  0x11   :  { %183 = vst [vmem:[%s472_s6 + $0x20] sm:$0xff] %v167_v7  ;;  %v154_v18 = vadd.f32 %v138_v9, %v76_v8  ;;  %v78_v19 = vadd.f32 %v249_v2, %v55_v10  ;;  %v56_v21 = vmul.f32 %v244_v1, %v33_v4  ;;  %184 = vst [vmem:[%s472_s6 + $0x28] sm:$0xff] %v168_v13 }
  0x12   :  { %v169_v23 = vmax.f32 %v153_v14, 0.0  ;;  %v155_v24 = vadd.f32 %v139_v16, %v77_v15  ;;  %v118_v25 = vmul.f32 %v258_v5, %v95_v11  ;;  %v57_v26 = vmul.f32 %v244_v1, %v34_v12 }
  0x13   :  { %v170_v29 = vmax.f32 %v154_v18, 0.0  ;;  %v140_v30 = vadd.f32 %v263_v6, %v117_v20  ;;  %v79_v31 = vadd.f32 %v249_v2, %v56_v21  ;;  %v119_v32 = vmul.f32 %v258_v5, %v96_v17 }
  0x14   :  { %185 = vst [vmem:[%s472_s6 + $0x30] sm:$0xff] %v169_v23  ;;  %v171_v35 = vmax.f32 %v155_v24, 0.0  ;;  %v141_v36 = vadd.f32 %v263_v6, %v118_v25  ;;  %v80_v37 = vadd.f32 %v249_v2, %v57_v26  ;;  %v58_v38 = vmul.f32 %v244_v1, %v35_v22 }
  0x15   :  { %186 = vst [vmem:[%s472_s6 + $0x38] sm:$0xff] %v170_v29  ;;  %v156_v39 = vadd.f32 %v140_v30, %v78_v19  ;;  %v142_v40 = vadd.f32 %v263_v6, %v119_v32  ;;  %v120_v41 = vmul.f32 %v258_v5, %v97_v27  ;;  %v59_v42 = vmul.f32 %v244_v1, %v36_v28 }
  0x16   :  { %187 = vst [vmem:[%s472_s6 + $0x40] sm:$0xff] %v171_v35  ;;  %v157_v44 = vadd.f32 %v141_v36, %v79_v31  ;;  %v81_v45 = vadd.f32 %v249_v2, %v58_v38  ;;  %v121_v46 = vmul.f32 %v258_v5, %v98_v33  ;;  %v60_v47 = vmul.f32 %v244_v1, %v37_v34 }
  0x17   :  { %v172_v50 = vmax.f32 %v156_v39, 0.0  ;;  %v158_v51 = vadd.f32 %v142_v40, %v80_v37  ;;  %v143_v52 = vadd.f32 %v263_v6, %v120_v41  ;;  %v82_v53 = vadd.f32 %v249_v2, %v59_v42 }
  0x18   :  { %v173_v54 = vmax.f32 %v157_v44, 0.0  ;;  %v144_v55 = vadd.f32 %v263_v6, %v121_v46  ;;  %v83_v56 = vadd.f32 %v249_v2, %v60_v47  ;;  %v122_v57 = vmul.f32 %v258_v5, %v99_v43 }
  0x19   :  { %188 = vst [vmem:[%s472_s6 + $0x48] sm:$0xff] %v172_v50  ;;  %v174_v58 = vmax.f32 %v158_v51, 0.0  ;;  %v159_v59 = vadd.f32 %v143_v52, %v81_v45  ;;  %v61_v60 = vmul.f32 %v244_v1, %v38_v48  ;;  %v123_v61 = vmul.f32 %v258_v5, %v100_v49 }
  0x1a   :  { %189 = vst [vmem:[%s472_s6 + $0x50] sm:$0xff] %v173_v54  ;;  %v160_v62 = vadd.f32 %v144_v55, %v82_v53  ;;  %v145_v63 = vadd.f32 %v263_v6, %v122_v57 }
  0x1b   :  { %190 = vst [vmem:[%s472_s6 + $0x58] sm:$0xff] %v174_v58  ;;  %v175_v0 = vmax.f32 %v159_v59, 0.0  ;;  %v84_v3 = vadd.f32 %v249_v2, %v61_v60  ;;  %v146_v4 = vadd.f32 %v263_v6, %v123_v61 }
  0x1c   :  { %v176_v7 = vmax.f32 %v160_v62, 0.0  ;;  %v161_v1 = vadd.f32 %v145_v63, %v83_v56 }
  0x1d   :  { %191 = vst [vmem:[%s472_s6 + $0x60] sm:$0xff] %v175_v0  ;;  %v162_v5 = vadd.f32 %v146_v4, %v84_v3 }
  0x1e   :  { %192 = vst [vmem:[%s472_s6 + $0x68] sm:$0xff] %v176_v7  ;;  %v177_v8 = vmax.f32 %v161_v1, 0.0 }
  0x1f   :  { %v178_v9 = vmax.f32 %v162_v5, 0.0 }
  0x20   :  { %193 = vst [vmem:[%s472_s6 + $0x70] sm:$0xff] %v177_v8 }
  0x21   :  { %194 = vst [vmem:[%s472_s6 + $0x78] sm:$0xff] %v178_v9 }

// kernel: basic_block_2d.4
= control target key start
LH: loop header
LB: loop body
LE: loop exit
PB: predicated region body
PF: predicated region fallthrough
CT: control target
= control target key end

     0   :  { %v1841_v3 = vmov 0.0   ;;  %vm1242_vm0 = vcmask 1040384   ;;  %s2818_s3 = inlined_call_operand.vmem [shape: f32[1152,128], index: 3, kind: input, shape index: {}]   ;;  %s2819_s0 = inlined_call_operand.vmem [shape: f32[2,64,128], index: 0, kind: input, shape index: {}]   ;;  %s2820_s1 = inlined_call_operand.vmem [shape: f32[1,128], index: 1, kind: input, shape index: {}]   ;;  %s2821_s2 = inlined_call_operand.vmem [shape: f32[1,128], index: 2, kind: input, shape index: {}]   ;;  %s2822_s4 = inlined_call_operand.vmem [shape: f32[2,64,128], index: 4, kind: output, shape index: {0}]   ;;  %s2823_s5 = inlined_call_operand.vmem [shape: f32[1,2,128], index: 5, kind: output, shape index: {1}]  }
   0x1   :  { %v315_v0 = vld [vmem:[%s2818_s3 + $0x80] sm:$0xff]  ;;  %v316_v1 = vld [vmem:[%s2818_s3 + $0x88] sm:$0xff]  ;;  %97 = vst [vmem:[#allocation2] sm:$0xff] %v1841_v3  ;;  %98 = vst [vmem:[#allocation2 + $0x8] sm:$0xff] %v1841_v3 }
   0x2   :  { %v347_v2 = vld [vmem:[%s2818_s3 + $0x180] sm:$0xff]  ;;  %99 = vst [vmem:[#allocation2 + $0x10] sm:$0xff] %v1841_v3  ;;  %100 = vst [vmem:[#allocation2 + $0x18] sm:$0xff] %v1841_v3  ;;  %v1663_v4 = vpack.c.bf16 %v316_v1, %v315_v0  ;;  %v348_v5 = vld [vmem:[%s2818_s3 + $0x188] sm:$0xff] }
   0x3   :  { %101 = vst [vmem:[#allocation2 + $0x20] sm:$0xff] %v1841_v3  ;;  %102 = vst [vmem:[#allocation2 + $0x28] sm:$0xff] %v1841_v3  ;;  %v299_v6 = vld [vmem:[%s2818_s3] sm:$0xff]  ;;  %v300_v7 = vld [vmem:[%s2818_s3 + $0x8] sm:$0xff]  ;;  %v1695_v8 = vpack.c.bf16 %v348_v5, %v347_v2 }
   0x4   :  { %103 = vst [vmem:[#allocation2 + $0x30] sm:$0xff] %v1841_v3  ;;  %104 = vst [vmem:[#allocation2 + $0x38] sm:$0xff] %v1841_v3  ;;  %v1665_v9 = vpack.c.bf16 %v300_v7, %v299_v6  ;;  %v331_v10 = vld [vmem:[%s2818_s3 + $0x100] sm:$0xff]  ;;  %v332_v11 = vld [vmem:[%s2818_s3 + $0x108] sm:$0xff]  ;;  %1664 = vmatprep.subr.bf16.mxu0 %v1663_v4 }
   0x5   :  { %105 = vst [vmem:[#allocation2 + $0x40] sm:$0xff] %v1841_v3  ;;  %106 = vst [vmem:[#allocation2 + $0x48] sm:$0xff] %v1841_v3  ;;  %v317_v12 = vld [vmem:[%s2818_s3 + $0x90] sm:$0xff]  ;;  %v1697_v13 = vpack.c.bf16 %v332_v11, %v331_v10  ;;  %v318_v14 = vld [vmem:[%s2818_s3 + $0x98] sm:$0xff]  ;;  %1696 = vmatprep.subr.bf16.mxu1 %v1695_v8 }
   0x6   :  { %107 = vst [vmem:[#allocation2 + $0x50] sm:$0xff] %v1841_v3  ;;  %108 = vst [vmem:[#allocation2 + $0x58] sm:$0xff] %v1841_v3  ;;  %v349_v15 = vld [vmem:[%s2818_s3 + $0x190] sm:$0xff]  ;;  %v350_v16 = vld [vmem:[%s2818_s3 + $0x198] sm:$0xff]  ;;  %1666 = vmatpush3.bf16.msra.mxu0 %v1665_v9  ;;  %v1667_v17 = vpack.c.bf16 %v318_v14, %v317_v12 }
   0x7   :  { %109 = vst [vmem:[#allocation2 + $0x60] sm:$0xff] %v1841_v3  ;;  %110 = vst [vmem:[#allocation2 + $0x68] sm:$0xff] %v1841_v3  ;;  %v1699_v18 = vpack.c.bf16 %v350_v16, %v349_v15  ;;  %v301_v19 = vld [vmem:[%s2818_s3 + $0x10] sm:$0xff]  ;;  %v302_v20 = vld [vmem:[%s2818_s3 + $0x18] sm:$0xff]  ;;  %1698 = vmatpush3.bf16.msra.mxu1 %v1697_v13 }
   0x8   :  { %111 = vst [vmem:[#allocation2 + $0x70] sm:$0xff] %v1841_v3  ;;  %112 = vst [vmem:[#allocation2 + $0x78] sm:$0xff] %v1841_v3  ;;  %v333_v21 = vld [vmem:[%s2818_s3 + $0x110] sm:$0xff]  ;;  %v1669_v22 = vpack.c.bf16 %v302_v20, %v301_v19  ;;  %v334_v23 = vld [vmem:[%s2818_s3 + $0x118] sm:$0xff]  ;;  %1668 = vmatprep.subr.bf16.mxu0 %v1667_v17 }
   0x9   :  { %113 = vst [vmem:[#allocation2 + $0x80] sm:$0xff] %v1841_v3  ;;  %114 = vst [vmem:[#allocation2 + $0x88] sm:$0xff] %v1841_v3  ;;  %v319_v24 = vld [vmem:[%s2818_s3 + $0xa0] sm:$0xff]  ;;  %v320_v25 = vld [vmem:[%s2818_s3 + $0xa8] sm:$0xff]  ;;  %1700 = vmatprep.subr.bf16.mxu1 %v1699_v18  ;;  %v1701_v26 = vpack.c.bf16 %v334_v23, %v333_v21 }
   0xa   :  { %115 = vst [vmem:[#allocation2 + $0x90] sm:$0xff] %v1841_v3  ;;  %116 = vst [vmem:[#allocation2 + $0x98] sm:$0xff] %v1841_v3  ;;  %v1671_v27 = vpack.c.bf16 %v320_v25, %v319_v24  ;;  %v351_v28 = vld [vmem:[%s2818_s3 + $0x1a0] sm:$0xff]  ;;  %v352_v29 = vld [vmem:[%s2818_s3 + $0x1a8] sm:$0xff]  ;;  %1670 = vmatpush3.bf16.msra.mxu0 %v1669_v22 }
   0xb   :  { %117 = vst [vmem:[#allocation2 + $0xa0] sm:$0xff] %v1841_v3  ;;  %118 = vst [vmem:[#allocation2 + $0xa8] sm:$0xff] %v1841_v3  ;;  %v303_v30 = vld [vmem:[%s2818_s3 + $0x20] sm:$0xff]  ;;  %v1703_v31 = vpack.c.bf16 %v352_v29, %v351_v28  ;;  %v304_v32 = vld [vmem:[%s2818_s3 + $0x28] sm:$0xff]  ;;  %1702 = vmatpush3.bf16.msra.mxu1 %v1701_v26 }
   0xc   :  { %119 = vst [vmem:[#allocation2 + $0xb0] sm:$0xff] %v1841_v3  ;;  %120 = vst [vmem:[#allocation2 + $0xb8] sm:$0xff] %v1841_v3  ;;  %v335_v33 = vld [vmem:[%s2818_s3 + $0x120] sm:$0xff]  ;;  %v336_v34 = vld [vmem:[%s2818_s3 + $0x128] sm:$0xff]  ;;  %v1673_v35 = vpack.c.bf16 %v304_v32, %v303_v30  ;;  %1672 = vmatprep.subr.bf16.mxu0 %v1671_v27 }
   0xd   :  { %121 = vst [vmem:[#allocation2 + $0xc0] sm:$0xff] %v1841_v3  ;;  %122 = vst [vmem:[#allocation2 + $0xc8] sm:$0xff] %v1841_v3  ;;  %v321_v36 = vld [vmem:[%s2818_s3 + $0xb0] sm:$0xff]  ;;  %v322_v37 = vld [vmem:[%s2818_s3 + $0xb8] sm:$0xff]  ;;  %v1705_v39 = vpack.c.bf16 %v336_v34, %v335_v33  ;;  %1704 = vmatprep.subr.bf16.mxu1 %v1703_v31 }
   0xe   :  { %123 = vst [vmem:[#allocation2 + $0xd0] sm:$0xff] %v1841_v3  ;;  %124 = vst [vmem:[#allocation2 + $0xd8] sm:$0xff] %v1841_v3  ;;  %v353_v38 = vld [vmem:[%s2818_s3 + $0x1b0] sm:$0xff]  ;;  %v1675_v40 = vpack.c.bf16 %v322_v37, %v321_v36  ;;  %v354_v41 = vld [vmem:[%s2818_s3 + $0x1b8] sm:$0xff]  ;;  %1674 = vmatpush3.bf16.msra.mxu0 %v1673_v35 }
   0xf   :  { %125 = vst [vmem:[#allocation2 + $0xe0] sm:$0xff] %v1841_v3  ;;  %126 = vst [vmem:[#allocation2 + $0xe8] sm:$0xff] %v1841_v3  ;;  %v305_v42 = vld [vmem:[%s2818_s3 + $0x30] sm:$0xff]  ;;  %v306_v43 = vld [vmem:[%s2818_s3 + $0x38] sm:$0xff]  ;;  %v1707_v44 = vpack.c.bf16 %v354_v41, %v353_v38  ;;  %1706 = vmatpush3.bf16.msra.mxu1 %v1705_v39 }
  0x10   :  { %127 = vst [vmem:[#allocation2 + $0xf0] sm:$0xff] %v1841_v3  ;;  %128 = vst [vmem:[#allocation2 + $0xf8] sm:$0xff] %v1841_v3  ;;  %v337_v45 = vld [vmem:[%s2818_s3 + $0x130] sm:$0xff]  ;;  %v338_v46 = vld [vmem:[%s2818_s3 + $0x138] sm:$0xff]  ;;  %v1677_v51 = vpack.c.bf16 %v306_v43, %v305_v42  ;;  %1676 = vmatprep.subr.bf16.mxu0 %v1675_v40 }
  0x11   :  { %129 = vst [vmem:[#allocation2 + $0x100] sm:$0xff] %v1841_v3  ;;  %130 = vst [vmem:[#allocation2 + $0x108] sm:$0xff] %v1841_v3  ;;  %v323_v47 = vld [vmem:[%s2818_s3 + $0xc0] sm:$0xff]  ;;  %v324_v48 = vld [vmem:[%s2818_s3 + $0xc8] sm:$0xff]  ;;  %v1709_v52 = vpack.c.bf16 %v338_v46, %v337_v45  ;;  %1708 = vmatprep.subr.bf16.mxu1 %v1707_v44 }
  0x12   :  { %131 = vst [vmem:[#allocation2 + $0x110] sm:$0xff] %v1841_v3  ;;  %132 = vst [vmem:[#allocation2 + $0x118] sm:$0xff] %v1841_v3  ;;  %v355_v49 = vld [vmem:[%s2818_s3 + $0x1c0] sm:$0xff]  ;;  %v356_v50 = vld [vmem:[%s2818_s3 + $0x1c8] sm:$0xff]  ;;  %v1679_v53 = vpack.c.bf16 %v324_v48, %v323_v47  ;;  %1678 = vmatpush3.bf16.msra.mxu0 %v1677_v51 }
  0x13   :  { %133 = vst [vmem:[#allocation2 + $0x120] sm:$0xff] %v1841_v3  ;;  %134 = vst [vmem:[#allocation2 + $0x128] sm:$0xff] %v1841_v3  ;;  %v307_v54 = vld [vmem:[%s2818_s3 + $0x40] sm:$0xff]  ;;  %v308_v55 = vld [vmem:[%s2818_s3 + $0x48] sm:$0xff]  ;;  %v1711_v57 = vpack.c.bf16 %v356_v50, %v355_v49  ;;  %1710 = vmatpush3.bf16.msra.mxu1 %v1709_v52 }
  0x14   :  { %135 = vst [vmem:[#allocation2 + $0x130] sm:$0xff] %v1841_v3  ;;  %136 = vst [vmem:[#allocation2 + $0x138] sm:$0xff] %v1841_v3  ;;  %v339_v56 = vld [vmem:[%s2818_s3 + $0x140] sm:$0xff]  ;;  %v340_v58 = vld [vmem:[%s2818_s3 + $0x148] sm:$0xff]  ;;  %v1681_v63 = vpack.c.bf16 %v308_v55, %v307_v54  ;;  %1680 = vmatprep.subr.bf16.mxu0 %v1679_v53 }
  0x15   :  { %v325_v59 = vld [vmem:[%s2818_s3 + $0xd0] sm:$0xff]  ;;  %v326_v60 = vld [vmem:[%s2818_s3 + $0xd8] sm:$0xff]  ;;  %v1713_v0 = vpack.c.bf16 %v340_v58, %v339_v56  ;;  %1712 = vmatprep.subr.bf16.mxu1 %v1711_v57  ;;  %v327_v8 = vld [vmem:[%s2818_s3 + $0xe0] sm:$0xff] }
  0x16   :  { %v357_v61 = vld [vmem:[%s2818_s3 + $0x1d0] sm:$0xff]  ;;  %v358_v62 = vld [vmem:[%s2818_s3 + $0x1d8] sm:$0xff]  ;;  %v1683_v1 = vpack.c.bf16 %v326_v60, %v325_v59  ;;  %v328_v9 = vld [vmem:[%s2818_s3 + $0xe8] sm:$0xff]  ;;  %1682 = vmatpush3.bf16.msra.mxu0 %v1681_v63 }
  0x17   :  { %v309_v2 = vld [vmem:[%s2818_s3 + $0x50] sm:$0xff]  ;;  %v310_v4 = vld [vmem:[%s2818_s3 + $0x58] sm:$0xff]  ;;  %v1715_v6 = vpack.c.bf16 %v358_v62, %v357_v61  ;;  %v359_v10 = vld [vmem:[%s2818_s3 + $0x1e0] sm:$0xff]  ;;  %1714 = vmatpush3.bf16.msra.mxu1 %v1713_v0  ;;  %v1687_v18 = vpack.c.bf16 %v328_v9, %v327_v8 }
  0x18   :  { %v341_v5 = vld [vmem:[%s2818_s3 + $0x150] sm:$0xff]  ;;  %v342_v7 = vld [vmem:[%s2818_s3 + $0x158] sm:$0xff]  ;;  %v360_v11 = vld [vmem:[%s2818_s3 + $0x1e8] sm:$0xff]  ;;  %v1685_v13 = vpack.c.bf16 %v310_v4, %v309_v2  ;;  %1684 = vmatprep.subr.bf16.mxu0 %v1683_v1 }
  0x19   :  { %v311_v12 = vld [vmem:[%s2818_s3 + $0x60] sm:$0xff]  ;;  %v312_v14 = vld [vmem:[%s2818_s3 + $0x68] sm:$0xff]  ;;  %v1717_v17 = vpack.c.bf16 %v342_v7, %v341_v5  ;;  %v329_v19 = vld [vmem:[%s2818_s3 + $0xf0] sm:$0xff]  ;;  %1716 = vmatprep.subr.bf16.mxu1 %v1715_v6  ;;  %v1719_v22 = vpack.c.bf16 %v360_v11, %v359_v10 }
  0x1a   :  { %v343_v15 = vld [vmem:[%s2818_s3 + $0x160] sm:$0xff]  ;;  %v344_v16 = vld [vmem:[%s2818_s3 + $0x168] sm:$0xff]  ;;  %v330_v23 = vld [vmem:[%s2818_s3 + $0xf8] sm:$0xff]  ;;  %1686 = vmatpush3.bf16.msra.mxu0 %v1685_v13  ;;  %v1689_v30 = vpack.c.bf16 %v312_v14, %v311_v12 }
  0x1b   :  { %v170_v20 = vld [vmem:[#allocation2 + $0x1] sm:$0xff]  ;;  %v2092_v24 = vld [vmem:[%s2820_s1] ss:$0 sm:$0xff]  ;;  %v361_v26 = vld [vmem:[%s2818_s3 + $0x1f0] sm:$0xff]  ;;  %v1721_v31 = vpack.c.bf16 %v344_v16, %v343_v15  ;;  %1718 = vmatpush3.bf16.msra.mxu1 %v1717_v17  ;;  %1688 = vmatprep.subr.bf16.mxu0 %v1687_v18  ;;  %v1691_v35 = vpack.c.bf16 %v330_v23, %v329_v19 }
  0x1c   :  { %v19_v21 = vld [vmem:[%s2819_s0] sm:$0xff]  ;;  %507 = vmatprep.mubr.f32.mxu0 %v170_v20  ;;  %v362_v27 = vld [vmem:[%s2818_s3 + $0x1f8] sm:$0xff]  ;;  %v313_v28 = vld [vmem:[%s2818_s3 + $0x70] sm:$0xff]  ;;  %1720 = vmatprep.subr.bf16.mxu1 %v1719_v22 }
  0x1d   :  { %v2097_v25 = vld [vmem:[%s2821_s2] ss:$0 sm:$0xff]  ;;  %v42_v29 = vmul.f32 %v2092_v24, %v19_v21  ;;  %v314_v32 = vld [vmem:[%s2818_s3 + $0x78] sm:$0xff]  ;;  %v20_v33 = vld [vmem:[%s2819_s0 + $0x8] sm:$0xff]  ;;  %v1723_v41 = vpack.c.bf16 %v362_v27, %v361_v26 }
  0x1e   :  { %v21_v34 = vld [vmem:[%s2819_s0 + $0x10] sm:$0xff]  ;;  %v346_v37 = vld [vmem:[%s2818_s3 + $0x178] sm:$0xff]  ;;  %v379_v39 = vld [vmem:[%s2818_s3 + $0x280] sm:$0xff]  ;;  %v43_v40 = vmul.f32 %v2092_v24, %v20_v33  ;;  %1690 = vmatpush3.bf16.msra.mxu0 %v1689_v30  ;;  %v1693_v50 = vpack.c.bf16 %v314_v32, %v313_v28 }
  0x1f   :  { %v345_v36 = vld [vmem:[%s2818_s3 + $0x170] sm:$0xff]  ;;  %v65_v38 = vadd.f32 %v2097_v25, %v42_v29  ;;  %v380_v42 = vld [vmem:[%s2818_s3 + $0x288] sm:$0xff]  ;;  %v44_v43 = vmul.f32 %v2092_v24, %v21_v34  ;;  %v22_v44 = vld [vmem:[%s2819_s0 + $0x18] sm:$0xff]  ;;  %1722 = vmatpush3.bf16.msra.mxu1 %v1721_v31  ;;  %1692 = vmatprep.subr.bf16.mxu0 %v1691_v35 }
  0x20   :  { %v23_v45 = vld [vmem:[%s2819_s0 + $0x20] sm:$0xff]  ;;  %v66_v47 = vadd.f32 %v2097_v25, %v43_v40  ;;  %v45_v48 = vmul.f32 %v2092_v24, %v22_v44  ;;  %v412_v53 = vld [vmem:[%s2818_s3 + $0x388] sm:$0xff]  ;;  %v1725_v54 = vpack.c.bf16 %v346_v37, %v345_v36  ;;  %v1727_v55 = vpack.c.bf16 %v380_v42, %v379_v39  ;;  %1724 = vmatprep.subr.bf16.mxu1 %v1723_v41  ;;  %v381_v62 = vld [vmem:[%s2818_s3 + $0x290] sm:$0xff] }
  0x21   :  { %v2139_v46 = vmax.f32 %v65_v38, 0.0  ;;  %v411_v49 = vld [vmem:[%s2818_s3 + $0x380] sm:$0xff]  ;;  %v67_v51 = vadd.f32 %v2097_v25, %v44_v43  ;;  %v46_v52 = vmul.f32 %v2092_v24, %v23_v45  ;;  %v364_v57 = vld [vmem:[%s2818_s3 + $0x208] sm:$0xff]  ;;  %v382_v63 = vld [vmem:[%s2818_s3 + $0x298] sm:$0xff] }
  0x22   :  { %v363_v56 = vld [vmem:[%s2818_s3 + $0x200] sm:$0xff]  ;;  %v2158_v58 = vmax.f32 %v66_v47, 0.0  ;;  %v68_v59 = vadd.f32 %v2097_v25, %v45_v48  ;;  %v24_v60 = vld [vmem:[%s2819_s0 + $0x28] sm:$0xff]  ;;  %v1759_v1 = vpack.c.bf16 %v412_v53, %v411_v49  ;;  %v25_v4 = vld [vmem:[%s2819_s0 + $0x30] sm:$0xff]  ;;  %1694 = vmatpush3.bf16.msra.mxu0 %v1693_v50  ;;  %v1731_v13 = vpack.c.bf16 %v382_v63, %v381_v62 }
  0x23   :  { %138 = vst [vmem:[#allocation2 + $0x11] sm:$0xff] %v2139_v46  ;;  %v2164_v61 = vmax.f32 %v67_v51, 0.0  ;;  %v69_v0 = vadd.f32 %v2097_v25, %v46_v52  ;;  %v47_v2 = vmul.f32 %v2092_v24, %v24_v60  ;;  %v48_v6 = vmul.f32 %v2092_v24, %v25_v4  ;;  %v365_v8 = vld [vmem:[%s2818_s3 + $0x210] sm:$0xff]  ;;  %v366_v9 = vld [vmem:[%s2818_s3 + $0x218] sm:$0xff]  ;;  %1726 = vmatpush3.bf16.msra.mxu1 %v1725_v54  ;;  %v186_v12 = vld [vmem:[#allocation2 + $0x2] sm:$0xff] }
  0x24   :  { %139 = vst [vmem:[#allocation2 + $0x21] sm:$0xff] %v2158_v58  ;;  %v2178_v5 = vmax.f32 %v68_v59, 0.0  ;;  %v1729_v7 = vpack.c.bf16 %v364_v57, %v363_v56  ;;  %1728 = vmatprep.subr.bf16.mxu0 %v1727_v55  ;;  %v383_v14 = vld [vmem:[%s2818_s3 + $0x2a0] sm:$0xff]  ;;  %v26_v16 = vld [vmem:[%s2819_s0 + $0x38] sm:$0xff]  ;;  %v384_v18 = vld [vmem:[%s2818_s3 + $0x2a8] sm:$0xff]  ;;  %1760 = vmatprep.subr.bf16.mxu1 %v1759_v1  ;;  %v1733_v31 = vpack.c.bf16 %v366_v9, %v365_v8 }
  0x25   :  { %140 = vst [vmem:[#allocation2 + $0x31] sm:$0xff] %v2164_v61  ;;  %v2188_v10 = vmax.f32 %v69_v0, 0.0  ;;  %v70_v11 = vadd.f32 %v2097_v25, %v47_v2  ;;  %v71_v15 = vadd.f32 %v2097_v25, %v48_v6  ;;  %v27_v17 = vld [vmem:[%s2819_s0 + $0x40] sm:$0xff]  ;;  %v396_v20 = vld [vmem:[%s2818_s3 + $0x308] sm:$0xff]  ;;  %v49_v22 = vmul.f32 %v2092_v24, %v26_v16  ;;  %508 = vmatmul.mubr.f32.vlgmr.msra.gmra.mrb[0].mxu0 %v1841_v3  ;;  %v413_v28 = vld [vmem:[%s2818_s3 + $0x390] sm:$0xff] }
  0x26   :  { %141 = vst [vmem:[#allocation2 + $0x41] sm:$0xff] %v2178_v5  ;;  %v395_v19 = vld [vmem:[%s2818_s3 + $0x300] sm:$0xff]  ;;  %v50_v23 = vmul.f32 %v2092_v24, %v27_v17  ;;  %v414_v29 = vld [vmem:[%s2818_s3 + $0x398] sm:$0xff]  ;;  %1730 = vmatpush3.bf16.msra.mxu0 %v1729_v7  ;;  %512 = vmatprep.mubr.f32.mxu0 %v2139_v46  ;;  %v368_v32 = vld [vmem:[%s2818_s3 + $0x228] sm:$0xff]  ;;  %v1735_v36 = vpack.c.bf16 %v384_v18, %v383_v14 }
  0x27   :  { %142 = vst [vmem:[#allocation2 + $0x51] sm:$0xff] %v2188_v10  ;;  %v2212_v21 = vmax.f32 %v70_v11, 0.0  ;;  %v2220_v26 = vld [vmem:[%s2818_s3 + $0x220] sm:$0xff]  ;;  %v2222_v27 = vmax.f32 %v71_v15, 0.0  ;;  %v385_v33 = vld [vmem:[%s2818_s3 + $0x2b0] sm:$0xff]  ;;  %v72_v34 = vadd.f32 %v2097_v25, %v49_v22  ;;  %1732 = vmatprep.subr.bf16.mxu0 %v1731_v13  ;;  %v1761_v37 = vpack.c.bf16 %v396_v20, %v395_v19  ;;  %v386_v38 = vld [vmem:[%s2818_s3 + $0x2b8] sm:$0xff] }
  0x28   :  { %v73_v35 = vadd.f32 %v2097_v25, %v50_v23  ;;  %v397_v39 = vld [vmem:[%s2818_s3 + $0x310] sm:$0xff]  ;;  %v28_v40 = vld [vmem:[%s2819_s0 + $0x48] sm:$0xff]  ;;  %v1763_v42 = vpack.c.bf16 %v414_v29, %v413_v28  ;;  %v398_v43 = vld [vmem:[%s2818_s3 + $0x318] sm:$0xff]  ;;  %v1737_v54 = vpack.c.bf16 %v368_v32, %v2220_v26  ;;  %v1739_v56 = vpack.c.bf16 %v386_v38, %v385_v33 }
  0x29   :  { %143 = vst [vmem:[#allocation2 + $0x61] sm:$0xff] %v2212_v21  ;;  %144 = vst [vmem:[#allocation2 + $0x71] sm:$0xff] %v2222_v27  ;;  %v2255_v44 = vmax.f32 %v72_v34, 0.0  ;;  %v51_v47 = vmul.f32 %v2092_v24, %v28_v40  ;;  %v29_v48 = vld [vmem:[%s2819_s0 + $0x50] sm:$0xff]  ;;  %v415_v50 = vld [vmem:[%s2818_s3 + $0x3a0] sm:$0xff]  ;;  %v1765_v60 = vpack.c.bf16 %v398_v43, %v397_v39 }
  0x2a   :  { %v202_v30 = vld [vmem:[#allocation2 + $0x10] sm:$0xff]  ;;  %v2257_v45 = vmax.f32 %v73_v35, 0.0  ;;  %v416_v51 = vld [vmem:[%s2818_s3 + $0x3a8] sm:$0xff]  ;;  %v52_v52 = vmul.f32 %v2092_v24, %v29_v48  ;;  %1734 = vmatpush3.bf16.msra.mxu0 %v1733_v31  ;;  %v370_v59 = vld [vmem:[%s2818_s3 + $0x238] sm:$0xff] }
  0x2b   :  { %652 = vmatprep.mubr.f32.mxu1 %v202_v30  ;;  %v2250_v41 = vld [vmem:[#allocation2 + $0x20] sm:$0xff]  ;;  %513 = vmatmul.mubr.f32.gmra.mrb[2].mxu0 %v202_v30  ;;  %v2264_v49 = vld [vmem:[#allocation2 + $0x12] sm:$0xff]  ;;  %145 = vst [vmem:[#allocation2 + $0x81] sm:$0xff] %v2255_v44  ;;  %v74_v55 = vadd.f32 %v2097_v25, %v51_v47  ;;  %v388_v0 = vld [vmem:[%s2818_s3 + $0x2c8] sm:$0xff]  ;;  %v1767_v1 = vpack.c.bf16 %v416_v51, %v415_v50 }
  0x2c   :  { %653 = vmatmul.mubr.f32.vlgmr.msra.gmra.mrb[0].mxu1 %v186_v12  ;;  %517 = vmatprep.mubr.f32.mxu0 %v2158_v58  ;;  %v2274_v53 = vld [vmem:[#allocation2 + $0x30] sm:$0xff]  ;;  %146 = vst [vmem:[#allocation2 + $0xb1] sm:$0xff] %v2257_v45  ;;  %v387_v62 = vld [vmem:[%s2818_s3 + $0x2c0] sm:$0xff]  ;;  %v75_v63 = vadd.f32 %v2097_v25, %v52_v52  ;;  %v400_v4 = vld [vmem:[%s2818_s3 + $0x328] sm:$0xff] }
  0x2d   :  { %657 = vmatprep.mubr.f32.mxu1 %v2250_v41  ;;  %1736 = vmatprep.subr.bf16.mxu0 %v1735_v36  ;;  %v369_v57 = vld [vmem:[%s2818_s3 + $0x230] sm:$0xff]  ;;  %v399_v2 = vld [vmem:[%s2818_s3 + $0x320] sm:$0xff]  ;;  %v2300_v6 = vmax.f32 %v74_v55, 0.0  ;;  %v418_v11 = vld [vmem:[%s2818_s3 + $0x3b8] sm:$0xff]  ;;  %v1743_v16 = vpack.c.bf16 %v388_v0, %v387_v62 }
  0x2e   :  { %1762 = vmatpush3.bf16.msra.mxu1 %v1761_v37  ;;  %v2304_v7 = vld [vmem:[#allocation2 + $0x22] sm:$0xff]  ;;  %v2306_v8 = vmax.f32 %v75_v63, 0.0  ;;  %v417_v9 = vld [vmem:[%s2818_s3 + $0x3b0] sm:$0xff]  ;;  %1738 = vmatpush3.bf16.msra.mxu0 %v1737_v54  ;;  %v1741_v13 = vpack.c.bf16 %v370_v59, %v369_v57  ;;  %v1769_v17 = vpack.c.bf16 %v400_v4, %v399_v2  ;;  %v30_v19 = vld [vmem:[%s2819_s0 + $0x58] sm:$0xff] }
  0x2f   :  { %1764 = vmatprep.subr.bf16.mxu1 %v1763_v42  ;;  %518 = vmatmul.mubr.f32.gmra.mrb[4].mxu0 %v2250_v41  ;;  %v2315_v12 = vld [vmem:[#allocation2 + $0x40] sm:$0xff]  ;;  %v372_v15 = vld [vmem:[%s2818_s3 + $0x248] sm:$0xff]  ;;  %147 = vst [vmem:[#allocation2 + $0xc1] sm:$0xff] %v2300_v6  ;;  %v389_v18 = vld [vmem:[%s2818_s3 + $0x2d0] sm:$0xff]  ;;  %v1771_v23 = vpack.c.bf16 %v418_v11, %v417_v9  ;;  %v53_v29 = vmul.f32 %v2092_v24, %v30_v19 }
  0x30   :  { %658 = vmatmul.mubr.f32.gmra.mrb[2].mxu1 %v2264_v49  ;;  %522 = vmatprep.mubr.f32.mxu0 %v2164_v61  ;;  %v371_v14 = vld [vmem:[%s2818_s3 + $0x240] sm:$0xff]  ;;  %148 = vst [vmem:[#allocation2 + $0xd1] sm:$0xff] %v2306_v8  ;;  %v390_v22 = vld [vmem:[%s2818_s3 + $0x2d8] sm:$0xff]  ;;  %v401_v26 = vld [vmem:[%s2818_s3 + $0x330] sm:$0xff] }
  0x31   :  { %662 = vmatprep.mubr.f32.mxu1 %v2274_v53  ;;  %1740 = vmatprep.subr.bf16.mxu0 %v1739_v56  ;;  %v31_v20 = vld [vmem:[%s2819_s0 + $0x60] sm:$0xff]  ;;  %v402_v28 = vld [vmem:[%s2818_s3 + $0x338] sm:$0xff]  ;;  %v420_v33 = vld [vmem:[%s2818_s3 + $0x3c8] sm:$0xff]  ;;  %v1745_v35 = vpack.c.bf16 %v372_v15, %v371_v14  ;;  %v76_v37 = vadd.f32 %v2097_v25, %v53_v29  ;;  %v1747_v40 = vpack.c.bf16 %v390_v22, %v389_v18 }
  0x32   :  { %1766 = vmatpush3.bf16.msra.mxu1 %v1765_v60  ;;  %v54_v30 = vmul.f32 %v2092_v24, %v31_v20  ;;  %v2348_v31 = vld [vmem:[#allocation2 + $0x32] sm:$0xff]  ;;  %v419_v32 = vld [vmem:[%s2818_s3 + $0x3c0] sm:$0xff]  ;;  %1742 = vmatpush3.bf16.msra.mxu0 %v1741_v13  ;;  %v1773_v43 = vpack.c.bf16 %v402_v28, %v401_v26  ;;  %v32_v48 = vld [vmem:[%s2819_s0 + $0x68] sm:$0xff] }
  0x33   :  { %1768 = vmatprep.subr.bf16.mxu1 %v1767_v1  ;;  %523 = vmatmul.mubr.f32.gmra.mrb[6].mxu0 %v2274_v53  ;;  %v2357_v34 = vld [vmem:[#allocation2 + $0x50] sm:$0xff]  ;;  %v2364_v39 = vld [vmem:[#allocation2 + $0x42] sm:$0xff]  ;;  %v374_v42 = vld [vmem:[%s2818_s3 + $0x258] sm:$0xff]  ;;  %v2376_v50 = vmax.f32 %v76_v37, 0.0  ;;  %v1775_v54 = vpack.c.bf16 %v420_v33, %v419_v32  ;;  %v55_v57 = vmul.f32 %v2092_v24, %v32_v48 }
  0x34   :  { %663 = vmatmul.mubr.f32.gmra.mrb[4].mxu1 %v2304_v7  ;;  %527 = vmatprep.mubr.f32.mxu0 %v2178_v5  ;;  %v373_v36 = vld [vmem:[%s2818_s3 + $0x250] sm:$0xff]  ;;  %v77_v38 = vadd.f32 %v2097_v25, %v54_v30  ;;  %v391_v47 = vld [vmem:[%s2818_s3 + $0x2e0] sm:$0xff]  ;;  %v392_v52 = vld [vmem:[%s2818_s3 + $0x2e8] sm:$0xff] }
  0x35   :  { %667 = vmatprep.mubr.f32.mxu1 %v2315_v12  ;;  %1744 = vmatprep.subr.bf16.mxu0 %v1743_v16  ;;  %v403_v55 = vld [vmem:[%s2818_s3 + $0x340] sm:$0xff]  ;;  %v404_v56 = vld [vmem:[%s2818_s3 + $0x348] sm:$0xff]  ;;  %v421_v59 = vld [vmem:[%s2818_s3 + $0x3d0] sm:$0xff]  ;;  %v1749_v0 = vpack.c.bf16 %v374_v42, %v373_v36  ;;  %149 = vst [vmem:[#allocation2 + $0xe1] sm:$0xff] %v2376_v50  ;;  %v78_v1 = vadd.f32 %v2097_v25, %v55_v57 }
  0x36   :  { %1770 = vmatpush3.bf16.msra.mxu1 %v1769_v17  ;;  %v2378_v51 = vmax.f32 %v77_v38, 0.0  ;;  %v422_v60 = vld [vmem:[%s2818_s3 + $0x3d8] sm:$0xff]  ;;  %v33_v62 = vld [vmem:[%s2819_s0 + $0x70] sm:$0xff]  ;;  %v2402_v63 = vld [vmem:[#allocation2 + $0x60] sm:$0xff]  ;;  %1746 = vmatpush3.bf16.msra.mxu0 %v1745_v35  ;;  %v1751_v9 = vpack.c.bf16 %v392_v52, %v391_v47  ;;  %v1777_v14 = vpack.c.bf16 %v404_v56, %v403_v55 }
  0x37   :  { %1772 = vmatprep.subr.bf16.mxu1 %v1771_v23  ;;  %528 = vmatmul.mubr.f32.gmra.mrb[8].mxu0 %v2315_v12  ;;  %v56_v2 = vmul.f32 %v2092_v24, %v33_v62  ;;  %v2408_v4 = vld [vmem:[#allocation2 + $0x52] sm:$0xff]  ;;  %v375_v11 = vld [vmem:[%s2818_s3 + $0x260] sm:$0xff]  ;;  %v376_v13 = vld [vmem:[%s2818_s3 + $0x268] sm:$0xff]  ;;  %v2420_v16 = vmax.f32 %v78_v1, 0.0  ;;  %v1779_v17 = vpack.c.bf16 %v422_v60, %v421_v59 }
  0x38   :  { %668 = vmatmul.mubr.f32.gmra.mrb[6].mxu1 %v2348_v31  ;;  %532 = vmatprep.mubr.f32.mxu0 %v2188_v10  ;;  %150 = vst [vmem:[#allocation2 + $0xf1] sm:$0xff] %v2378_v51  ;;  %v405_v15 = vld [vmem:[%s2818_s3 + $0x350] sm:$0xff]  ;;  %v406_v18 = vld [vmem:[%s2818_s3 + $0x358] sm:$0xff]  ;;  %v423_v23 = vld [vmem:[%s2818_s3 + $0x3e0] sm:$0xff]  ;;  %v1753_v30 = vpack.c.bf16 %v376_v13, %v375_v11 }
  0x39   :  { %672 = vmatprep.mubr.f32.mxu1 %v2357_v34  ;;  %1748 = vmatprep.subr.bf16.mxu0 %v1747_v40  ;;  %v79_v19 = vadd.f32 %v2097_v25, %v56_v2  ;;  %v393_v20 = vld [vmem:[%s2818_s3 + $0x2f0] sm:$0xff]  ;;  %v394_v22 = vld [vmem:[%s2818_s3 + $0x2f8] sm:$0xff]  ;;  %v424_v26 = vld [vmem:[%s2818_s3 + $0x3e8] sm:$0xff]  ;;  %151 = vst [vmem:[#allocation2 + $0x101] sm:$0xff] %v2420_v16  ;;  %v1781_v35 = vpack.c.bf16 %v406_v18, %v405_v15 }
  0x3a   :  { %1774 = vmatpush3.bf16.msra.mxu1 %v1773_v43  ;;  %v34_v28 = vld [vmem:[%s2819_s0 + $0x78] sm:$0xff]  ;;  %v2444_v29 = vld [vmem:[#allocation2 + $0x70] sm:$0xff]  ;;  %1750 = vmatpush3.bf16.msra.mxu0 %v1749_v0  ;;  %v1755_v36 = vpack.c.bf16 %v394_v22, %v393_v20  ;;  %v407_v40 = vld [vmem:[%s2818_s3 + $0x360] sm:$0xff] }
  0x3b   :  { %1776 = vmatprep.subr.bf16.mxu1 %v1775_v54  ;;  %533 = vmatmul.mubr.f32.gmra.mrb[10].mxu0 %v2357_v34  ;;  %v2447_v32 = vmax.f32 %v79_v19, 0.0  ;;  %v57_v33 = vmul.f32 %v2092_v24, %v34_v28  ;;  %v377_v37 = vld [vmem:[%s2818_s3 + $0x270] sm:$0xff]  ;;  %v378_v38 = vld [vmem:[%s2818_s3 + $0x278] sm:$0xff]  ;;  %v1783_v24 = vpack.c.bf16 %v424_v26, %v423_v23  ;;  %v408_v42 = vld [vmem:[%s2818_s3 + $0x368] sm:$0xff] }
  0x3c   :  { %673 = vmatmul.mubr.f32.gmra.mrb[8].mxu1 %v2364_v39  ;;  %537 = vmatprep.mubr.f32.mxu0 %v2212_v21  ;;  %v427_v47 = vld [vmem:[%s2818_s3 + $0x400] sm:$0xff]  ;;  %v428_v48 = vld [vmem:[%s2818_s3 + $0x408] sm:$0xff]  ;;  %v425_v54 = vld [vmem:[%s2818_s3 + $0x3f0] sm:$0xff]  ;;  %v1757_v56 = vpack.c.bf16 %v378_v38, %v377_v37  ;;  %v1785_v60 = vpack.c.bf16 %v408_v42, %v407_v40 }
  0x3d   :  { %677 = vmatprep.mubr.f32.mxu1 %v2402_v63  ;;  %1752 = vmatprep.subr.bf16.mxu0 %v1751_v9  ;;  %152 = vst [vmem:[#allocation2 + $0x111] sm:$0xff] %v2447_v32  ;;  %v80_v43 = vadd.f32 %v2097_v25, %v57_v33  ;;  %v2473_v52 = vld [vmem:[#allocation2 + $0x62] sm:$0xff]  ;;  %v426_v25 = vld [vmem:[%s2818_s3 + $0x3f8] sm:$0xff]  ;;  %v2486_v62 = vpack.c.bf16 %v428_v48, %v427_v47  ;;  %v409_v1 = vld [vmem:[%s2818_s3 + $0x370] sm:$0xff] }
  0x3e   :  { %1778 = vmatpush3.bf16.msra.mxu1 %v1777_v14  ;;  %v2482_v55 = vld [vmem:[#allocation2 + $0x80] sm:$0xff]  ;;  %1754 = vmatpush3.bf16.msra.mxu0 %v1753_v30  ;;  %v1787_v0 = vpack.c.bf16 %v426_v25, %v425_v54  ;;  %v410_v2 = vld [vmem:[%s2818_s3 + $0x378] sm:$0xff]  ;;  %v210_v11 = vld [vmem:[#allocation2 + $0xb0] sm:$0xff] }
  0x3f   :  { %1780 = vmatprep.subr.bf16.mxu1 %v1779_v17  ;;  %538 = vmatmul.mubr.f32.gmra.mrb[12].mxu0 %v2402_v63  ;;  %v2484_v57 = vmax.f32 %v80_v43, 0.0  ;;  %v178_v59 = vld [vmem:[#allocation2 + $0xa1] sm:$0xff]  ;;  %v2498_v9 = vld [vmem:[#allocation2 + $0x72] sm:$0xff]  ;;  %v1789_v13 = vpack.c.bf16 %v410_v2, %v409_v1 }
  0x40   :  { %678 = vmatmul.mubr.f32.gmra.mrb[10].mxu1 %v2408_v4  ;;  %542 = vmatprep.mubr.f32.mxu0 %v2222_v27  ;;  %v194_v14 = vld [vmem:[#allocation2 + $0xa2] sm:$0xff]  ;;  %v2508_v17 = vld [vmem:[#allocation2 + $0xb2] sm:$0xff] }
  0x41   :  { %682 = vmatprep.mubr.f32.mxu1 %v2444_v29  ;;  %1756 = vmatprep.subr.bf16.mxu0 %v1755_v36  ;;  %153 = vst [vmem:[#allocation2 + $0x121] sm:$0xff] %v2484_v57  ;;  %v2504_v15 = vld [vmem:[#allocation2 + $0xc0] sm:$0xff]  ;;  %v2511_v18 = vld [vmem:[#allocation2 + $0xd0] sm:$0xff]  ;;  %v430_v37 = vld [vmem:[%s2818_s3 + $0x418] sm:$0xff] }
  0x42   :  { %1782 = vmatpush3.bf16.msra.mxu1 %v1781_v35  ;;  %1758 = vmatpush3.bf16.msra.mxu0 %v1757_v56  ;;  %v2519_v19 = vld [vmem:[#allocation2 + $0xe0] sm:$0xff]  ;;  %v2524_v20 = vld [vmem:[#allocation2 + $0xd2] sm:$0xff]  ;;  %v432_v42 = vld [vmem:[%s2818_s3 + $0x428] sm:$0xff] }
  0x43   :  { %1784 = vmatprep.subr.bf16.mxu1 %v1783_v24  ;;  %543 = vmatmul.mubr.f32.gmra.mrb[14].mxu0 %v2444_v29  ;;  %v2527_v22 = vld [vmem:[#allocation2 + $0xf0] sm:$0xff]  ;;  %v2532_v23 = vld [vmem:[#allocation2 + $0xe2] sm:$0xff]  ;;  %v434_v47 = vld [vmem:[%s2818_s3 + $0x438] sm:$0xff] }
  0x44   :  { %683 = vmatmul.mubr.f32.gmra.mrb[12].mxu1 %v2473_v52  ;;  %547 = vmatprep.mubr.f32.mxu0 %v178_v59  ;;  %v2535_v26 = vld [vmem:[#allocation2 + $0x100] sm:$0xff]  ;;  %v2540_v28 = vld [vmem:[#allocation2 + $0xf2] sm:$0xff]  ;;  %v436_v48 = vld [vmem:[%s2818_s3 + $0x448] sm:$0xff] }
  0x45   :  { %687 = vmatprep.mubr.f32.mxu1 %v2482_v55  ;;  %1792 = vmatprep.subr.bf16.mxu0 %v2486_v62  ;;  %v2543_v30 = vld [vmem:[#allocation2 + $0x110] sm:$0xff]  ;;  %v2548_v33 = vld [vmem:[#allocation2 + $0x102] sm:$0xff]  ;;  %v438_v54 = vld [vmem:[%s2818_s3 + $0x458] sm:$0xff] }
  0x46   :  { %1786 = vmatpush3.bf16.msra.mxu1 %v1785_v60  ;;  %v429_v36 = vld [vmem:[%s2818_s3 + $0x410] sm:$0xff]  ;;  %v431_v24 = vld [vmem:[%s2818_s3 + $0x420] sm:$0xff]  ;;  %v440_v25 = vld [vmem:[%s2818_s3 + $0x468] sm:$0xff] }
  0x47   :  { %1788 = vmatprep.subr.bf16.mxu1 %v1787_v0  ;;  %548 = vmatmul.mubr.f32.gmra.mrb[16].mxu0 %v1841_v3  ;;  %v2516_v3 = vld [vmem:[#allocation2 + $0xc2] sm:$0xff]  ;;  %v2562_v38 = vld [vmem:[#allocation2 + $0x112] sm:$0xff]  ;;  %v1795_v40 = vpack.c.bf16 %v430_v37, %v429_v36 }
  0x48   :  { %688 = vmatmul.mubr.f32.gmra.mrb[14].mxu1 %v2498_v9  ;;  %552 = vmatprep.mubr.f32.mxu0 %v2257_v45  ;;  %v2551_v35 = vld [vmem:[#allocation2 + $0x120] sm:$0xff]  ;;  %v433_v43 = vld [vmem:[%s2818_s3 + $0x430] sm:$0xff]  ;;  %v442_v56 = vld [vmem:[%s2818_s3 + $0x478] sm:$0xff] }
  0x49   :  { %692 = vmatprep.mubr.f32.mxu1 %v210_v11  ;;  %v274_v59 = vld [vmem:[#allocation2 + $0x91] sm:$0xff] }
  0x4a   :  { %1790 = vmatpush3.bf16.msra.mxu1 %v1789_v13 }
  0x4b   :  { %1823 = vmatprep.subr.bf16.mxu1 %v2486_v62  ;;  %553 = vmatmul.mubr.f32.gmra.mrb[18].mxu0 %v210_v11 }
  0x4c   :  { %693 = vmatmul.mubr.f32.gmra.mrb[16].mxu1 %v194_v14  ;;  %557 = vmatprep.mubr.f32.mxu0 %v2300_v6 }
  0x4d   :  { %697 = vmatprep.mubr.f32.mxu1 %v2504_v15 }
  0x4f   :  { %558 = vmatmul.mubr.f32.gmra.mrb[20].mxu0 %v2504_v15 }
  0x50   :  { %698 = vmatmul.mubr.f32.gmra.mrb[18].mxu1 %v2508_v17  ;;  %562 = vmatprep.mubr.f32.mxu0 %v2306_v8 }
  0x51   :  { %702 = vmatprep.mubr.f32.mxu1 %v2511_v18 }
  0x53   :  { %563 = vmatmul.mubr.f32.gmra.mrb[22].mxu0 %v2511_v18 }
  0x54   :  { %703 = vmatmul.mubr.f32.gmra.mrb[20].mxu1 %v2516_v3  ;;  %567 = vmatprep.mubr.f32.mxu0 %v2376_v50 }
  0x55   :  { %707 = vmatprep.mubr.f32.mxu1 %v2519_v19 }
  0x57   :  { %568 = vmatmul.mubr.f32.gmra.mrb[24].mxu0 %v2519_v19 }
  0x58   :  { %708 = vmatmul.mubr.f32.gmra.mrb[22].mxu1 %v2524_v20  ;;  %572 = vmatprep.mubr.f32.mxu0 %v2378_v51 }
  0x59   :  { %712 = vmatprep.mubr.f32.mxu1 %v2527_v22 }
  0x5b   :  { %573 = vmatmul.mubr.f32.gmra.mrb[26].mxu0 %v2527_v22 }
  0x5c   :  { %713 = vmatmul.mubr.f32.gmra.mrb[24].mxu1 %v2532_v23  ;;  %577 = vmatprep.mubr.f32.mxu0 %v2420_v16 }
  0x5d   :  { %717 = vmatprep.mubr.f32.mxu1 %v2535_v26 }
  0x5f   :  { %578 = vmatmul.mubr.f32.gmra.mrb[28].mxu0 %v2535_v26 }
  0x60   :  { %718 = vmatmul.mubr.f32.gmra.mrb[26].mxu1 %v2540_v28  ;;  %582 = vmatprep.mubr.f32.mxu0 %v2447_v32 }
  0x61   :  { %722 = vmatprep.mubr.f32.mxu1 %v2543_v30 }
  0x63   :  { %583 = vmatmul.mubr.f32.gmra.mrb[30].mxu0 %v2543_v30 }
  0x64   :  { %723 = vmatmul.mubr.f32.gmra.mrb[28].mxu1 %v2548_v33  ;;  %797 = vmatprep.mubr.f32.mxu0 %v2264_v49  ;;  %v1799_v49 = vpack.c.bf16 %v432_v42, %v431_v24 }
  0x65   :  { %727 = vmatprep.mubr.f32.mxu1 %v2551_v35 }
  0x67   :  { %798 = vmatmul.mubr.f32.vlgmr.msra.gmra.mrb[32].mxu0 %v2139_v46  ;;  %v1803_v46 = vpack.c.bf16 %v434_v47, %v433_v43 }
  0x68   :  { %728 = vmatmul.mubr.f32.gmra.mrb[30].mxu1 %v2562_v38  ;;  %1794 = vmatpush3.bf16.msra.mxu0 %v2486_v62 }
  0x69   :  { %942 = vmatprep.mubr.f32.mxu1 %v2158_v58  ;;  %802 = vmatprep.mubr.f32.mxu0 %v2304_v7 }
  0x6a   :  { %1796 = vmatprep.subr.bf16.mxu0 %v1795_v40 }
  0x6b   :  { %803 = vmatmul.mubr.f32.gmra.mrb[34].mxu0 %v2158_v58 }
  0x6c   :  { %943 = vmatmul.mubr.f32.vlgmr.msra.gmra.mrb[32].mxu1 %v2250_v41  ;;  %807 = vmatprep.mubr.f32.mxu0 %v2348_v31  ;;  %v435_v41 = vld [vmem:[%s2818_s3 + $0x440] sm:$0xff] }
  0x6d   :  { %947 = vmatprep.mubr.f32.mxu1 %v2164_v61  ;;  %1798 = vmatpush3.bf16.msra.mxu0 %v1795_v40  ;;  %v1807_v58 = vpack.c.bf16 %v436_v48, %v435_v41 }
  0x6e   :  { %1800 = vmatprep.subr.bf16.mxu0 %v1799_v49  ;;  %1831 = vmatpush3.bf16.msra.mxu1 %v2486_v62 }
  0x6f   :  { %1824 = vmatprep.subr.bf16.mxu1 %v1795_v40  ;;  %808 = vmatmul.mubr.f32.gmra.mrb[36].mxu0 %v2164_v61 }
  0x70   :  { %948 = vmatmul.mubr.f32.gmra.mrb[34].mxu1 %v2274_v53  ;;  %812 = vmatprep.mubr.f32.mxu0 %v2364_v39  ;;  %v437_v53 = vld [vmem:[%s2818_s3 + $0x450] sm:$0xff] }
  0x71   :  { %952 = vmatprep.mubr.f32.mxu1 %v2178_v5  ;;  %1802 = vmatpush3.bf16.msra.mxu0 %v1799_v49  ;;  %v1811_v61 = vpack.c.bf16 %v438_v54, %v437_v53 }
  0x72   :  { %1804 = vmatprep.subr.bf16.mxu0 %v1803_v46  ;;  %1832 = vmatpush3.bf16.msra.mxu1 %v1795_v40 }
  0x73   :  { %1825 = vmatprep.subr.bf16.mxu1 %v1799_v49  ;;  %813 = vmatmul.mubr.f32.gmra.mrb[38].mxu0 %v2178_v5 }
  0x74   :  { %953 = vmatmul.mubr.f32.gmra.mrb[36].mxu1 %v2315_v12  ;;  %817 = vmatprep.mubr.f32.mxu0 %v2408_v4  ;;  %v439_v12 = vld [vmem:[%s2818_s3 + $0x460] sm:$0xff] }
  0x75   :  { %957 = vmatprep.mubr.f32.mxu1 %v2188_v10  ;;  %1806 = vmatpush3.bf16.msra.mxu0 %v1803_v46  ;;  %v1815_v5 = vpack.c.bf16 %v440_v25, %v439_v12 }
  0x76   :  { %1808 = vmatprep.subr.bf16.mxu0 %v1807_v58  ;;  %1833 = vmatpush3.bf16.msra.mxu1 %v1799_v49 }
  0x77   :  { %1826 = vmatprep.subr.bf16.mxu1 %v1803_v46  ;;  %818 = vmatmul.mubr.f32.gmra.mrb[40].mxu0 %v2188_v10  ;;  %v2627_v10 = vld [vmem:[#allocation2 + $0x82] sm:$0xff] }
  0x78   :  { %958 = vmatmul.mubr.f32.gmra.mrb[38].mxu1 %v2357_v34  ;;  %822 = vmatprep.mubr.f32.mxu0 %v2473_v52  ;;  %v441_v34 = vld [vmem:[%s2818_s3 + $0x470] sm:$0xff] }
  0x79   :  { %962 = vmatprep.mubr.f32.mxu1 %v2212_v21  ;;  %1810 = vmatpush3.bf16.msra.mxu0 %v1807_v58 }
  0x7a   :  { %1812 = vmatprep.subr.bf16.mxu0 %v1811_v61  ;;  %1834 = vmatpush3.bf16.msra.mxu1 %v1803_v46 }
  0x7b   :  { %1827 = vmatprep.subr.bf16.mxu1 %v1807_v58  ;;  %823 = vmatmul.mubr.f32.gmra.mrb[42].mxu0 %v2212_v21  ;;  %v1840_v21 = vld [vmem:[#allocation2] sm:$0xff] }
  0x7c   :  { %963 = vmatmul.mubr.f32.gmra.mrb[40].mxu1 %v2402_v63  ;;  %827 = vmatprep.mubr.f32.mxu0 %v2498_v9  ;;  %v1819_v63 = vpack.c.bf16 %v442_v56, %v441_v34 }
  0x7d   :  { %967 = vmatprep.mubr.f32.mxu1 %v2222_v27  ;;  %1814 = vmatpush3.bf16.msra.mxu0 %v1811_v61 }
  0x7e   :  { %1816 = vmatprep.subr.bf16.mxu0 %v1815_v5  ;;  %1835 = vmatpush3.bf16.msra.mxu1 %v1807_v58 }
  0x7f   :  { %1828 = vmatprep.subr.bf16.mxu1 %v1811_v61  ;;  %828 = vmatmul.mubr.f32.gmra.mrb[44].mxu0 %v2222_v27  ;;  %v249_v27 = vld [vmem:[#allocation2 + $0x122] sm:$0xff] }
  0x80   :  { %968 = vmatmul.mubr.f32.gmra.mrb[42].mxu1 %v2444_v29  ;;  %832 = vmatprep.mubr.f32.mxu0 %v2627_v10 }
  0x81   :  { %972 = vmatprep.mubr.f32.mxu1 %v2255_v44  ;;  %1818 = vmatpush3.bf16.msra.mxu0 %v1815_v5 }
  0x82   :  { %1836 = vmatpush3.bf16.msra.mxu1 %v1811_v61  ;;  %1820 = vmatprep.subr.bf16.mxu0 %v1819_v63 }
  0x83   :  { %1829 = vmatprep.subr.bf16.mxu1 %v1815_v5  ;;  %833 = vmatmul.mubr.f32.gmra.mrb[46].mxu0 %v2255_v44  ;;  %v282_v44 = vld [vmem:[#allocation2 + $0x131] sm:$0xff] }
  0x84   :  { %973 = vmatmul.mubr.f32.gmra.mrb[44].mxu1 %v2482_v55  ;;  %837 = vmatprep.mubr.f32.mxu0 %v2508_v17 }
  0x85   :  { %977 = vmatprep.mubr.f32.mxu1 %v274_v59  ;;  %1822 = vmatpush3.bf16.msra.mxu0 %v1819_v63 }
  0x86   :  { %1837 = vmatpush3.bf16.msra.mxu1 %v1815_v5 }
  0x87   :  { %1830 = vmatprep.subr.bf16.mxu1 %v1819_v63  ;;  %838 = vmatmul.mubr.f32.gmra.mrb[48].mxu0 %v2257_v45  ;;  %v290_v45 = vld [vmem:[#allocation2 + $0x92] sm:$0xff] }
  0x88   :  { %978 = vmatmul.mubr.f32.gmra.mrb[46].mxu1 %v1840_v21  ;;  %842 = vmatprep.mubr.f32.mxu0 %v2516_v3 }
  0x89   :  { %982 = vmatprep.mubr.f32.mxu1 %v2300_v6 }
  0x8a   :  { %1838 = vmatpush3.bf16.msra.mxu1 %v1819_v63 }
  0x8b   :  { %843 = vmatmul.mubr.f32.gmra.mrb[50].mxu0 %v2300_v6  ;;  %v298_v6 = vld [vmem:[#allocation2 + $0x132] sm:$0xff] }
  0x8c   :  { %983 = vmatmul.mubr.f32.gmra.mrb[48].mxu1 %v2504_v15  ;;  %847 = vmatprep.mubr.f32.mxu0 %v2524_v20 }
  0x8d   :  { %987 = vmatprep.mubr.f32.mxu1 %v2306_v8 }
  0x8f   :  { %848 = vmatmul.mubr.f32.gmra.mrb[52].mxu0 %v2306_v8 }
  0x90   :  { %988 = vmatmul.mubr.f32.gmra.mrb[50].mxu1 %v2511_v18  ;;  %852 = vmatprep.mubr.f32.mxu0 %v2532_v23 }
  0x91   :  { %992 = vmatprep.mubr.f32.mxu1 %v2376_v50 }
  0x93   :  { %853 = vmatmul.mubr.f32.gmra.mrb[54].mxu0 %v2376_v50 }
  0x94   :  { %993 = vmatmul.mubr.f32.gmra.mrb[52].mxu1 %v2519_v19  ;;  %857 = vmatprep.mubr.f32.mxu0 %v2540_v28 }
  0x95   :  { %997 = vmatprep.mubr.f32.mxu1 %v2378_v51 }
  0x97   :  { %858 = vmatmul.mubr.f32.gmra.mrb[56].mxu0 %v2378_v51 }
  0x98   :  { %998 = vmatmul.mubr.f32.gmra.mrb[54].mxu1 %v2527_v22  ;;  %862 = vmatprep.mubr.f32.mxu0 %v2548_v33 }
  0x99   :  { %1002 = vmatprep.mubr.f32.mxu1 %v2420_v16 }
  0x9b   :  { %863 = vmatmul.mubr.f32.gmra.mrb[58].mxu0 %v2420_v16 }
  0x9c   :  { %1003 = vmatmul.mubr.f32.gmra.mrb[56].mxu1 %v2535_v26  ;;  %867 = vmatprep.mubr.f32.mxu0 %v2562_v38 }
  0x9d   :  { %1007 = vmatprep.mubr.f32.mxu1 %v2447_v32 }
  0x9f   :  { %868 = vmatmul.mubr.f32.gmra.mrb[60].mxu0 %v2447_v32 }
  0xa0   :  { %1008 = vmatmul.mubr.f32.gmra.mrb[58].mxu1 %v2543_v30  ;;  %872 = vmatprep.mubr.f32.mxu0 %v249_v27 }
  0xa1   :  { %1012 = vmatprep.mubr.f32.mxu1 %v2484_v57 }
  0xa3   :  { %873 = vmatmul.mubr.f32.gmra.mrb[62].mxu0 %v2484_v57 }
  0xa4   :  { %1013 = vmatmul.mubr.f32.gmra.mrb[60].mxu1 %v2551_v35  ;;  %1639 = vmatprep.mubr.f32.mxu0 %v2304_v7 }
  0xa5   :  { %1017 = vmatprep.mubr.f32.mxu1 %v282_v44 }
  0xa7   :  { %1640 = vmatmul.mubr.f32.vlgmr.msra.gmra.mrb[64].mxu0 %v2348_v31 }
  0xa8   :  { %1018 = vmatmul.mubr.f32.gmra.mrb[62].mxu1 %v1840_v21  ;;  %1642 = vmatprep.mubr.f32.mxu0 %v2364_v39 }
  0xa9   :  { %1651 = vmatprep.mubr.f32.mxu1 %v2516_v3 }
  0xab   :  { %1643 = vmatmul.mubr.f32.gmra.mrb[66].mxu0 %v2408_v4 }
  0xac   :  { %1652 = vmatmul.mubr.f32.vlgmr.msra.gmra.mrb[64].mxu1 %v2524_v20  ;;  %1645 = vmatprep.mubr.f32.mxu0 %v2473_v52 }
  0xad   :  { %1654 = vmatprep.mubr.f32.mxu1 %v2532_v23 }
  0xaf   :  { %1646 = vmatmul.mubr.f32.gmra.mrb[68].mxu0 %v2498_v9 }
  0xb0   :  { %1655 = vmatmul.mubr.f32.gmra.mrb[66].mxu1 %v2540_v28  ;;  %1648 = vmatprep.mubr.f32.mxu0 %v2627_v10 }
  0xb1   :  { %1657 = vmatprep.mubr.f32.mxu1 %v2548_v33 }
  0xb3   :  { %1649 = vmatmul.mubr.f32.gmra.mrb[70].mxu0 %v290_v45 }
  0xb4   :  { %1658 = vmatmul.mubr.f32.gmra.mrb[68].mxu1 %v2562_v38 }
  0xb5   :  { %1660 = vmatprep.mubr.f32.mxu1 %v249_v27 }
  0xb8   :  { %1661 = vmatmul.mubr.f32.gmra.mrb[70].mxu1 %v298_v6 }
  0xf8   :  { %v1287_v7 = vpop.f32.mrb[0].mxu0 }
  0xf9   :  { %v1288_v8 = vpop.f32.mrb[1].mxu0 }
  0xfa   :  { %v1289_v31 = vadd.f32 %v1288_v8, %v1287_v7 }
  0xfe   :  { %v1290_v51 = vpop.f32.mrb[2].mxu0 }
  0xff   :  { %v1367_v39 = vpop.f32.mrb[0].mxu1  ;;  %v1291_v16 = vpop.f32.mrb[3].mxu0 }
 0x100   :  { %v1368_v50 = vpop.f32.mrb[1].mxu1  ;;  %v1292_v29 = vadd.f32 %v1291_v16, %v1290_v51 }
 0x101   :  { %v1369_v4 = vadd.f32 %v1368_v50, %v1367_v39 }
 0x102   :  { %v1293_v57 = vpop.f32.mrb[4].mxu0 }
 0x103   :  { %v2677_v32 = vadd.f32 %v1369_v4, %v1289_v31  ;;  %v1370_v52 = vpop.f32.mrb[2].mxu1  ;;  %v1294_v62 = vpop.f32.mrb[5].mxu0 }
 0x104   :  { %v1371_v55 = vpop.f32.mrb[3].mxu1  ;;  %v1295_v0 = vadd.f32 %v1294_v62, %v1293_v57 }
 0x105   :  { %v1372_v60 = vadd.f32 %v1371_v55, %v1370_v52 }
 0x106   :  { %v1296_v11 = vpop.f32.mrb[6].mxu0 }
 0x107   :  { %v2679_v1 = vadd.f32 %v1372_v60, %v1292_v29  ;;  %v1373_v2 = vpop.f32.mrb[4].mxu1  ;;  %v1297_v14 = vpop.f32.mrb[7].mxu0 }
 0x108   :  { %v1374_v9 = vpop.f32.mrb[5].mxu1  ;;  %v1298_v15 = vadd.f32 %v1297_v14, %v1296_v11 }
 0x109   :  { %v1375_v13 = vadd.f32 %v1374_v9, %v1373_v2 }
 0x10a   :  { %v1299_v19 = vpop.f32.mrb[8].mxu0 }
 0x10b   :  { %v2681_v17 = vadd.f32 %v1375_v13, %v1295_v0  ;;  %v1376_v18 = vpop.f32.mrb[6].mxu1  ;;  %v1300_v22 = vpop.f32.mrb[9].mxu0 }
 0x10c   :  { %v1377_v3 = vpop.f32.mrb[7].mxu1  ;;  %v1301_v23 = vadd.f32 %v1300_v22, %v1299_v19 }
 0x10d   :  { %v1378_v20 = vadd.f32 %v1377_v3, %v1376_v18 }
 0x10e   :  { %v1302_v33 = vpop.f32.mrb[10].mxu0 }
 0x10f   :  { %v2683_v26 = vadd.f32 %v1378_v20, %v1298_v15  ;;  %v1379_v28 = vpop.f32.mrb[8].mxu1  ;;  %v1303_v36 = vpop.f32.mrb[11].mxu0 }
 0x110   :  { %v1380_v30 = vpop.f32.mrb[9].mxu1  ;;  %v1304_v37 = vadd.f32 %v1303_v36, %v1302_v33 }
 0x111   :  { %v1381_v35 = vadd.f32 %v1380_v30, %v1379_v28 }
 0x112   :  { %v1305_v42 = vpop.f32.mrb[12].mxu0 }
 0x113   :  { %v2685_v38 = vadd.f32 %v1381_v35, %v1301_v23  ;;  %v1382_v40 = vpop.f32.mrb[10].mxu1  ;;  %v1306_v43 = vpop.f32.mrb[13].mxu0 }
 0x114   :  { %v1383_v24 = vpop.f32.mrb[11].mxu1  ;;  %v1307_v47 = vadd.f32 %v1306_v43, %v1305_v42 }
 0x115   :  { %v1384_v49 = vadd.f32 %v1383_v24, %v1382_v40 }
 0x116   :  { %v1308_v58 = vpop.f32.mrb[14].mxu0 }
 0x117   :  { %v2687_v46 = vadd.f32 %v1384_v49, %v1304_v37  ;;  %v1385_v41 = vpop.f32.mrb[12].mxu1  ;;  %v1309_v54 = vpop.f32.mrb[15].mxu0 }
 0x118   :  { %v1386_v48 = vpop.f32.mrb[13].mxu1  ;;  %v1310_v61 = vadd.f32 %v1309_v54, %v1308_v58 }
 0x119   :  { %v1387_v53 = vadd.f32 %v1386_v48, %v1385_v41 }
 0x11a   :  { %v1311_v34 = vpop.f32.mrb[16].mxu0 }
 0x11b   :  { %v2689_v12 = vadd.f32 %v1387_v53, %v1307_v47  ;;  %v1388_v25 = vpop.f32.mrb[14].mxu1  ;;  %v1312_v10 = vpop.f32.mrb[17].mxu0 }
 0x11c   :  { %v1389_v5 = vpop.f32.mrb[15].mxu1  ;;  %v1313_v63 = vadd.f32 %v1312_v10, %v1311_v34 }
 0x11d   :  { %v1390_v56 = vadd.f32 %v1389_v5, %v1388_v25 }
 0x11e   :  { %v1314_v44 = vpop.f32.mrb[18].mxu0 }
 0x11f   :  { %v2691_v59 = vadd.f32 %v1390_v56, %v1310_v61  ;;  %v1391_v21 = vpop.f32.mrb[16].mxu1  ;;  %v1315_v6 = vpop.f32.mrb[19].mxu0 }
 0x120   :  { %v1392_v27 = vpop.f32.mrb[17].mxu1  ;;  %v1316_v7 = vadd.f32 %v1315_v6, %v1314_v44 }
 0x121   :  { %v1393_v45 = vadd.f32 %v1392_v27, %v1391_v21 }
 0x122   :  { %v1317_v50 = vpop.f32.mrb[20].mxu0 }
 0x123   :  { %v2693_v8 = vadd.f32 %v1393_v45, %v1313_v63  ;;  %v1394_v31 = vpop.f32.mrb[18].mxu1  ;;  %v1318_v4 = vpop.f32.mrb[21].mxu0 }
 0x124   :  { %v1395_v39 = vpop.f32.mrb[19].mxu1  ;;  %v1319_v16 = vadd.f32 %v1318_v4, %v1317_v50 }
 0x125   :  { %v1396_v51 = vadd.f32 %v1395_v39, %v1394_v31 }
 0x126   :  { %v1320_v57 = vpop.f32.mrb[22].mxu0 }
 0x127   :  { %v2695_v29 = vadd.f32 %v1396_v51, %v1316_v7  ;;  %v1397_v52 = vpop.f32.mrb[20].mxu1  ;;  %v1321_v62 = vpop.f32.mrb[23].mxu0 }
 0x128   :  { %v1398_v55 = vpop.f32.mrb[21].mxu1  ;;  %v1322_v0 = vadd.f32 %v1321_v62, %v1320_v57 }
 0x129   :  { %v1399_v60 = vadd.f32 %v1398_v55, %v1397_v52 }
 0x12a   :  { %v1323_v13 = vpop.f32.mrb[24].mxu0 }
 0x12b   :  { %v2697_v2 = vadd.f32 %v1399_v60, %v1319_v16  ;;  %v1400_v9 = vpop.f32.mrb[22].mxu1  ;;  %v1324_v15 = vpop.f32.mrb[25].mxu0 }
 0x12c   :  { %v1401_v11 = vpop.f32.mrb[23].mxu1  ;;  %v1325_v18 = vadd.f32 %v1324_v15, %v1323_v13 }
 0x12d   :  { %v1402_v14 = vadd.f32 %v1401_v11, %v1400_v9 }
 0x12e   :  { %v1326_v22 = vpop.f32.mrb[26].mxu0 }
 0x12f   :  { %v2699_v3 = vadd.f32 %v1402_v14, %v1322_v0  ;;  %v1403_v19 = vpop.f32.mrb[24].mxu1  ;;  %v1327_v28 = vpop.f32.mrb[27].mxu0 }
 0x130   :  { %v1404_v20 = vpop.f32.mrb[25].mxu1  ;;  %v1328_v30 = vadd.f32 %v1327_v28, %v1326_v22 }
 0x131   :  { %v1405_v23 = vadd.f32 %v1404_v20, %v1403_v19 }
 0x132   :  { %v1329_v37 = vpop.f32.mrb[28].mxu0 }
 0x133   :  { %v2701_v33 = vadd.f32 %v1405_v23, %v1325_v18  ;;  %v1406_v35 = vpop.f32.mrb[26].mxu1  ;;  %v1330_v24 = vpop.f32.mrb[29].mxu0 }
 0x134   :  { %v1407_v36 = vpop.f32.mrb[27].mxu1  ;;  %v1331_v42 = vadd.f32 %v1330_v24, %v1329_v37 }
 0x135   :  { %v1408_v40 = vadd.f32 %v1407_v36, %v1406_v35 }
 0x136   :  { %v1332_v41 = vpop.f32.mrb[30].mxu0 }
 0x137   :  { %v2703_v49 = vadd.f32 %v1408_v40, %v1328_v30  ;;  %v1409_v43 = vpop.f32.mrb[28].mxu1  ;;  %v1333_v58 = vpop.f32.mrb[31].mxu0 }
 0x138   :  { %v1410_v47 = vpop.f32.mrb[29].mxu1  ;;  %v1334_v53 = vadd.f32 %v1333_v58, %v1332_v41 }
 0x139   :  { %v1411_v48 = vadd.f32 %v1410_v47, %v1409_v43 }
 0x13a   :  { %v1447_v5 = vpop.f32.mrb[32].mxu0 }
 0x13b   :  { %v2705_v54 = vadd.f32 %v1411_v48, %v1331_v42  ;;  %v1412_v61 = vpop.f32.mrb[30].mxu1  ;;  %v1448_v56 = vpop.f32.mrb[33].mxu0 }
 0x13c   :  { %v1413_v25 = vpop.f32.mrb[31].mxu1  ;;  %v1449_v10 = vadd.f32 %v1448_v56, %v1447_v5 }
 0x13d   :  { %v1414_v34 = vadd.f32 %v1413_v25, %v1412_v61 }
 0x13e   :  { %v800_v27 = vadd.f32 %v1449_v10, %v2677_v32  ;;  %v1450_v45 = vpop.f32.mrb[34].mxu0 }
 0x13f   :  { %v2707_v63 = vadd.f32 %v1414_v34, %v1334_v53  ;;  %v1527_v21 = vpop.f32.mrb[32].mxu1  ;;  %v1451_v7 = vpop.f32.mrb[35].mxu0 }
 0x140   :  { %v1528_v44 = vpop.f32.mrb[33].mxu1  ;;  %v1452_v31 = vadd.f32 %v1451_v7, %v1450_v45 }
 0x141   :  { %v1529_v6 = vadd.f32 %v1528_v44, %v1527_v21 }
 0x142   :  { %v805_v51 = vadd.f32 %v1452_v31, %v2679_v1  ;;  %v1453_v16 = vpop.f32.mrb[36].mxu0 }
 0x143   :  { %v1530_v39 = vpop.f32.mrb[34].mxu1  ;;  %v2710_v50 = vadd.f32 %v1529_v6, %v800_v27  ;;  %v1454_v55 = vpop.f32.mrb[37].mxu0 }
 0x144   :  { %v1531_v4 = vpop.f32.mrb[35].mxu1  ;;  %v1455_v57 = vadd.f32 %v1454_v55, %v1453_v16 }
 0x145   :  { %v1532_v52 = vadd.f32 %v1531_v4, %v1530_v39 }
 0x146   :  { %v810_v32 = vadd.f32 %v1455_v57, %v2681_v17  ;;  %v1456_v9 = vpop.f32.mrb[38].mxu0 }
 0x147   :  { %v1533_v60 = vpop.f32.mrb[36].mxu1  ;;  %v2713_v62 = vadd.f32 %v1532_v52, %v805_v51  ;;  %v1457_v13 = vpop.f32.mrb[39].mxu0 }
 0x148   :  { %v1534_v0 = vpop.f32.mrb[37].mxu1  ;;  %v1458_v14 = vadd.f32 %v1457_v13, %v1456_v9 }
 0x149   :  { %v1535_v11 = vadd.f32 %v1534_v0, %v1533_v60 }
 0x14a   :  { %v815_v1 = vadd.f32 %v1458_v14, %v2683_v26  ;;  %v1459_v20 = vpop.f32.mrb[40].mxu0 }
 0x14b   :  { %v1536_v15 = vpop.f32.mrb[38].mxu1  ;;  %v2716_v18 = vadd.f32 %v1535_v11, %v810_v32  ;;  %v1460_v23 = vpop.f32.mrb[41].mxu0 }
 0x14c   :  { %v1537_v19 = vpop.f32.mrb[39].mxu1  ;;  %v1461_v28 = vadd.f32 %v1460_v23, %v1459_v20 }
 0x14d   :  { %v1538_v22 = vadd.f32 %v1537_v19, %v1536_v15 }
 0x14e   :  { %v820_v17 = vadd.f32 %v1461_v28, %v2685_v38  ;;  %v1462_v37 = vpop.f32.mrb[42].mxu0 }
 0x14f   :  { %v1539_v30 = vpop.f32.mrb[40].mxu1  ;;  %v2719_v35 = vadd.f32 %v1538_v22, %v815_v1  ;;  %v1463_v24 = vpop.f32.mrb[43].mxu0 }
 0x150   :  { %v1540_v36 = vpop.f32.mrb[41].mxu1  ;;  %v1464_v42 = vadd.f32 %v1463_v24, %v1462_v37 }
 0x151   :  { %v1541_v40 = vadd.f32 %v1540_v36, %v1539_v30 }
 0x152   :  { %v825_v26 = vadd.f32 %v1464_v42, %v2687_v46  ;;  %v1465_v48 = vpop.f32.mrb[44].mxu0 }
 0x153   :  { %v1542_v43 = vpop.f32.mrb[42].mxu1  ;;  %v2722_v47 = vadd.f32 %v1541_v40, %v820_v17  ;;  %v1466_v53 = vpop.f32.mrb[45].mxu0 }
 0x154   :  { %v1543_v41 = vpop.f32.mrb[43].mxu1  ;;  %v1467_v61 = vadd.f32 %v1466_v53, %v1465_v48 }
 0x155   :  { %v1544_v58 = vadd.f32 %v1543_v41, %v1542_v43 }
 0x156   :  { %v830_v38 = vadd.f32 %v1467_v61, %v2689_v12  ;;  %v1468_v56 = vpop.f32.mrb[46].mxu0 }
 0x157   :  { %v1545_v25 = vpop.f32.mrb[44].mxu1  ;;  %v2725_v5 = vadd.f32 %v1544_v58, %v825_v26  ;;  %v1469_v21 = vpop.f32.mrb[47].mxu0 }
 0x158   :  { %v1546_v34 = vpop.f32.mrb[45].mxu1  ;;  %v1470_v27 = vadd.f32 %v1469_v21, %v1468_v56 }
 0x159   :  { %v1547_v10 = vadd.f32 %v1546_v34, %v1545_v25 }
 0x15a   :  { %v835_v46 = vadd.f32 %v1470_v27, %v2691_v59  ;;  %v1471_v7 = vpop.f32.mrb[48].mxu0 }
 0x15b   :  { %v1548_v44 = vpop.f32.mrb[46].mxu1  ;;  %v2728_v45 = vadd.f32 %v1547_v10, %v830_v38  ;;  %v1472_v39 = vpop.f32.mrb[49].mxu0 }
 0x15c   :  { %v1549_v6 = vpop.f32.mrb[47].mxu1  ;;  %v1473_v51 = vadd.f32 %v1472_v39, %v1471_v7 }
 0x15d   :  { %v1550_v31 = vadd.f32 %v1549_v6, %v1548_v44 }
 0x15e   :  { %v840_v12 = vadd.f32 %v1473_v51, %v2693_v8  ;;  %v1474_v55 = vpop.f32.mrb[50].mxu0 }
 0x15f   :  { %v1551_v4 = vpop.f32.mrb[48].mxu1  ;;  %v2731_v16 = vadd.f32 %v1550_v31, %v835_v46  ;;  %v1475_v60 = vpop.f32.mrb[51].mxu0 }
 0x160   :  { %v1552_v52 = vpop.f32.mrb[49].mxu1  ;;  %v1476_v32 = vadd.f32 %v1475_v60, %v1474_v55 }
 0x161   :  { %v1553_v57 = vadd.f32 %v1552_v52, %v1551_v4 }
 0x162   :  { %v845_v59 = vadd.f32 %v1476_v32, %v2695_v29  ;;  %v1477_v13 = vpop.f32.mrb[52].mxu0 }
 0x163   :  { %v1554_v0 = vpop.f32.mrb[50].mxu1  ;;  %v2734_v9 = vadd.f32 %v1553_v57, %v840_v12  ;;  %v1478_v15 = vpop.f32.mrb[53].mxu0 }
 0x164   :  { %v1555_v11 = vpop.f32.mrb[51].mxu1  ;;  %v1479_v1 = vadd.f32 %v1478_v15, %v1477_v13 }
 0x165   :  { %v1556_v14 = vadd.f32 %v1555_v11, %v1554_v0 }
 0x166   :  { %v850_v22 = vadd.f32 %v1479_v1, %v2697_v2  ;;  %v1480_v23 = vpop.f32.mrb[54].mxu0 }
 0x167   :  { %v1557_v19 = vpop.f32.mrb[52].mxu1  ;;  %v990_v20 = vadd.f32 %v1556_v14, %v845_v59  ;;  %v1481_v30 = vpop.f32.mrb[55].mxu0 }
 0x168   :  { %v1558_v8 = vpop.f32.mrb[53].mxu1  ;;  %v1482_v17 = vadd.f32 %v1481_v30, %v1480_v23 }
 0x169   :  { %v1559_v28 = vadd.f32 %v1558_v8, %v1557_v19 }
 0x16a   :  { %v855_v40 = vadd.f32 %v1482_v17, %v2699_v3  ;;  %v1483_v24 = vpop.f32.mrb[56].mxu0 }
 0x16b   :  { %v1560_v36 = vpop.f32.mrb[54].mxu1  ;;  %v2738_v37 = vadd.f32 %v1559_v28, %v850_v22  ;;  %v1484_v43 = vpop.f32.mrb[57].mxu0 }
 0x16c   :  { %v1561_v29 = vpop.f32.mrb[55].mxu1  ;;  %v1485_v26 = vadd.f32 %v1484_v43, %v1483_v24 }
 0x16d   :  { %v1562_v42 = vadd.f32 %v1561_v29, %v1560_v36 }
 0x16e   :  { %v860_v58 = vadd.f32 %v1485_v26, %v2701_v33  ;;  %v1486_v53 = vpop.f32.mrb[58].mxu0 }
 0x16f   :  { %v1563_v41 = vpop.f32.mrb[56].mxu1  ;;  %v1000_v48 = vadd.f32 %v1562_v42, %v855_v40  ;;  %v1487_v25 = vpop.f32.mrb[59].mxu0 }
 0x170   :  { %v1564_v2 = vpop.f32.mrb[57].mxu1  ;;  %v1488_v38 = vadd.f32 %v1487_v25, %v1486_v53 }
 0x171   :  { %v1565_v61 = vadd.f32 %v1564_v2, %v1563_v41 }
 0x172   :  { %v865_v10 = vadd.f32 %v1488_v38, %v2703_v49  ;;  %v1489_v21 = vpop.f32.mrb[60].mxu0 }
 0x173   :  { %v1566_v34 = vpop.f32.mrb[58].mxu1  ;;  %v2742_v56 = vadd.f32 %v1565_v61, %v860_v58  ;;  %v1490_v44 = vpop.f32.mrb[61].mxu0 }
 0x174   :  { %v1567_v3 = vpop.f32.mrb[59].mxu1  ;;  %v1491_v46 = vadd.f32 %v1490_v44, %v1489_v21 }
 0x175   :  { %v1568_v27 = vadd.f32 %v1567_v3, %v1566_v34 }
 0x176   :  { %v870_v31 = vadd.f32 %v1491_v46, %v2705_v54  ;;  %v1492_v39 = vpop.f32.mrb[62].mxu0 }
 0x177   :  { %v1569_v6 = vpop.f32.mrb[60].mxu1  ;;  %v1010_v7 = vadd.f32 %v1568_v27, %v865_v10  ;;  %v1493_v4 = vpop.f32.mrb[63].mxu0 }
 0x178   :  { %v1570_v33 = vpop.f32.mrb[61].mxu1  ;;  %v1494_v12 = vadd.f32 %v1493_v4, %v1492_v39 }
 0x179   :  { %v1571_v51 = vadd.f32 %v1570_v33, %v1569_v6 }
 0x17a   :  { %v875_v57 = vadd.f32 %v1494_v12, %v2707_v63  ;;  %v1641_v60 = vpop.f32.mrb[64].mxu0 }
 0x17b   :  { %v1572_v52 = vpop.f32.mrb[62].mxu1  ;;  %v2746_v55 = vadd.f32 %v1571_v51, %v870_v31  ;;  %v1095_v0 = vadd.f32 %v1641_v60, %v2713_v62  ;;  %v1089_v59 = vpop.f32.mrb[65].mxu0 }
 0x17c   :  { %v1573_v49 = vpop.f32.mrb[63].mxu1  ;;  %v1090_v11 = vadd.f32 %v1089_v59, %v2710_v50 }
 0x17d   :  { %v1574_v32 = vadd.f32 %v1573_v49, %v1572_v52  ;;  %1169 = vst [vmem:[%s2822_s4 + $0x8] sm:$0xff] %v1095_v0  ;;  %v1206_v54 = vmul.f32 %v1095_v0, %v1095_v0 }
 0x17e   :  { %1168 = vst [vmem:[%s2822_s4] sm:$0xff] %v1090_v11  ;;  %v1184_v63 = vadd.f32 %v1095_v0, %v1090_v11  ;;  %v1205_v1 = vmul.f32 %v1090_v11, %v1090_v11  ;;  %v1644_v62 = vpop.f32.mrb[66].mxu0 }
 0x17f   :  { %v1653_v13 = vpop.f32.mrb[64].mxu1  ;;  %v1020_v14 = vadd.f32 %v1574_v32, %v875_v57  ;;  %v1105_v50 = vadd.f32 %v1644_v62, %v2719_v35  ;;  %v1099_v8 = vpop.f32.mrb[67].mxu0 }
 0x180   :  { %v2754_v15 = vadd.f32 %v1653_v13, %v990_v20  ;;  %v1129_v19 = vpop.f32.mrb[65].mxu1  ;;  %v1221_v20 = vadd.f32 %v1206_v54, %v1205_v1  ;;  %v1100_v23 = vadd.f32 %v1099_v8, %v2716_v18 }
 0x181   :  { %v1130_v22 = vadd.f32 %v1129_v19, %v2734_v9  ;;  %1171 = vst [vmem:[%s2822_s4 + $0x18] sm:$0xff] %v1105_v50  ;;  %v1208_v24 = vmul.f32 %v1105_v50, %v1105_v50 }
 0x182   :  { %1177 = vst [vmem:[%s2822_s4 + $0x48] sm:$0xff] %v2754_v15  ;;  %1170 = vst [vmem:[%s2822_s4 + $0x10] sm:$0xff] %v1100_v23  ;;  %v1185_v35 = vadd.f32 %v1184_v63, %v1100_v23  ;;  %v1207_v30 = vmul.f32 %v1100_v23, %v1100_v23  ;;  %v1647_v36 = vpop.f32.mrb[68].mxu0  ;;  %v1214_v4 = vmul.f32 %v2754_v15, %v2754_v15 }
 0x183   :  { %1176 = vst [vmem:[%s2822_s4 + $0x40] sm:$0xff] %v1130_v22  ;;  %v1656_v9 = vpop.f32.mrb[66].mxu1  ;;  %v1115_v40 = vadd.f32 %v1647_v36, %v2725_v5  ;;  %v1109_v29 = vpop.f32.mrb[69].mxu0  ;;  %v1213_v33 = vmul.f32 %v1130_v22, %v1130_v22 }
 0x184   :  { %v1145_v28 = vadd.f32 %v1656_v9, %v1000_v48  ;;  %v1139_v17 = vpop.f32.mrb[67].mxu1  ;;  %v1222_v42 = vadd.f32 %v1221_v20, %v1207_v30  ;;  %v1110_v43 = vadd.f32 %v1109_v29, %v2722_v47  ;;  %v1186_v26 = vadd.f32 %v1185_v35, %v1105_v50 }
 0x185   :  { %v1140_v18 = vadd.f32 %v1139_v17, %v2738_v37  ;;  %1173 = vst [vmem:[%s2822_s4 + $0x28] sm:$0xff] %v1115_v40  ;;  %v1210_v38 = vmul.f32 %v1115_v40, %v1115_v40 }
 0x186   :  { %1179 = vst [vmem:[%s2822_s4 + $0x58] sm:$0xff] %v1145_v28  ;;  %1172 = vst [vmem:[%s2822_s4 + $0x20] sm:$0xff] %v1110_v43  ;;  %v1187_v41 = vadd.f32 %v1186_v26, %v1110_v43  ;;  %v1209_v48 = vmul.f32 %v1110_v43, %v1110_v43  ;;  %v1223_v58 = vadd.f32 %v1222_v42, %v1208_v24  ;;  %v1650_v47 = vpop.f32.mrb[70].mxu0 }
 0x187   :  { %1178 = vst [vmem:[%s2822_s4 + $0x50] sm:$0xff] %v1140_v18  ;;  %v1659_v37 = vpop.f32.mrb[68].mxu1  ;;  %v1125_v61 = vadd.f32 %v1650_v47, %v2731_v16  ;;  %v1119_v25 = vpop.f32.mrb[71].mxu0  ;;  %v1216_v60 = vmul.f32 %v1145_v28, %v1145_v28 }
 0x188   :  { %v1155_v5 = vadd.f32 %v1659_v37, %v1010_v7  ;;  %v1149_v2 = vpop.f32.mrb[69].mxu1  ;;  %v1224_v34 = vadd.f32 %v1223_v58, %v1209_v48  ;;  %v1120_v10 = vadd.f32 %v1119_v25, %v2728_v45  ;;  %v1188_v3 = vadd.f32 %v1187_v41, %v1115_v40 }
 0x189   :  { %v1150_v53 = vadd.f32 %v1149_v2, %v2742_v56  ;;  %1175 = vst [vmem:[%s2822_s4 + $0x38] sm:$0xff] %v1125_v61  ;;  %v1212_v6 = vmul.f32 %v1125_v61, %v1125_v61 }
 0x18a   :  { %1181 = vst [vmem:[%s2822_s4 + $0x68] sm:$0xff] %v1155_v5  ;;  %1174 = vst [vmem:[%s2822_s4 + $0x30] sm:$0xff] %v1120_v10  ;;  %v1189_v21 = vadd.f32 %v1188_v3, %v1120_v10  ;;  %v1211_v27 = vmul.f32 %v1120_v10, %v1120_v10  ;;  %v1225_v44 = vadd.f32 %v1224_v34, %v1210_v38 }
 0x18b   :  { %1180 = vst [vmem:[%s2822_s4 + $0x60] sm:$0xff] %v1150_v53  ;;  %v1662_v56 = vpop.f32.mrb[70].mxu1  ;;  %v1217_v59 = vmul.f32 %v1150_v53, %v1150_v53  ;;  %v1218_v13 = vmul.f32 %v1155_v5, %v1155_v5 }
 0x18c   :  { %v1165_v16 = vadd.f32 %v1662_v56, %v1020_v14  ;;  %v1159_v46 = vpop.f32.mrb[71].mxu1  ;;  %v1190_v7 = vadd.f32 %v1189_v21, %v1125_v61  ;;  %v1226_v31 = vadd.f32 %v1225_v44, %v1211_v27 }
 0x18d   :  { %v1160_v45 = vadd.f32 %v1159_v46, %v2746_v55  ;;  %v1215_v55 = vmul.f32 %v1140_v18, %v1140_v18 }
 0x18e   :  { %1183 = vst [vmem:[%s2822_s4 + $0x78] sm:$0xff] %v1165_v16  ;;  %v1191_v39 = vadd.f32 %v1190_v7, %v1130_v22  ;;  %v1227_v51 = vadd.f32 %v1226_v31, %v1212_v6  ;;  %v1220_v22 = vmul.f32 %v1165_v16, %v1165_v16 }
 0x18f   :  { %1182 = vst [vmem:[%s2822_s4 + $0x70] sm:$0xff] %v1160_v45  ;;  %v1219_v19 = vmul.f32 %v1160_v45, %v1160_v45 }
 0x190   :  { %v1192_v12 = vadd.f32 %v1191_v39, %v2754_v15  ;;  %v1228_v52 = vadd.f32 %v1227_v51, %v1213_v33 }
 0x192   :  { %v1229_v57 = vadd.f32 %v1228_v52, %v1214_v4  ;;  %v1193_v49 = vadd.f32 %v1192_v12, %v1140_v18 }
 0x194   :  { %v1194_v32 = vadd.f32 %v1193_v49, %v1145_v28  ;;  %v1230_v0 = vadd.f32 %v1229_v57, %v1215_v55 }
 0x196   :  { %v1195_v11 = vadd.f32 %v1194_v32, %v1150_v53  ;;  %v1231_v54 = vadd.f32 %v1230_v0, %v1216_v60 }
 0x198   :  { %v1196_v14 = vadd.f32 %v1195_v11, %v1155_v5  ;;  %v1232_v63 = vadd.f32 %v1231_v54, %v1217_v59 }
 0x19a   :  { %v1197_v1 = vadd.f32 %v1196_v14, %v1160_v45  ;;  %v1233_v62 = vadd.f32 %v1232_v63, %v1218_v13 }
 0x19c   :  { %v1198_v50 = vadd.f32 %v1197_v1, %v1165_v16  ;;  %v1234_v8 = vadd.f32 %v1233_v62, %v1219_v19 }
 0x19e   :  { %v1199_v15 = vrot.slane %v1198_v50, 4  ;;  %v1235_v20 = vadd.f32 %v1234_v8, %v1220_v22 }
 0x1a0   :  { %v1200_v23 = vadd.f32 %v1199_v15, %v1198_v50  ;;  %v1236_v9 = vrot.slane %v1235_v20, 4 }
 0x1a2   :  { %v1201_v35 = vrot.slane %v1200_v23, 2  ;;  %v1237_v30 = vadd.f32 %v1236_v9, %v1235_v20 }
 0x1a4   :  { %v1202_v28 = vadd.f32 %v1201_v35, %v1200_v23  ;;  %v1238_v17 = vrot.slane %v1237_v30, 2 }
 0x1a6   :  { %v1203_v36 = vrot.slane %v1202_v28, 1  ;;  %v1239_v18 = vadd.f32 %v1238_v17, %v1237_v30 }
 0x1a8   :  { %v1240_v40 = vrot.slane %v1239_v18, 1  ;;  %v1204_v29 = vadd.f32 %v1203_v36, %v1202_v28 }
 0x1aa   :  { %v1241_v24 = vadd.f32 %v1240_v40, %v1239_v18 }
 0x1ac   :  { %v1243_v42 = vsel %vm1242_vm0, %v1204_v29, %v1241_v24 }
 0x1ad   :  { %1244 = vst [vmem:[%s2823_s5] sm:$0x3] %v1243_v42 }

// kernel: basic_block_2d.3
= control target key start
LH: loop header
LB: loop body
LE: loop exit
PB: predicated region body
PF: predicated region fallthrough
CT: control target
= control target key end

     0   :  { %s1650_s13 = smov 8   ;;  %s1651_s14 = smov 16   ;;  %vm43_vm0 = vcmask 64512   ;;  %vm140_vm1 = vcmask 130112   ;;  %vm237_vm2 = vcmask 195712   ;;  %vm334_vm3 = vcmask 261312   ;;  %s2628_s1 = inlined_call_operand.vmem [shape: f32[2,9,9,8], index: 1, kind: input, shape index: {}]   ;;  %s2629_s0 = inlined_call_operand.vmem [shape: f32[2,9,9,8], index: 0, kind: input, shape index: {}]   ;;  %s2630_s2 = inlined_call_operand.vmem [shape: f32[2,9,9,8], index: 2, kind: input, shape index: {}]   ;;  %s2631_s3 = inlined_call_operand.vmem [shape: f32[2,9,9,8], index: 3, kind: input, shape index: {}]   ;;  %s2632_s4 = inlined_call_operand.vmem [shape: f32[72,128], index: 4, kind: input, shape index: {}]   ;;  %s2633_s5 = inlined_call_operand.vmem [shape: f32[8,128], index: 5, kind: input, shape index: {}]   ;;  %s2634_s6 = inlined_call_operand.vmem [shape: f32[2,64,128], index: 6, kind: output, shape index: {0}]   ;;  %s2635_s8 = inlined_call_operand.vmem [shape: f32[2,64,128], index: 8, kind: output, shape index: {2}]   ;;  %s2636_s9 = inlined_call_operand.vmem [shape: f32[1,2,128], index: 9, kind: output, shape index: {3}]   ;;  %s2637_s7 = inlined_call_operand.vmem [shape: f32[1,2,128], index: 7, kind: output, shape index: {1}]  }
   0x1   :  { %v60_v0 = vld [vmem:[%s2628_s1] sm:$0xff]  ;;  %v1719_v2 = vld [vmem:[%s2628_s1 + $0x10] sm:$0xff]  ;;  %s1652_s27 = smov 24   ;;  %s1653_s17 = smov 32   ;;  %v855_v22 = vld [vmem:[%s2632_s4 + $0x8] sm:$0xff]  ;;  %vm431_vm4 = vcmask 326912  }
   0x2   :  { %v157_v1 = vld [vmem:[%s2629_s0 + $0x1] sm:$0xff]  ;;  %92 = vrot.lane.b32.xlu0 %v60_v0, %s1650_s13  ;;  %v1724_v3 = vld [vmem:[%s2629_s0 + $0x11] sm:$0xff]  ;;  %s1654_s29 = smov 40   ;;  %s1655_s26 = smov 48   ;;  %vm528_vm5 = vcmask 392512   ;;  %vm626_vm6 = vcmask 458112  }
   0x3   :  { %189 = vrot.lane.b32.xlu1 %v157_v1, %s1651_s14  ;;  %v1436_v4 = vld [vmem:[%s2629_s0 + $0x10] sm:$0xff]  ;;  %v254_v5 = vld [vmem:[%s2630_s2] sm:$0xff]  ;;  %v857_v28 = vld [vmem:[%s2632_s4 + $0x18] sm:$0xff]  ;;  %s1656_s25 = smov 56   ;;  %s1657_s19 = smov 64   ;;  %vm724_vm7 = vcmask 523712  }
   0x4   :  { %45 = vst.msk [vmem:[#allocation2 + $0x8] sm:$0xff] %vm43_vm0, %v1436_v4  ;;  %v255_v6 = vld [vmem:[%s2630_s2 + $0x10] sm:$0xff]  ;;  %v1437_v7 = vld [vmem:[%s2629_s0 + $0x20] sm:$0xff]  ;;  %v859_v31 = vld [vmem:[%s2632_s4 + $0x28] sm:$0xff]  ;;  %vm821_vm8 = vcmask 589312   ;;  %vm863_vm9 = vcmask 588800  }
   0x5   :  { %46 = vst.msk [vmem:[#allocation2 + $0x10] sm:$0xff] %vm43_vm0, %v1437_v7  ;;  %v1749_v8 = vld [vmem:[%s2629_s0 + $0x30] sm:$0xff]  ;;  %v351_v9 = vld [vmem:[%s2631_s3] sm:$0xff]  ;;  %v861_v37 = vld [vmem:[%s2632_s4 + $0x38] sm:$0xff]  ;;  %vm1131_vm10 = vcmask 1040384  }
   0x6   :  { %94 = vrot.lane.b32.xlu0 %v1719_v2, %s1650_s13  ;;  %v1757_v10 = vld [vmem:[%s2628_s1 + $0x20] sm:$0xff]  ;;  %47 = vst.msk [vmem:[#allocation2 + $0x18] sm:$0xff] %vm43_vm0, %v1749_v8  ;;  %v1774_v12 = vld [vmem:[%s2629_s0 + $0x50] sm:$0xff] }
   0x7   :  { %191 = vrot.lane.b32.xlu1 %v1724_v3, %s1651_s14  ;;  %v1762_v11 = vld [vmem:[%s2629_s0 + $0x40] sm:$0xff]  ;;  %v352_v13 = vld [vmem:[%s2631_s3 + $0x10] sm:$0xff]  ;;  %49 = vst.msk [vmem:[#allocation2 + $0x28] sm:$0xff] %vm43_vm0, %v1774_v12 }
   0x8   :  { %48 = vst.msk [vmem:[#allocation2 + $0x20] sm:$0xff] %vm43_vm0, %v1762_v11  ;;  %v448_v14 = vld [vmem:[%s2630_s2 + $0x1] sm:$0xff]  ;;  %v1800_v17 = vld [vmem:[%s2628_s1 + $0x30] sm:$0xff] }
   0x9   :  { %v1785_v15 = vld [vmem:[%s2629_s0 + $0x60] sm:$0xff]  ;;  %v1808_v19 = vld [vmem:[%s2629_s0 + $0x70] sm:$0xff] }
   0xa   :  { %286 = vrot.lane.b32.xlu0 %v254_v5, %s1652_s27  ;;  %50 = vst.msk [vmem:[#allocation2 + $0x30] sm:$0xff] %vm43_vm0, %v1785_v15  ;;  %v27_v16 = vld [vmem:[%s2629_s0] sm:$0xff]  ;;  %51 = vst.msk [vmem:[#allocation2 + $0x38] sm:$0xff] %vm43_vm0, %v1808_v19  ;;  %v449_v20 = vld [vmem:[%s2630_s2 + $0x11] sm:$0xff] }
   0xb   :  { %288 = vrot.lane.b32.xlu1 %v255_v6, %s1652_s27  ;;  %44 = vst.msk [vmem:[#allocation2] sm:$0xff] %vm43_vm0, %v27_v16  ;;  %v159_v18 = vld [vmem:[%s2629_s0 + $0x21] sm:$0xff]  ;;  %v1836_v25 = vld [vmem:[%s2629_s0 + $0x31] sm:$0xff] }
   0xc   :  { %v854_v21 = vld [vmem:[%s2632_s4] sm:$0xff]  ;;  %v856_v27 = vld [vmem:[%s2632_s4 + $0x10] sm:$0xff] }
   0xd   :  { %v1827_v23 = vld [vmem:[%s2629_s0 + $0xa0] sm:$0xff]  ;;  %v1626_v24 = vpack.c.bf16 %v855_v22, %v854_v21  ;;  %v1630_v29 = vpack.c.bf16 %v857_v28, %v856_v27  ;;  %v1859_v32 = vld [vmem:[%s2629_s0 + $0xb0] sm:$0xff] }
   0xe   :  { %383 = vrot.lane.b32.xlu0 %v351_v9, %s1653_s17  ;;  %53 = vst.msk [vmem:[#allocation2 + $0x48] sm:$0xff] %vm43_vm0, %v1827_v23  ;;  %v256_v26 = vld [vmem:[%s2630_s2 + $0x20] sm:$0xff]  ;;  %54 = vst.msk [vmem:[#allocation2 + $0x50] sm:$0xff] %vm43_vm0, %v1859_v32  ;;  %v257_v34 = vld [vmem:[%s2630_s2 + $0x30] sm:$0xff] }
   0xf   :  { %96 = vrot.lane.b32.xlu1 %v1757_v10, %s1650_s13  ;;  %1627 = vmatprep.subr.bf16.mxu0 %v1626_v24  ;;  %v858_v30 = vld [vmem:[%s2632_s4 + $0x20] sm:$0xff]  ;;  %v860_v36 = vld [vmem:[%s2632_s4 + $0x30] sm:$0xff] }
  0x10   :  { %1629 = vmatpush3.bf16.msra.mxu0 %v1626_v24  ;;  %v1634_v33 = vpack.c.bf16 %v859_v31, %v858_v30  ;;  %v353_v35 = vld [vmem:[%s2631_s3 + $0x20] sm:$0xff]  ;;  %v1638_v38 = vpack.c.bf16 %v861_v37, %v860_v36  ;;  %v354_v41 = vld [vmem:[%s2631_s3 + $0x30] sm:$0xff] }
  0x11   :  { %1631 = vmatprep.subr.bf16.mxu0 %v1630_v29  ;;  %v862_v39 = vld [vmem:[%s2632_s4 + $0x40] sm:$0xff]  ;;  %v65_v43 = vld [vmem:[%s2628_s1 + $0x50] sm:$0xff] }
  0x12   :  { %385 = vrot.lane.b32.xlu0 %v352_v13, %s1653_s17  ;;  %v64_v40 = vld [vmem:[%s2628_s1 + $0x40] sm:$0xff]  ;;  %v451_v45 = vld [vmem:[%s2630_s2 + $0x31] sm:$0xff] }
  0x13   :  { %480 = vrot.lane.b32.xlu1 %v448_v14, %s1654_s29  ;;  %v450_v42 = vld [vmem:[%s2630_s2 + $0x21] sm:$0xff]  ;;  %v162_v47 = vld [vmem:[%s2629_s0 + $0x51] sm:$0xff] }
  0x14   :  { %1633 = vmatpush3.bf16.msra.mxu0 %v1630_v29  ;;  %v161_v44 = vld [vmem:[%s2629_s0 + $0x41] sm:$0xff]  ;;  %v1932_v49 = vld [vmem:[%s2629_s0 + $0xd0] sm:$0xff] }
  0x15   :  { %1635 = vmatprep.subr.bf16.mxu0 %v1634_v33  ;;  %v1914_v46 = vld [vmem:[%s2629_s0 + $0xc0] sm:$0xff]  ;;  %56 = vst.msk [vmem:[#allocation2 + $0x60] sm:$0xff] %vm43_vm0, %v1932_v49  ;;  %v259_v50 = vld [vmem:[%s2630_s2 + $0x50] sm:$0xff] }
  0x16   :  { %98 = vrot.lane.b32.xlu0 %v1800_v17, %s1650_s13  ;;  %55 = vst.msk [vmem:[#allocation2 + $0x58] sm:$0xff] %vm43_vm0, %v1914_v46  ;;  %v258_v48 = vld [vmem:[%s2630_s2 + $0x40] sm:$0xff]  ;;  %v356_v53 = vld [vmem:[%s2631_s3 + $0x50] sm:$0xff] }
  0x17   :  { %193 = vrot.lane.b32.xlu1 %v159_v18, %s1651_s14  ;;  %v355_v51 = vld [vmem:[%s2631_s3 + $0x40] sm:$0xff]  ;;  %v1967_v55 = vld [vmem:[%s2628_s1 + $0x70] sm:$0xff] }
  0x18   :  { %1637 = vmatpush3.bf16.msra.mxu0 %v1634_v33  ;;  %v66_v52 = vld [vmem:[%s2628_s1 + $0x60] sm:$0xff]  ;;  %v453_v57 = vld [vmem:[%s2630_s2 + $0x51] sm:$0xff] }
  0x19   :  { %1639 = vmatprep.subr.bf16.mxu0 %v1638_v38  ;;  %v452_v54 = vld [vmem:[%s2630_s2 + $0x41] sm:$0xff]  ;;  %v1989_v59 = vld [vmem:[%s2629_s0 + $0x71] sm:$0xff] }
  0x1a   :  { %482 = vrot.lane.b32.xlu0 %v449_v20, %s1654_s29  ;;  %v163_v56 = vld [vmem:[%s2629_s0 + $0x61] sm:$0xff]  ;;  %v35_v61 = vld [vmem:[%s2629_s0 + $0x90] sm:$0xff] }
  0x1b   :  { %578 = vrot.lane.b32.xlu1 %v1436_v4, %s1655_s26  ;;  %v1984_v58 = vld [vmem:[%s2629_s0 + $0xe0] sm:$0xff]  ;;  %52 = vst.msk [vmem:[#allocation2 + $0x40] sm:$0xff] %vm43_vm0, %v35_v61  ;;  %v2006_v62 = vld [vmem:[%s2629_s0 + $0xf0] sm:$0xff] }
  0x1c   :  { %1641 = vmatpush3.bf16.msra.mxu0 %v1638_v38  ;;  %v260_v60 = vld [vmem:[%s2630_s2 + $0x60] sm:$0xff]  ;;  %57 = vst.msk [vmem:[#allocation2 + $0x68] sm:$0xff] %vm43_vm0, %v1984_v58  ;;  %58 = vst.msk [vmem:[#allocation2 + $0x70] sm:$0xff] %vm43_vm0, %v2006_v62  ;;  %v261_v63 = vld [vmem:[%s2630_s2 + $0x70] sm:$0xff] }
  0x1d   :  { %1574 = vmatprep.subr.mxu0 %v862_v39  ;;  %v2019_v0 = vld [vmem:[%s2631_s3 + $0x60] sm:$0xff]  ;;  %v68_v1 = vld [vmem:[%s2628_s1 + $0x90] sm:$0xff] }
  0x1e   :  { %195 = vrot.lane.b32.xlu0 %v1836_v25, %s1651_s14  ;;  %v2045_v4 = vld [vmem:[%s2628_s1 + $0xa0] sm:$0xff]  ;;  %v165_v5 = vld [vmem:[%s2629_s0 + $0x91] sm:$0xff] }
  0x1f   :  { %290 = vrot.lane.b32.xlu1 %v256_v26, %s1652_s27  ;;  %v455_v9 = vld [vmem:[%s2630_s2 + $0x71] sm:$0xff]  ;;  %v1443_v16 = vld [vmem:[%s2629_s0 + $0x80] sm:$0xff] }
  0x20   :  { %1575 = vmatpush3.msra.mxu0 %v862_v39  ;;  %v262_v13 = vld [vmem:[%s2630_s2 + $0x90] sm:$0xff]  ;;  %v1459_v24 = vld [vmem:[%s2628_s1 + $0x80] sm:$0xff] }
  0x21   :  { %v2097_v20 = vld [vmem:[%s2631_s3 + $0x90] sm:$0xff]  ;;  %v2118_v28 = vld [vmem:[%s2631_s3 + $0xa0] sm:$0xff] }
  0x22   :  { %580 = vrot.lane.b32.xlu0 %v1437_v7, %s1655_s26  ;;  %v70_v27 = vld [vmem:[%s2628_s1 + $0xb0] sm:$0xff]  ;;  %v1475_v33 = vld [vmem:[%s2629_s0 + $0x81] sm:$0xff] }
  0x23   :  { %676 = vrot.lane.b32.xlu1 %v1719_v2, %s1656_s25  ;;  %v2032_v2 = vld [vmem:[%s2631_s3 + $0x70] sm:$0xff]  ;;  %v2138_v36 = vld [vmem:[%s2628_s1 + $0xc0] sm:$0xff] }
  0x24   :  { %v456_v31 = vld [vmem:[%s2630_s2 + $0x91] sm:$0xff] }
  0x25   :  { %v167_v37 = vld [vmem:[%s2629_s0 + $0xb1] sm:$0xff] }
  0x26   :  { %292 = vrot.lane.b32.xlu0 %v257_v34, %s1652_s27 }
  0x27   :  { %387 = vrot.lane.b32.xlu1 %v353_v35, %s1653_s17 }
  0x2a   :  { %678 = vrot.lane.b32.xlu0 %v1757_v10, %s1656_s25 }
  0x2b   :  { %773 = vrot.lane.b32.xlu1 %v1724_v3, %s1657_s19  ;;  %v454_v3 = vld [vmem:[%s2630_s2 + $0x61] sm:$0xff] }
  0x2e   :  { %100 = vrot.lane.b32.xlu0 %v64_v40, %s1650_s13 }
  0x2f   :  { %389 = vrot.lane.b32.xlu1 %v354_v41, %s1653_s17 }
  0x32   :  { %484 = vrot.lane.b32.xlu0 %v450_v42, %s1654_s29 }
  0x33   :  { %775 = vrot.lane.b32.xlu1 %v159_v18, %s1657_s19 }
  0x36   :  { %102 = vrot.lane.b32.xlu0 %v65_v43, %s1650_s13 }
  0x37   :  { %197 = vrot.lane.b32.xlu1 %v161_v44, %s1651_s14 }
  0x3a   :  { %486 = vrot.lane.b32.xlu0 %v451_v45, %s1654_s29 }
  0x3b   :  { %582 = vrot.lane.b32.xlu1 %v1749_v8, %s1655_s26  ;;  %v2054_v8 = vld [vmem:[%s2629_s0 + $0x100] sm:$0xff] }
  0x3c   :  { %59 = vst.msk [vmem:[#allocation2 + $0x78] sm:$0xff] %vm43_vm0, %v2054_v8 }
  0x3e   :  { %199 = vrot.lane.b32.xlu0 %v162_v47, %s1651_s14 }
  0x3f   :  { %294 = vrot.lane.b32.xlu1 %v258_v48, %s1652_s27 }
  0x42   :  { %584 = vrot.lane.b32.xlu0 %v1762_v11, %s1655_s26 }
  0x43   :  { %680 = vrot.lane.b32.xlu1 %v1800_v17, %s1656_s25 }
  0x46   :  { %296 = vrot.lane.b32.xlu0 %v259_v50, %s1652_s27  ;;  %v265_v50 = vld [vmem:[%s2630_s2 + $0xc0] sm:$0xff] }
  0x47   :  { %391 = vrot.lane.b32.xlu1 %v355_v51, %s1653_s17  ;;  %v2181_v51 = vld [vmem:[%s2631_s3 + $0xb0] sm:$0xff] }
  0x4a   :  { %682 = vrot.lane.b32.xlu0 %v64_v40, %s1656_s25  ;;  %v457_v40 = vld [vmem:[%s2630_s2 + $0xa1] sm:$0xff] }
  0x4b   :  { %777 = vrot.lane.b32.xlu1 %v1836_v25, %s1657_s19 }
  0x4e   :  { %104 = vrot.lane.b32.xlu0 %v66_v52, %s1650_s13 }
  0x4f   :  { %393 = vrot.lane.b32.xlu1 %v356_v53, %s1653_s17 }
  0x52   :  { %488 = vrot.lane.b32.xlu0 %v452_v54, %s1654_s29 }
  0x53   :  { %779 = vrot.lane.b32.xlu1 %v161_v44, %s1657_s19  ;;  %v264_v44 = vld [vmem:[%s2630_s2 + $0xb0] sm:$0xff] }
  0x56   :  { %106 = vrot.lane.b32.xlu0 %v1967_v55, %s1650_s13 }
  0x57   :  { %201 = vrot.lane.b32.xlu1 %v163_v56, %s1651_s14 }
  0x5a   :  { %490 = vrot.lane.b32.xlu0 %v453_v57, %s1654_s29  ;;  %v2200_v57 = vld [vmem:[%s2631_s3 + $0xc0] sm:$0xff] }
  0x5b   :  { %586 = vrot.lane.b32.xlu1 %v1774_v12, %s1655_s26  ;;  %v2073_v12 = vld [vmem:[%s2629_s0 + $0xa1] sm:$0xff] }
  0x5e   :  { %203 = vrot.lane.b32.xlu0 %v1989_v59, %s1651_s14 }
  0x5f   :  { %298 = vrot.lane.b32.xlu1 %v260_v60, %s1652_s27 }
  0x62   :  { %588 = vrot.lane.b32.xlu0 %v1785_v15, %s1655_s26 }
  0x63   :  { %684 = vrot.lane.b32.xlu1 %v65_v43, %s1656_s25  ;;  %v2159_v43 = vld [vmem:[%s2629_s0 + $0xc1] sm:$0xff] }
  0x66   :  { %300 = vrot.lane.b32.xlu0 %v261_v63, %s1652_s27  ;;  %v458_v63 = vld [vmem:[%s2630_s2 + $0xb1] sm:$0xff] }
  0x67   :  { %395 = vrot.lane.b32.xlu1 %v2019_v0, %s1653_s17 }
  0x6a   :  { %686 = vrot.lane.b32.xlu0 %v66_v52, %s1656_s25 }
  0x6b   :  { %781 = vrot.lane.b32.xlu1 %v162_v47, %s1657_s19 }
  0x6e   :  { %108 = vrot.lane.b32.xlu0 %v68_v1, %s1650_s13 }
  0x6f   :  { %397 = vrot.lane.b32.xlu1 %v2032_v2, %s1653_s17 }
  0x72   :  { %492 = vrot.lane.b32.xlu0 %v454_v3, %s1654_s29 }
  0x73   :  { %783 = vrot.lane.b32.xlu1 %v163_v56, %s1657_s19  ;;  %v72_v56 = vld [vmem:[%s2628_s1 + $0xd0] sm:$0xff] }
  0x74   :  { %v93_v6 = vpop.permute.xlu0 %92 }
  0x75   :  { %v190_v7 = vpop.permute.xlu1 %189  ;;  %141 = vst.msk [vmem:[#allocation2] sm:$0xff] %vm140_vm1, %v93_v6 }
  0x76   :  { %238 = vst.msk [vmem:[#allocation2] sm:$0xff] %vm237_vm2, %v190_v7  ;;  %110 = vrot.lane.b32.xlu0 %v2045_v4, %s1650_s13 }
  0x77   :  { %205 = vrot.lane.b32.xlu1 %v165_v5, %s1651_s14  ;;  %v2223_v5 = vld [vmem:[%s2629_s0 + $0xd1] sm:$0xff] }
  0x78   :  { %v95_v10 = vpop.permute.xlu0 %94 }
  0x79   :  { %v192_v11 = vpop.permute.xlu1 %191  ;;  %142 = vst.msk [vmem:[#allocation2 + $0x8] sm:$0xff] %vm140_vm1, %v95_v10 }
  0x7a   :  { %239 = vst.msk [vmem:[#allocation2 + $0x8] sm:$0xff] %vm237_vm2, %v192_v11  ;;  %494 = vrot.lane.b32.xlu0 %v455_v9, %s1654_s29  ;;  %v459_v9 = vld [vmem:[%s2630_s2 + $0xc1] sm:$0xff] }
  0x7b   :  { %590 = vrot.lane.b32.xlu1 %v1808_v19, %s1655_s26  ;;  %v263_v19 = vld [vmem:[%s2630_s2 + $0xa0] sm:$0xff] }
  0x7c   :  { %v287_v14 = vpop.permute.xlu0 %286 }
  0x7d   :  { %v289_v15 = vpop.permute.xlu1 %288  ;;  %335 = vst.msk [vmem:[#allocation2] sm:$0xff] %vm334_vm3, %v287_v14 }
  0x7e   :  { %336 = vst.msk [vmem:[#allocation2 + $0x8] sm:$0xff] %vm334_vm3, %v289_v15  ;;  %207 = vrot.lane.b32.xlu0 %v2073_v12, %s1651_s14 }
  0x7f   :  { %302 = vrot.lane.b32.xlu1 %v262_v13, %s1652_s27  ;;  %v266_v13 = vld [vmem:[%s2630_s2 + $0xd0] sm:$0xff] }
  0x80   :  { %v384_v17 = vpop.permute.xlu0 %383 }
  0x81   :  { %v97_v18 = vpop.permute.xlu1 %96  ;;  %432 = vst.msk [vmem:[#allocation2] sm:$0xff] %vm431_vm4, %v384_v17  ;;  %v267_v17 = vld [vmem:[%s2630_s2 + $0xe0] sm:$0xff] }
  0x82   :  { %143 = vst.msk [vmem:[#allocation2 + $0x10] sm:$0xff] %vm140_vm1, %v97_v18  ;;  %592 = vrot.lane.b32.xlu0 %v1443_v16, %s1655_s26  ;;  %v2264_v18 = vld [vmem:[%s2631_s3 + $0xd0] sm:$0xff] }
  0x83   :  { %688 = vrot.lane.b32.xlu1 %v1967_v55, %s1656_s25 }
  0x84   :  { %v386_v21 = vpop.permute.xlu0 %385 }
  0x85   :  { %v481_v22 = vpop.permute.xlu1 %480  ;;  %433 = vst.msk [vmem:[#allocation2 + $0x8] sm:$0xff] %vm431_vm4, %v386_v21 }
  0x86   :  { %529 = vst.msk [vmem:[#allocation2] sm:$0xff] %vm528_vm5, %v481_v22  ;;  %304 = vrot.lane.b32.xlu0 %v263_v19, %s1652_s27 }
  0x87   :  { %399 = vrot.lane.b32.xlu1 %v2097_v20, %s1653_s17 }
  0x88   :  { %v99_v25 = vpop.permute.xlu0 %98 }
  0x89   :  { %v194_v26 = vpop.permute.xlu1 %193  ;;  %144 = vst.msk [vmem:[#allocation2 + $0x18] sm:$0xff] %vm140_vm1, %v99_v25  ;;  %v2280_v25 = vld [vmem:[%s2628_s1 + $0xf0] sm:$0xff] }
  0x8a   :  { %240 = vst.msk [vmem:[#allocation2 + $0x10] sm:$0xff] %vm237_vm2, %v194_v26  ;;  %690 = vrot.lane.b32.xlu0 %v1459_v24, %s1656_s25  ;;  %v2285_v26 = vld [vmem:[%s2631_s3 + $0xe0] sm:$0xff] }
  0x8b   :  { %785 = vrot.lane.b32.xlu1 %v1989_v59, %s1657_s19 }
  0x8c   :  { %v483_v29 = vpop.permute.xlu0 %482 }
  0x8d   :  { %v579_v30 = vpop.permute.xlu1 %578  ;;  %530 = vst.msk [vmem:[#allocation2 + $0x8] sm:$0xff] %vm528_vm5, %v483_v29 }
  0x8e   :  { %627 = vst.msk [vmem:[#allocation2] sm:$0xff] %vm626_vm6, %v579_v30  ;;  %112 = vrot.lane.b32.xlu0 %v70_v27, %s1650_s13 }
  0x8f   :  { %401 = vrot.lane.b32.xlu1 %v2118_v28, %s1653_s17 }
  0x90   :  { %v196_v34 = vpop.permute.xlu0 %195 }
  0x91   :  { %v291_v35 = vpop.permute.xlu1 %290  ;;  %241 = vst.msk [vmem:[#allocation2 + $0x18] sm:$0xff] %vm237_vm2, %v196_v34 }
  0x92   :  { %337 = vst.msk [vmem:[#allocation2 + $0x10] sm:$0xff] %vm334_vm3, %v291_v35  ;;  %496 = vrot.lane.b32.xlu0 %v456_v31, %s1654_s29  ;;  %v460_v31 = vld [vmem:[%s2630_s2 + $0xd1] sm:$0xff]  ;;  %v1150_v35 = vld [vmem:[%s2633_s5] sm:$0xff] }
  0x93   :  { %787 = vrot.lane.b32.xlu1 %v1475_v33, %s1657_s19  ;;  %1600 = vmatprep.subr.mxu1 %v1150_v35 }
  0x94   :  { %v581_v38 = vpop.permute.xlu0 %580  ;;  %1601 = vmatpush3.msra.mxu1 %v1150_v35 }
  0x95   :  { %v677_v39 = vpop.permute.xlu1 %676  ;;  %628 = vst.msk [vmem:[#allocation2 + $0x8] sm:$0xff] %vm626_vm6, %v581_v38  ;;  %v2314_v38 = vld [vmem:[%s2628_s1 + $0x100] sm:$0xff] }
  0x96   :  { %725 = vst.msk [vmem:[#allocation2] sm:$0xff] %vm724_vm7, %v677_v39  ;;  %114 = vrot.lane.b32.xlu0 %v2138_v36, %s1650_s13  ;;  %v2319_v39 = vld [vmem:[%s2629_s0 + $0xf1] sm:$0xff] }
  0x97   :  { %209 = vrot.lane.b32.xlu1 %v167_v37, %s1651_s14 }
  0x98   :  { %v293_v41 = vpop.permute.xlu0 %292 }
  0x99   :  { %v388_v42 = vpop.permute.xlu1 %387  ;;  %338 = vst.msk [vmem:[#allocation2 + $0x18] sm:$0xff] %vm334_vm3, %v293_v41 }
  0x9a   :  { %434 = vst.msk [vmem:[#allocation2 + $0x10] sm:$0xff] %vm431_vm4, %v388_v42  ;;  %498 = vrot.lane.b32.xlu0 %v457_v40, %s1654_s29  ;;  %v1136_v42 = vld [vmem:[%s2631_s3 + $0x20] sm:$0xff] }
  0x9b   :  { %594 = vrot.lane.b32.xlu1 %v1827_v23, %s1655_s26 }
  0x9c   :  { %v679_v45 = vpop.permute.xlu0 %678 }
  0x9d   :  { %v774_v47 = vpop.permute.xlu1 %773  ;;  %726 = vst.msk [vmem:[#allocation2 + $0x8] sm:$0xff] %vm724_vm7, %v679_v45 }
  0x9e   :  { %822 = vst.msk [vmem:[#allocation2] sm:$0xff] %vm821_vm8, %v774_v47  ;;  %211 = vrot.lane.b32.xlu0 %v2159_v43, %s1651_s14 }
  0x9f   :  { %306 = vrot.lane.b32.xlu1 %v264_v44, %s1652_s27  ;;  %v461_v44 = vld [vmem:[%s2630_s2 + $0xe1] sm:$0xff] }
  0xa0   :  { %v101_v23 = vpop.permute.xlu0 %100 }
  0xa1   :  { %v390_v48 = vpop.permute.xlu1 %389  ;;  %145 = vst.msk [vmem:[#allocation2 + $0x20] sm:$0xff] %vm140_vm1, %v101_v23  ;;  %v1138_v23 = vld [vmem:[%s2631_s3 + $0x40] sm:$0xff] }
  0xa2   :  { %435 = vst.msk [vmem:[#allocation2 + $0x18] sm:$0xff] %vm431_vm4, %v390_v48  ;;  %596 = vrot.lane.b32.xlu0 %v1859_v32, %s1655_s26  ;;  %v1139_v48 = vld [vmem:[%s2631_s3 + $0x50] sm:$0xff] }
  0xa3   :  { %692 = vrot.lane.b32.xlu1 %v2045_v4, %s1656_s25  ;;  %v2218_v4 = vld [vmem:[%s2628_s1 + $0xe0] sm:$0xff] }
  0xa4   :  { %v485_v52 = vpop.permute.xlu0 %484 }
  0xa5   :  { %v776_v53 = vpop.permute.xlu1 %775  ;;  %v838_v54 = vld [vmem:[#allocation2] sm:$0xff]  ;;  %531 = vst.msk [vmem:[#allocation2 + $0x10] sm:$0xff] %vm528_vm5, %v485_v52  ;;  %v268_v52 = vld [vmem:[%s2630_s2 + $0xf0] sm:$0xff] }
  0xa6   :  { %823 = vst.msk [vmem:[#allocation2 + $0x8] sm:$0xff] %vm821_vm8, %v776_v53  ;;  %1576 = vmatprep.mubr.msk.f32.mxu0 %vm863_vm9, %v838_v54  ;;  %308 = vrot.lane.b32.xlu0 %v265_v50, %s1652_s27  ;;  %v2354_v50 = vld [vmem:[%s2629_s0 + $0x101] sm:$0xff] }
  0xa7   :  { %403 = vrot.lane.b32.xlu1 %v2181_v51, %s1653_s17 }
  0xa8   :  { %v103_v32 = vpop.permute.xlu0 %102 }
  0xa9   :  { %v198_v55 = vpop.permute.xlu1 %197  ;;  %146 = vst.msk [vmem:[#allocation2 + $0x28] sm:$0xff] %vm140_vm1, %v103_v32 }
  0xaa   :  { %242 = vst.msk [vmem:[#allocation2 + $0x20] sm:$0xff] %vm237_vm2, %v198_v55  ;;  %694 = vrot.lane.b32.xlu0 %v70_v27, %s1656_s25 }
  0xab   :  { %789 = vrot.lane.b32.xlu1 %v2073_v12, %s1657_s19  ;;  %v2242_v12 = vld [vmem:[%s2629_s0 + $0xe1] sm:$0xff] }
  0xac   :  { %v487_v59 = vpop.permute.xlu0 %486 }
  0xad   :  { %v583_v60 = vpop.permute.xlu1 %582  ;;  %v839_v61 = vld [vmem:[#allocation2 + $0x8] sm:$0xff]  ;;  %532 = vst.msk [vmem:[#allocation2 + $0x18] sm:$0xff] %vm528_vm5, %v487_v59 }
  0xae   :  { %629 = vst.msk [vmem:[#allocation2 + $0x10] sm:$0xff] %vm626_vm6, %v583_v60  ;;  %1577 = vmatmul.mubr.msk.f32.vlgmr.msra.gmra.mrb[0].mxu0 %vm863_vm9, %v839_v61  ;;  %116 = vrot.lane.b32.xlu0 %v72_v56, %s1650_s13 }
  0xaf   :  { %405 = vrot.lane.b32.xlu1 %v2200_v57, %s1653_s17 }
  0xb0   :  { %v200_v1 = vpop.permute.xlu0 %199 }
  0xb1   :  { %v295_v3 = vpop.permute.xlu1 %294  ;;  %243 = vst.msk [vmem:[#allocation2 + $0x28] sm:$0xff] %vm237_vm2, %v200_v1 }
  0xb2   :  { %339 = vst.msk [vmem:[#allocation2 + $0x20] sm:$0xff] %vm334_vm3, %v295_v3  ;;  %500 = vrot.lane.b32.xlu0 %v458_v63, %s1654_s29  ;;  %v463_v63 = vld [vmem:[%s2630_s2 + $0x101] sm:$0xff] }
  0xb3   :  { %791 = vrot.lane.b32.xlu1 %v167_v37, %s1657_s19  ;;  %v1135_v37 = vld [vmem:[%s2631_s3 + $0x10] sm:$0xff] }
  0xb4   :  { %v585_v6 = vpop.permute.xlu0 %584 }
  0xb5   :  { %v681_v7 = vpop.permute.xlu1 %680  ;;  %630 = vst.msk [vmem:[#allocation2 + $0x18] sm:$0xff] %vm626_vm6, %v585_v6 }
  0xb6   :  { %727 = vst.msk [vmem:[#allocation2 + $0x10] sm:$0xff] %vm724_vm7, %v681_v7  ;;  %118 = vrot.lane.b32.xlu0 %v2218_v4, %s1650_s13  ;;  %v1467_v7 = vld [vmem:[%s2628_s1 + $0x110] sm:$0xff] }
  0xb7   :  { %213 = vrot.lane.b32.xlu1 %v2223_v5, %s1651_s14 }
  0xb8   :  { %v297_v10 = vpop.permute.xlu0 %296 }
  0xb9   :  { %v392_v11 = vpop.permute.xlu1 %391  ;;  %340 = vst.msk [vmem:[#allocation2 + $0x28] sm:$0xff] %vm334_vm3, %v297_v10 }
  0xba   :  { %436 = vst.msk [vmem:[#allocation2 + $0x20] sm:$0xff] %vm431_vm4, %v392_v11  ;;  %502 = vrot.lane.b32.xlu0 %v459_v9, %s1654_s29 }
  0xbb   :  { %598 = vrot.lane.b32.xlu1 %v1914_v46, %s1655_s26 }
  0xbc   :  { %v683_v14 = vpop.permute.xlu0 %682 }
  0xbd   :  { %v778_v15 = vpop.permute.xlu1 %777  ;;  %728 = vst.msk [vmem:[#allocation2 + $0x18] sm:$0xff] %vm724_vm7, %v683_v14 }
  0xbe   :  { %824 = vst.msk [vmem:[#allocation2 + $0x10] sm:$0xff] %vm821_vm8, %v778_v15  ;;  %215 = vrot.lane.b32.xlu0 %v2242_v12, %s1651_s14 }
  0xbf   :  { %310 = vrot.lane.b32.xlu1 %v266_v13, %s1652_s27 }
  0xc0   :  { %v105_v46 = vpop.permute.xlu0 %104 }
  0xc1   :  { %v394_v16 = vpop.permute.xlu1 %393  ;;  %147 = vst.msk [vmem:[#allocation2 + $0x30] sm:$0xff] %vm140_vm1, %v105_v46 }
  0xc2   :  { %437 = vst.msk [vmem:[#allocation2 + $0x28] sm:$0xff] %vm431_vm4, %v394_v16  ;;  %600 = vrot.lane.b32.xlu0 %v1932_v49, %s1655_s26 }
  0xc3   :  { %696 = vrot.lane.b32.xlu1 %v2138_v36, %s1656_s25  ;;  %v1134_v36 = vld [vmem:[%s2631_s3] sm:$0xff] }
  0xc4   :  { %v489_v19 = vpop.permute.xlu0 %488  ;;  %1602 = vmatprep.mubr.msk.f32.mxu1 %vm43_vm0, %v1134_v36 }
  0xc5   :  { %v780_v21 = vpop.permute.xlu1 %779  ;;  %v840_v22 = vld [vmem:[#allocation2 + $0x10] sm:$0xff]  ;;  %533 = vst.msk [vmem:[#allocation2 + $0x20] sm:$0xff] %vm528_vm5, %v489_v19  ;;  %1603 = vmatmul.mubr.msk.f32.vlgmr.msra.gmra.mrb[0].mxu1 %vm43_vm0, %v1135_v37 }
  0xc6   :  { %825 = vst.msk [vmem:[#allocation2 + $0x18] sm:$0xff] %vm821_vm8, %v780_v21  ;;  %1579 = vmatprep.mubr.msk.f32.mxu0 %vm863_vm9, %v840_v22  ;;  %312 = vrot.lane.b32.xlu0 %v267_v17, %s1652_s27 }
  0xc7   :  { %407 = vrot.lane.b32.xlu1 %v2264_v18, %s1653_s17  ;;  %1605 = vmatprep.mubr.msk.f32.mxu1 %vm43_vm0, %v1136_v42 }
  0xc8   :  { %v107_v49 = vpop.permute.xlu0 %106 }
  0xc9   :  { %v202_v24 = vpop.permute.xlu1 %201  ;;  %148 = vst.msk [vmem:[#allocation2 + $0x38] sm:$0xff] %vm140_vm1, %v107_v49 }
  0xca   :  { %244 = vst.msk [vmem:[#allocation2 + $0x30] sm:$0xff] %vm237_vm2, %v202_v24  ;;  %698 = vrot.lane.b32.xlu0 %v72_v56, %s1656_s25 }
  0xcb   :  { %793 = vrot.lane.b32.xlu1 %v2159_v43, %s1657_s19  ;;  %v1137_v43 = vld [vmem:[%s2631_s3 + $0x30] sm:$0xff] }
  0xcc   :  { %v491_v27 = vpop.permute.xlu0 %490  ;;  %1606 = vmatmul.mubr.msk.f32.gmra.mrb[2].mxu1 %vm43_vm0, %v1137_v43 }
  0xcd   :  { %v587_v29 = vpop.permute.xlu1 %586  ;;  %v841_v30 = vld [vmem:[#allocation2 + $0x18] sm:$0xff]  ;;  %534 = vst.msk [vmem:[#allocation2 + $0x28] sm:$0xff] %vm528_vm5, %v491_v27  ;;  %1608 = vmatprep.mubr.msk.f32.mxu1 %vm43_vm0, %v1138_v23 }
  0xce   :  { %631 = vst.msk [vmem:[#allocation2 + $0x20] sm:$0xff] %vm626_vm6, %v587_v29  ;;  %1580 = vmatmul.mubr.msk.f32.gmra.mrb[2].mxu0 %vm863_vm9, %v841_v30  ;;  %120 = vrot.lane.b32.xlu0 %v2280_v25, %s1650_s13 }
  0xcf   :  { %409 = vrot.lane.b32.xlu1 %v2285_v26, %s1653_s17 }
  0xd0   :  { %v204_v33 = vpop.permute.xlu0 %203  ;;  %1609 = vmatmul.mubr.msk.f32.gmra.mrb[4].mxu1 %vm43_vm0, %v1139_v48 }
  0xd1   :  { %v299_v34 = vpop.permute.xlu1 %298  ;;  %245 = vst.msk [vmem:[#allocation2 + $0x38] sm:$0xff] %vm237_vm2, %v204_v33  ;;  %1611 = vmatprep.mubr.msk.f32.mxu1 %vm43_vm0, %v2019_v0  ;;  %v269_v0 = vld [vmem:[%s2630_s2 + $0x100] sm:$0xff] }
  0xd2   :  { %341 = vst.msk [vmem:[#allocation2 + $0x30] sm:$0xff] %vm334_vm3, %v299_v34  ;;  %504 = vrot.lane.b32.xlu0 %v460_v31, %s1654_s29 }
  0xd3   :  { %795 = vrot.lane.b32.xlu1 %v2223_v5, %s1657_s19 }
  0xd4   :  { %v589_v40 = vpop.permute.xlu0 %588  ;;  %1612 = vmatmul.mubr.msk.f32.gmra.mrb[6].mxu1 %vm43_vm0, %v2032_v2  ;;  %v365_v2 = vld [vmem:[%s2631_s3 + $0xf0] sm:$0xff] }
  0xd5   :  { %v685_v41 = vpop.permute.xlu1 %684  ;;  %632 = vst.msk [vmem:[#allocation2 + $0x28] sm:$0xff] %vm626_vm6, %v589_v40  ;;  %1614 = vmatprep.mubr.msk.f32.mxu1 %vm43_vm0, %v2097_v20 }
  0xd6   :  { %729 = vst.msk [vmem:[#allocation2 + $0x20] sm:$0xff] %vm724_vm7, %v685_v41  ;;  %122 = vrot.lane.b32.xlu0 %v2314_v38, %s1650_s13 }
  0xd7   :  { %217 = vrot.lane.b32.xlu1 %v2319_v39, %s1651_s14 }
  0xd8   :  { %v301_v45 = vpop.permute.xlu0 %300  ;;  %1615 = vmatmul.mubr.msk.f32.gmra.mrb[8].mxu1 %vm43_vm0, %v2118_v28  ;;  %v366_v28 = vld [vmem:[%s2631_s3 + $0x100] sm:$0xff] }
  0xd9   :  { %v396_v47 = vpop.permute.xlu1 %395  ;;  %342 = vst.msk [vmem:[#allocation2 + $0x38] sm:$0xff] %vm334_vm3, %v301_v45  ;;  %1617 = vmatprep.mubr.msk.f32.mxu1 %vm43_vm0, %v2181_v51  ;;  %v462_v51 = vld [vmem:[%s2630_s2 + $0xf1] sm:$0xff] }
  0xda   :  { %438 = vst.msk [vmem:[#allocation2 + $0x30] sm:$0xff] %vm431_vm4, %v396_v47  ;;  %506 = vrot.lane.b32.xlu0 %v461_v44, %s1654_s29 }
  0xdb   :  { %602 = vrot.lane.b32.xlu1 %v1984_v58, %s1655_s26 }
  0xdc   :  { %v687_v53 = vpop.permute.xlu0 %686  ;;  %1618 = vmatmul.mubr.msk.f32.gmra.mrb[10].mxu1 %vm43_vm0, %v2200_v57 }
  0xdd   :  { %v782_v54 = vpop.permute.xlu1 %781  ;;  %730 = vst.msk [vmem:[#allocation2 + $0x28] sm:$0xff] %vm724_vm7, %v687_v53  ;;  %1620 = vmatprep.mubr.msk.f32.mxu1 %vm43_vm0, %v2264_v18 }
  0xde   :  { %826 = vst.msk [vmem:[#allocation2 + $0x20] sm:$0xff] %vm821_vm8, %v782_v54  ;;  %219 = vrot.lane.b32.xlu0 %v2354_v50, %s1651_s14 }
  0xdf   :  { %314 = vrot.lane.b32.xlu1 %v268_v52, %s1652_s27 }
  0xe0   :  { %v109_v58 = vpop.permute.xlu0 %108  ;;  %1621 = vmatmul.mubr.msk.f32.gmra.mrb[12].mxu1 %vm43_vm0, %v2285_v26 }
  0xe1   :  { %v398_v32 = vpop.permute.xlu1 %397  ;;  %149 = vst.msk [vmem:[#allocation2 + $0x40] sm:$0xff] %vm140_vm1, %v109_v58  ;;  %1623 = vmatprep.mubr.msk.f32.mxu1 %vm43_vm0, %v365_v2 }
  0xe2   :  { %439 = vst.msk [vmem:[#allocation2 + $0x38] sm:$0xff] %vm431_vm4, %v398_v32  ;;  %604 = vrot.lane.b32.xlu0 %v2006_v62, %s1655_s26 }
  0xe3   :  { %700 = vrot.lane.b32.xlu1 %v2218_v4, %s1656_s25  ;;  %v1451_v4 = vld [vmem:[%s2629_s0 + $0x110] sm:$0xff] }
  0xe4   :  { %v493_v55 = vpop.permute.xlu0 %492  ;;  %1624 = vmatmul.mubr.msk.f32.gmra.mrb[14].mxu1 %vm43_vm0, %v366_v28 }
  0xe5   :  { %v784_v56 = vpop.permute.xlu1 %783  ;;  %v842_v59 = vld [vmem:[#allocation2 + $0x20] sm:$0xff]  ;;  %535 = vst.msk [vmem:[#allocation2 + $0x30] sm:$0xff] %vm528_vm5, %v493_v55 }
  0xe6   :  { %827 = vst.msk [vmem:[#allocation2 + $0x28] sm:$0xff] %vm821_vm8, %v784_v56  ;;  %1582 = vmatprep.mubr.msk.f32.mxu0 %vm863_vm9, %v842_v59  ;;  %316 = vrot.lane.b32.xlu0 %v269_v0, %s1652_s27 }
  0xe7   :  { %411 = vrot.lane.b32.xlu1 %v365_v2, %s1653_s17 }
  0xe8   :  { %v111_v62 = vpop.permute.xlu0 %110 }
  0xe9   :  { %v206_v20 = vpop.permute.xlu1 %205  ;;  %150 = vst.msk [vmem:[#allocation2 + $0x48] sm:$0xff] %vm140_vm1, %v111_v62 }
  0xea   :  { %246 = vst.msk [vmem:[#allocation2 + $0x40] sm:$0xff] %vm237_vm2, %v206_v20  ;;  %702 = vrot.lane.b32.xlu0 %v2280_v25, %s1656_s25 }
  0xeb   :  { %797 = vrot.lane.b32.xlu1 %v2242_v12, %s1657_s19 }
  0xec   :  { %v495_v57 = vpop.permute.xlu0 %494 }
  0xed   :  { %v591_v60 = vpop.permute.xlu1 %590  ;;  %v843_v61 = vld [vmem:[#allocation2 + $0x28] sm:$0xff]  ;;  %536 = vst.msk [vmem:[#allocation2 + $0x38] sm:$0xff] %vm528_vm5, %v495_v57 }
  0xee   :  { %633 = vst.msk [vmem:[#allocation2 + $0x30] sm:$0xff] %vm626_vm6, %v591_v60  ;;  %1583 = vmatmul.mubr.msk.f32.gmra.mrb[4].mxu0 %vm863_vm9, %v843_v61  ;;  %413 = vrot.lane.b32.xlu0 %v366_v28, %s1653_s17 }
  0xef   :  { %508 = vrot.lane.b32.xlu1 %v462_v51, %s1654_s29 }
  0xf0   :  { %v208_v1 = vpop.permute.xlu0 %207 }
  0xf1   :  { %v303_v3 = vpop.permute.xlu1 %302  ;;  %247 = vst.msk [vmem:[#allocation2 + $0x48] sm:$0xff] %vm237_vm2, %v208_v1 }
  0xf2   :  { %343 = vst.msk [vmem:[#allocation2 + $0x40] sm:$0xff] %vm334_vm3, %v303_v3  ;;  %799 = vrot.lane.b32.xlu0 %v2319_v39, %s1657_s19 }
  0xf3   :  { %510 = vrot.lane.b32.xlu1 %v463_v63, %s1654_s29 }
  0xf4   :  { %v593_v5 = vpop.permute.xlu0 %592 }
  0xf5   :  { %v689_v6 = vpop.permute.xlu1 %688  ;;  %634 = vst.msk [vmem:[#allocation2 + $0x38] sm:$0xff] %vm626_vm6, %v593_v5 }
  0xf6   :  { %731 = vst.msk [vmem:[#allocation2 + $0x30] sm:$0xff] %vm724_vm7, %v689_v6  ;;  %606 = vrot.lane.b32.xlu0 %v2054_v8, %s1655_s26  ;;  %v1483_v8 = vld [vmem:[%s2629_s0 + $0x111] sm:$0xff] }
  0xf7   :  { %608 = vrot.lane.b32.xlu1 %v1451_v4, %s1655_s26 }
  0xf8   :  { %v305_v9 = vpop.permute.xlu0 %304 }
  0xf9   :  { %v400_v10 = vpop.permute.xlu1 %399  ;;  %344 = vst.msk [vmem:[#allocation2 + $0x48] sm:$0xff] %vm334_vm3, %v305_v9 }
  0xfa   :  { %440 = vst.msk [vmem:[#allocation2 + $0x40] sm:$0xff] %vm431_vm4, %v400_v10  ;;  %704 = vrot.lane.b32.xlu0 %v2314_v38, %s1656_s25 }
  0xfb   :  { %706 = vrot.lane.b32.xlu1 %v1467_v7, %s1656_s25 }
  0xfc   :  { %v691_v11 = vpop.permute.xlu0 %690 }
  0xfd   :  { %v786_v12 = vpop.permute.xlu1 %785  ;;  %732 = vst.msk [vmem:[#allocation2 + $0x38] sm:$0xff] %vm724_vm7, %v691_v11 }
  0xfe   :  { %828 = vst.msk [vmem:[#allocation2 + $0x30] sm:$0xff] %vm821_vm8, %v786_v12  ;;  %801 = vrot.lane.b32.xlu0 %v2354_v50, %s1657_s19 }
  0xff   :  { %803 = vrot.lane.b32.xlu1 %v1483_v8, %s1657_s19 }
 0x100   :  { %v113_v13 = vpop.permute.xlu0 %112 }
 0x101   :  { %v402_v14 = vpop.permute.xlu1 %401  ;;  %151 = vst.msk [vmem:[#allocation2 + $0x50] sm:$0xff] %vm140_vm1, %v113_v13 }
 0x102   :  { %441 = vst.msk [vmem:[#allocation2 + $0x48] sm:$0xff] %vm431_vm4, %v402_v14 }
 0x104   :  { %v497_v15 = vpop.permute.xlu0 %496 }
 0x105   :  { %v788_v46 = vpop.permute.xlu1 %787  ;;  %v844_v16 = vld [vmem:[#allocation2 + $0x30] sm:$0xff]  ;;  %537 = vst.msk [vmem:[#allocation2 + $0x40] sm:$0xff] %vm528_vm5, %v497_v15 }
 0x106   :  { %829 = vst.msk [vmem:[#allocation2 + $0x38] sm:$0xff] %vm821_vm8, %v788_v46  ;;  %1585 = vmatprep.mubr.msk.f32.mxu0 %vm863_vm9, %v844_v16 }
 0x108   :  { %v115_v17 = vpop.permute.xlu0 %114 }
 0x109   :  { %v210_v18 = vpop.permute.xlu1 %209  ;;  %152 = vst.msk [vmem:[#allocation2 + $0x58] sm:$0xff] %vm140_vm1, %v115_v17 }
 0x10a   :  { %248 = vst.msk [vmem:[#allocation2 + $0x50] sm:$0xff] %vm237_vm2, %v210_v18 }
 0x10c   :  { %v499_v19 = vpop.permute.xlu0 %498 }
 0x10d   :  { %v595_v21 = vpop.permute.xlu1 %594  ;;  %v845_v22 = vld [vmem:[#allocation2 + $0x38] sm:$0xff]  ;;  %538 = vst.msk [vmem:[#allocation2 + $0x48] sm:$0xff] %vm528_vm5, %v499_v19 }
 0x10e   :  { %635 = vst.msk [vmem:[#allocation2 + $0x40] sm:$0xff] %vm626_vm6, %v595_v21  ;;  %1586 = vmatmul.mubr.msk.f32.gmra.mrb[6].mxu0 %vm863_vm9, %v845_v22 }
 0x110   :  { %v212_v49 = vpop.permute.xlu0 %211 }
 0x111   :  { %v307_v24 = vpop.permute.xlu1 %306  ;;  %249 = vst.msk [vmem:[#allocation2 + $0x58] sm:$0xff] %vm237_vm2, %v212_v49 }
 0x112   :  { %345 = vst.msk [vmem:[#allocation2 + $0x50] sm:$0xff] %vm334_vm3, %v307_v24 }
 0x114   :  { %v597_v25 = vpop.permute.xlu0 %596 }
 0x115   :  { %v693_v26 = vpop.permute.xlu1 %692  ;;  %636 = vst.msk [vmem:[#allocation2 + $0x48] sm:$0xff] %vm626_vm6, %v597_v25 }
 0x116   :  { %733 = vst.msk [vmem:[#allocation2 + $0x40] sm:$0xff] %vm724_vm7, %v693_v26 }
 0x118   :  { %v309_v27 = vpop.permute.xlu0 %308 }
 0x119   :  { %v404_v29 = vpop.permute.xlu1 %403  ;;  %346 = vst.msk [vmem:[#allocation2 + $0x58] sm:$0xff] %vm334_vm3, %v309_v27 }
 0x11a   :  { %442 = vst.msk [vmem:[#allocation2 + $0x50] sm:$0xff] %vm431_vm4, %v404_v29 }
 0x11c   :  { %v695_v30 = vpop.permute.xlu0 %694 }
 0x11d   :  { %v790_v31 = vpop.permute.xlu1 %789  ;;  %734 = vst.msk [vmem:[#allocation2 + $0x48] sm:$0xff] %vm724_vm7, %v695_v30 }
 0x11e   :  { %830 = vst.msk [vmem:[#allocation2 + $0x40] sm:$0xff] %vm821_vm8, %v790_v31 }
 0x120   :  { %v117_v33 = vpop.permute.xlu0 %116 }
 0x121   :  { %v406_v34 = vpop.permute.xlu1 %405  ;;  %153 = vst.msk [vmem:[#allocation2 + $0x60] sm:$0xff] %vm140_vm1, %v117_v33 }
 0x122   :  { %443 = vst.msk [vmem:[#allocation2 + $0x58] sm:$0xff] %vm431_vm4, %v406_v34 }
 0x124   :  { %v501_v35 = vpop.permute.xlu0 %500 }
 0x125   :  { %v792_v36 = vpop.permute.xlu1 %791  ;;  %v846_v37 = vld [vmem:[#allocation2 + $0x40] sm:$0xff]  ;;  %539 = vst.msk [vmem:[#allocation2 + $0x50] sm:$0xff] %vm528_vm5, %v501_v35 }
 0x126   :  { %831 = vst.msk [vmem:[#allocation2 + $0x48] sm:$0xff] %vm821_vm8, %v792_v36  ;;  %1588 = vmatprep.mubr.msk.f32.mxu0 %vm863_vm9, %v846_v37 }
 0x128   :  { %v119_v38 = vpop.permute.xlu0 %118 }
 0x129   :  { %v214_v39 = vpop.permute.xlu1 %213  ;;  %154 = vst.msk [vmem:[#allocation2 + $0x68] sm:$0xff] %vm140_vm1, %v119_v38 }
 0x12a   :  { %250 = vst.msk [vmem:[#allocation2 + $0x60] sm:$0xff] %vm237_vm2, %v214_v39 }
 0x12c   :  { %v503_v40 = vpop.permute.xlu0 %502 }
 0x12d   :  { %v599_v41 = vpop.permute.xlu1 %598  ;;  %v847_v42 = vld [vmem:[#allocation2 + $0x48] sm:$0xff]  ;;  %540 = vst.msk [vmem:[#allocation2 + $0x58] sm:$0xff] %vm528_vm5, %v503_v40 }
 0x12e   :  { %637 = vst.msk [vmem:[#allocation2 + $0x50] sm:$0xff] %vm626_vm6, %v599_v41  ;;  %1589 = vmatmul.mubr.msk.f32.gmra.mrb[8].mxu0 %vm863_vm9, %v847_v42 }
 0x130   :  { %v216_v43 = vpop.permute.xlu0 %215 }
 0x131   :  { %v311_v44 = vpop.permute.xlu1 %310  ;;  %251 = vst.msk [vmem:[#allocation2 + $0x68] sm:$0xff] %vm237_vm2, %v216_v43 }
 0x132   :  { %347 = vst.msk [vmem:[#allocation2 + $0x60] sm:$0xff] %vm334_vm3, %v311_v44 }
 0x134   :  { %v601_v45 = vpop.permute.xlu0 %600 }
 0x135   :  { %v697_v47 = vpop.permute.xlu1 %696  ;;  %638 = vst.msk [vmem:[#allocation2 + $0x58] sm:$0xff] %vm626_vm6, %v601_v45 }
 0x136   :  { %735 = vst.msk [vmem:[#allocation2 + $0x50] sm:$0xff] %vm724_vm7, %v697_v47 }
 0x138   :  { %v313_v23 = vpop.permute.xlu0 %312 }
 0x139   :  { %v408_v48 = vpop.permute.xlu1 %407  ;;  %348 = vst.msk [vmem:[#allocation2 + $0x68] sm:$0xff] %vm334_vm3, %v313_v23 }
 0x13a   :  { %444 = vst.msk [vmem:[#allocation2 + $0x60] sm:$0xff] %vm431_vm4, %v408_v48 }
 0x13c   :  { %v699_v50 = vpop.permute.xlu0 %698 }
 0x13d   :  { %v794_v52 = vpop.permute.xlu1 %793  ;;  %736 = vst.msk [vmem:[#allocation2 + $0x58] sm:$0xff] %vm724_vm7, %v699_v50 }
 0x13e   :  { %832 = vst.msk [vmem:[#allocation2 + $0x50] sm:$0xff] %vm821_vm8, %v794_v52 }
 0x140   :  { %v121_v53 = vpop.permute.xlu0 %120 }
 0x141   :  { %v410_v54 = vpop.permute.xlu1 %409  ;;  %155 = vst.msk [vmem:[#allocation2 + $0x70] sm:$0xff] %vm140_vm1, %v121_v53 }
 0x142   :  { %445 = vst.msk [vmem:[#allocation2 + $0x68] sm:$0xff] %vm431_vm4, %v410_v54 }
 0x144   :  { %v505_v58 = vpop.permute.xlu0 %504 }
 0x145   :  { %v796_v32 = vpop.permute.xlu1 %795  ;;  %v848_v0 = vld [vmem:[#allocation2 + $0x50] sm:$0xff]  ;;  %541 = vst.msk [vmem:[#allocation2 + $0x60] sm:$0xff] %vm528_vm5, %v505_v58 }
 0x146   :  { %833 = vst.msk [vmem:[#allocation2 + $0x58] sm:$0xff] %vm821_vm8, %v796_v32  ;;  %1591 = vmatprep.mubr.msk.f32.mxu0 %vm863_vm9, %v848_v0 }
 0x148   :  { %v123_v2 = vpop.permute.xlu0 %122 }
 0x149   :  { %v218_v55 = vpop.permute.xlu1 %217  ;;  %156 = vst.msk [vmem:[#allocation2 + $0x78] sm:$0xff] %vm140_vm1, %v123_v2 }
 0x14a   :  { %252 = vst.msk [vmem:[#allocation2 + $0x70] sm:$0xff] %vm237_vm2, %v218_v55 }
 0x14c   :  { %v507_v56 = vpop.permute.xlu0 %506 }
 0x14d   :  { %v603_v59 = vpop.permute.xlu1 %602  ;;  %v849_v62 = vld [vmem:[#allocation2 + $0x58] sm:$0xff]  ;;  %542 = vst.msk [vmem:[#allocation2 + $0x68] sm:$0xff] %vm528_vm5, %v507_v56 }
 0x14e   :  { %639 = vst.msk [vmem:[#allocation2 + $0x60] sm:$0xff] %vm626_vm6, %v603_v59  ;;  %1592 = vmatmul.mubr.msk.f32.gmra.mrb[10].mxu0 %vm863_vm9, %v849_v62 }
 0x150   :  { %v220_v20 = vpop.permute.xlu0 %219 }
 0x151   :  { %v315_v28 = vpop.permute.xlu1 %314  ;;  %253 = vst.msk [vmem:[#allocation2 + $0x78] sm:$0xff] %vm237_vm2, %v220_v20 }
 0x152   :  { %349 = vst.msk [vmem:[#allocation2 + $0x70] sm:$0xff] %vm334_vm3, %v315_v28 }
 0x154   :  { %v605_v51 = vpop.permute.xlu0 %604 }
 0x155   :  { %v701_v57 = vpop.permute.xlu1 %700  ;;  %640 = vst.msk [vmem:[#allocation2 + $0x68] sm:$0xff] %vm626_vm6, %v605_v51 }
 0x156   :  { %737 = vst.msk [vmem:[#allocation2 + $0x60] sm:$0xff] %vm724_vm7, %v701_v57 }
 0x158   :  { %v317_v60 = vpop.permute.xlu0 %316 }
 0x159   :  { %v412_v61 = vpop.permute.xlu1 %411  ;;  %350 = vst.msk [vmem:[#allocation2 + $0x78] sm:$0xff] %vm334_vm3, %v317_v60 }
 0x15a   :  { %446 = vst.msk [vmem:[#allocation2 + $0x70] sm:$0xff] %vm431_vm4, %v412_v61 }
 0x15c   :  { %v703_v63 = vpop.permute.xlu0 %702 }
 0x15d   :  { %v798_v1 = vpop.permute.xlu1 %797  ;;  %738 = vst.msk [vmem:[#allocation2 + $0x68] sm:$0xff] %vm724_vm7, %v703_v63 }
 0x15e   :  { %834 = vst.msk [vmem:[#allocation2 + $0x60] sm:$0xff] %vm821_vm8, %v798_v1 }
 0x160   :  { %v414_v3 = vpop.permute.xlu0 %413 }
 0x161   :  { %v509_v4 = vpop.permute.xlu1 %508  ;;  %447 = vst.msk [vmem:[#allocation2 + $0x78] sm:$0xff] %vm431_vm4, %v414_v3 }
 0x162   :  { %543 = vst.msk [vmem:[#allocation2 + $0x70] sm:$0xff] %vm528_vm5, %v509_v4 }
 0x164   :  { %v800_v5 = vpop.permute.xlu0 %799 }
 0x165   :  { %v511_v6 = vpop.permute.xlu1 %510  ;;  %v850_v7 = vld [vmem:[#allocation2 + $0x60] sm:$0xff]  ;;  %835 = vst.msk [vmem:[#allocation2 + $0x68] sm:$0xff] %vm821_vm8, %v800_v5 }
 0x166   :  { %544 = vst.msk [vmem:[#allocation2 + $0x78] sm:$0xff] %vm528_vm5, %v511_v6  ;;  %1594 = vmatprep.mubr.msk.f32.mxu0 %vm863_vm9, %v850_v7 }
 0x168   :  { %v607_v9 = vpop.permute.xlu0 %606 }
 0x169   :  { %v609_v10 = vpop.permute.xlu1 %608  ;;  %641 = vst.msk [vmem:[#allocation2 + $0x70] sm:$0xff] %vm626_vm6, %v607_v9 }
 0x16a   :  { %642 = vst.msk [vmem:[#allocation2 + $0x78] sm:$0xff] %vm626_vm6, %v609_v10 }
 0x16c   :  { %v705_v8 = vpop.permute.xlu0 %704  ;;  %v851_v12 = vld [vmem:[#allocation2 + $0x68] sm:$0xff] }
 0x16d   :  { %v707_v11 = vpop.permute.xlu1 %706  ;;  %739 = vst.msk [vmem:[#allocation2 + $0x70] sm:$0xff] %vm724_vm7, %v705_v8  ;;  %1595 = vmatmul.mubr.msk.f32.gmra.mrb[12].mxu0 %vm863_vm9, %v851_v12 }
 0x16e   :  { %740 = vst.msk [vmem:[#allocation2 + $0x78] sm:$0xff] %vm724_vm7, %v707_v11 }
 0x170   :  { %v802_v13 = vpop.permute.xlu0 %801 }
 0x171   :  { %v804_v14 = vpop.permute.xlu1 %803  ;;  %836 = vst.msk [vmem:[#allocation2 + $0x70] sm:$0xff] %vm821_vm8, %v802_v13 }
 0x172   :  { %837 = vst.msk [vmem:[#allocation2 + $0x78] sm:$0xff] %vm821_vm8, %v804_v14 }
 0x178   :  { %v852_v15 = vld [vmem:[#allocation2 + $0x70] sm:$0xff] }
 0x179   :  { %v853_v46 = vld [vmem:[#allocation2 + $0x78] sm:$0xff]  ;;  %1597 = vmatprep.mubr.msk.f32.mxu0 %vm863_vm9, %v852_v15 }
 0x17a   :  { %1598 = vmatmul.mubr.msk.f32.gmra.mrb[14].mxu0 %vm863_vm9, %v853_v46 }
 0x181   :  { %v1578_v16 = vpop.f32.mrb[0].mxu0 }
 0x182   :  { %1058 = vst [vmem:[%s2634_s6 + $0x8] sm:$0xff] %v1578_v16  ;;  %v1095_v17 = vmul.f32 %v1578_v16, %v1578_v16  ;;  %v978_v18 = vpop.f32.mrb[1].mxu0 }
 0x183   :  { %1057 = vst [vmem:[%s2634_s6] sm:$0xff] %v978_v18  ;;  %v1073_v19 = vadd.f32 %v1578_v16, %v978_v18  ;;  %v1094_v21 = vmul.f32 %v978_v18, %v978_v18 }
 0x185   :  { %v1110_v22 = vadd.f32 %v1095_v17, %v1094_v21 }
 0x198   :  { %v1604_v33 = vpop.f32.mrb[0].mxu1 }
 0x199   :  { %1345 = vst [vmem:[%s2635_s8 + $0x8] sm:$0xff] %v1604_v33  ;;  %v1382_v34 = vmul.f32 %v1604_v33, %v1604_v33  ;;  %v1265_v35 = vpop.f32.mrb[1].mxu1 }
 0x19a   :  { %1344 = vst [vmem:[%s2635_s8] sm:$0xff] %v1265_v35  ;;  %v1360_v36 = vadd.f32 %v1604_v33, %v1265_v35  ;;  %v1381_v37 = vmul.f32 %v1265_v35, %v1265_v35 }
 0x19c   :  { %v1397_v38 = vadd.f32 %v1382_v34, %v1381_v37 }
 0x19f   :  { %v1607_v39 = vpop.f32.mrb[2].mxu1 }
 0x1a0   :  { %1347 = vst [vmem:[%s2635_s8 + $0x18] sm:$0xff] %v1607_v39  ;;  %v1275_v40 = vpop.f32.mrb[3].mxu1  ;;  %v1384_v41 = vmul.f32 %v1607_v39, %v1607_v39 }
 0x1a1   :  { %v1581_v49 = vpop.f32.mrb[2].mxu0  ;;  %1346 = vst [vmem:[%s2635_s8 + $0x10] sm:$0xff] %v1275_v40  ;;  %v1361_v42 = vadd.f32 %v1360_v36, %v1275_v40  ;;  %v1383_v43 = vmul.f32 %v1275_v40, %v1275_v40 }
 0x1a2   :  { %1060 = vst [vmem:[%s2634_s6 + $0x18] sm:$0xff] %v1581_v49  ;;  %v988_v24 = vpop.f32.mrb[3].mxu0  ;;  %v1097_v27 = vmul.f32 %v1581_v49, %v1581_v49 }
 0x1a3   :  { %1059 = vst [vmem:[%s2634_s6 + $0x10] sm:$0xff] %v988_v24  ;;  %v1074_v25 = vadd.f32 %v1073_v19, %v988_v24  ;;  %v1096_v26 = vmul.f32 %v988_v24, %v988_v24  ;;  %v1398_v44 = vadd.f32 %v1397_v38, %v1383_v43  ;;  %v1610_v45 = vpop.f32.mrb[4].mxu1  ;;  %v1362_v47 = vadd.f32 %v1607_v39, %v1361_v42 }
 0x1a4   :  { %1349 = vst [vmem:[%s2635_s8 + $0x28] sm:$0xff] %v1610_v45  ;;  %v1285_v23 = vpop.f32.mrb[5].mxu1  ;;  %v1386_v48 = vmul.f32 %v1610_v45, %v1610_v45 }
 0x1a5   :  { %v1111_v29 = vadd.f32 %v1110_v22, %v1096_v26  ;;  %v2530_v30 = vadd.f32 %v1581_v49, %v1074_v25  ;;  %1348 = vst [vmem:[%s2635_s8 + $0x20] sm:$0xff] %v1285_v23  ;;  %v1363_v50 = vadd.f32 %v1362_v47, %v1285_v23  ;;  %v1385_v52 = vmul.f32 %v1285_v23, %v1285_v23 }
 0x1a6   :  { %v1399_v53 = vadd.f32 %v1398_v44, %v1384_v41 }
 0x1a7   :  { %v2532_v31 = vadd.f32 %v1111_v29, %v1097_v27  ;;  %v1613_v58 = vpop.f32.mrb[6].mxu1  ;;  %v1364_v32 = vadd.f32 %v1610_v45, %v1363_v50 }
 0x1a8   :  { %v1400_v54 = vadd.f32 %v1399_v53, %v1385_v52  ;;  %1351 = vst [vmem:[%s2635_s8 + $0x38] sm:$0xff] %v1613_v58  ;;  %v1295_v0 = vpop.f32.mrb[7].mxu1  ;;  %v1388_v2 = vmul.f32 %v1613_v58, %v1613_v58 }
 0x1a9   :  { %1350 = vst [vmem:[%s2635_s8 + $0x30] sm:$0xff] %v1295_v0  ;;  %v1365_v55 = vadd.f32 %v1364_v32, %v1295_v0  ;;  %v1387_v56 = vmul.f32 %v1295_v0, %v1295_v0 }
 0x1aa   :  { %v1401_v59 = vadd.f32 %v1400_v54, %v1386_v48 }
 0x1ab   :  { %v1616_v20 = vpop.f32.mrb[8].mxu1  ;;  %v1366_v28 = vadd.f32 %v1613_v58, %v1365_v55 }
 0x1ac   :  { %v1402_v62 = vadd.f32 %v1401_v59, %v1387_v56  ;;  %1353 = vst [vmem:[%s2635_s8 + $0x48] sm:$0xff] %v1616_v20  ;;  %v1305_v51 = vpop.f32.mrb[9].mxu1  ;;  %v1390_v57 = vmul.f32 %v1616_v20, %v1616_v20 }
 0x1ad   :  { %1352 = vst [vmem:[%s2635_s8 + $0x40] sm:$0xff] %v1305_v51  ;;  %v1367_v60 = vadd.f32 %v1366_v28, %v1305_v51  ;;  %v1389_v61 = vmul.f32 %v1305_v51, %v1305_v51 }
 0x1ae   :  { %v1403_v63 = vadd.f32 %v1402_v62, %v1388_v2 }
 0x1af   :  { %v1619_v3 = vpop.f32.mrb[10].mxu1  ;;  %v1368_v4 = vadd.f32 %v1616_v20, %v1367_v60 }
 0x1b0   :  { %v1404_v1 = vadd.f32 %v1403_v63, %v1389_v61  ;;  %1355 = vst [vmem:[%s2635_s8 + $0x58] sm:$0xff] %v1619_v3  ;;  %v1315_v5 = vpop.f32.mrb[11].mxu1  ;;  %v1392_v6 = vmul.f32 %v1619_v3, %v1619_v3 }
 0x1b1   :  { %1354 = vst [vmem:[%s2635_s8 + $0x50] sm:$0xff] %v1315_v5  ;;  %v1369_v7 = vadd.f32 %v1368_v4, %v1315_v5  ;;  %v1391_v9 = vmul.f32 %v1315_v5, %v1315_v5 }
 0x1b2   :  { %v1405_v10 = vadd.f32 %v1404_v1, %v1390_v57 }
 0x1b3   :  { %v1622_v11 = vpop.f32.mrb[12].mxu1  ;;  %v1370_v12 = vadd.f32 %v1619_v3, %v1369_v7 }
 0x1b4   :  { %v1406_v8 = vadd.f32 %v1405_v10, %v1391_v9  ;;  %1357 = vst [vmem:[%s2635_s8 + $0x68] sm:$0xff] %v1622_v11  ;;  %v1325_v14 = vpop.f32.mrb[13].mxu1  ;;  %v1394_v46 = vmul.f32 %v1622_v11, %v1622_v11 }
 0x1b5   :  { %1356 = vst [vmem:[%s2635_s8 + $0x60] sm:$0xff] %v1325_v14  ;;  %v1371_v16 = vadd.f32 %v1370_v12, %v1325_v14  ;;  %v1393_v17 = vmul.f32 %v1325_v14, %v1325_v14 }
 0x1b6   :  { %v1407_v18 = vadd.f32 %v1406_v8, %v1392_v6 }
 0x1b7   :  { %v1625_v49 = vpop.f32.mrb[14].mxu1  ;;  %v1372_v33 = vadd.f32 %v1622_v11, %v1371_v16 }
 0x1b8   :  { %v1408_v22 = vadd.f32 %v1407_v18, %v1393_v17  ;;  %1359 = vst [vmem:[%s2635_s8 + $0x78] sm:$0xff] %v1625_v49  ;;  %v1335_v27 = vpop.f32.mrb[15].mxu1  ;;  %v1396_v29 = vmul.f32 %v1625_v49, %v1625_v49 }
 0x1b9   :  { %1358 = vst [vmem:[%s2635_s8 + $0x70] sm:$0xff] %v1335_v27  ;;  %v1395_v34 = vmul.f32 %v1335_v27, %v1335_v27  ;;  %v1373_v36 = vadd.f32 %v1372_v33, %v1335_v27 }
 0x1bb   :  { %v1374_v38 = vadd.f32 %v1625_v49, %v1373_v36 }
 0x1c1   :  { %v1584_v13 = vpop.f32.mrb[4].mxu0 }
 0x1c2   :  { %1062 = vst [vmem:[%s2634_s6 + $0x28] sm:$0xff] %v1584_v13  ;;  %v998_v15 = vpop.f32.mrb[5].mxu0  ;;  %v1099_v24 = vmul.f32 %v1584_v13, %v1584_v13 }
 0x1c3   :  { %1061 = vst [vmem:[%s2634_s6 + $0x20] sm:$0xff] %v998_v15  ;;  %v1076_v19 = vadd.f32 %v2530_v30, %v998_v15  ;;  %v1098_v21 = vmul.f32 %v998_v15, %v998_v15  ;;  %v1409_v30 = vadd.f32 %v1408_v22, %v1394_v46 }
 0x1c5   :  { %v1113_v25 = vadd.f32 %v2532_v31, %v1098_v21  ;;  %v1077_v26 = vadd.f32 %v1584_v13, %v1076_v19  ;;  %v1410_v37 = vadd.f32 %v1409_v30, %v1395_v34  ;;  %v1375_v31 = vrot.slane %v1374_v38, 4 }
 0x1c7   :  { %v1114_v35 = vadd.f32 %v1113_v25, %v1099_v24  ;;  %v1411_v39 = vadd.f32 %v1410_v37, %v1396_v29  ;;  %v1376_v41 = vadd.f32 %v1375_v31, %v1374_v38 }
 0x1c9   :  { %v1412_v40 = vrot.slane %v1411_v39, 4  ;;  %v1377_v43 = vrot.slane %v1376_v41, 2 }
 0x1cb   :  { %v1413_v42 = vadd.f32 %v1412_v40, %v1411_v39  ;;  %v1378_v45 = vadd.f32 %v1377_v43, %v1376_v41 }
 0x1cd   :  { %v1414_v44 = vrot.slane %v1413_v42, 2  ;;  %v1379_v23 = vrot.slane %v1378_v45, 1 }
 0x1cf   :  { %v1415_v47 = vadd.f32 %v1414_v44, %v1413_v42  ;;  %v1380_v50 = vadd.f32 %v1379_v23, %v1378_v45 }
 0x1d1   :  { %v1416_v48 = vrot.slane %v1415_v47, 1 }
 0x1d3   :  { %v1417_v52 = vadd.f32 %v1416_v48, %v1415_v47 }
 0x1d5   :  { %v1418_v53 = vsel %vm1131_vm10, %v1380_v50, %v1417_v52 }
 0x1d6   :  { %1419 = vst [vmem:[%s2636_s9] sm:$0x3] %v1418_v53 }
 0x1e1   :  { %v1587_v54 = vpop.f32.mrb[6].mxu0 }
 0x1e2   :  { %1064 = vst [vmem:[%s2634_s6 + $0x38] sm:$0xff] %v1587_v54  ;;  %v1008_v58 = vpop.f32.mrb[7].mxu0  ;;  %v1101_v2 = vmul.f32 %v1587_v54, %v1587_v54 }
 0x1e3   :  { %1063 = vst [vmem:[%s2634_s6 + $0x30] sm:$0xff] %v1008_v58  ;;  %v1078_v32 = vadd.f32 %v1077_v26, %v1008_v58  ;;  %v1100_v0 = vmul.f32 %v1008_v58, %v1008_v58 }
 0x1e5   :  { %v1115_v55 = vadd.f32 %v1114_v35, %v1100_v0  ;;  %v1079_v56 = vadd.f32 %v1587_v54, %v1078_v32 }
 0x1e7   :  { %v1116_v59 = vadd.f32 %v1115_v55, %v1101_v2 }
 0x201   :  { %v1590_v62 = vpop.f32.mrb[8].mxu0 }
 0x202   :  { %1066 = vst [vmem:[%s2634_s6 + $0x48] sm:$0xff] %v1590_v62  ;;  %v1018_v20 = vpop.f32.mrb[9].mxu0  ;;  %v1103_v57 = vmul.f32 %v1590_v62, %v1590_v62 }
 0x203   :  { %1065 = vst [vmem:[%s2634_s6 + $0x40] sm:$0xff] %v1018_v20  ;;  %v1080_v28 = vadd.f32 %v1079_v56, %v1018_v20  ;;  %v1102_v51 = vmul.f32 %v1018_v20, %v1018_v20 }
 0x205   :  { %v1117_v60 = vadd.f32 %v1116_v59, %v1102_v51  ;;  %v1081_v61 = vadd.f32 %v1590_v62, %v1080_v28 }
 0x207   :  { %v1118_v63 = vadd.f32 %v1117_v60, %v1103_v57 }
 0x221   :  { %v1593_v1 = vpop.f32.mrb[10].mxu0 }
 0x222   :  { %1068 = vst [vmem:[%s2634_s6 + $0x58] sm:$0xff] %v1593_v1  ;;  %v1028_v3 = vpop.f32.mrb[11].mxu0  ;;  %v1105_v6 = vmul.f32 %v1593_v1, %v1593_v1 }
 0x223   :  { %1067 = vst [vmem:[%s2634_s6 + $0x50] sm:$0xff] %v1028_v3  ;;  %v1082_v4 = vadd.f32 %v1081_v61, %v1028_v3  ;;  %v1104_v5 = vmul.f32 %v1028_v3, %v1028_v3 }
 0x225   :  { %v1119_v7 = vadd.f32 %v1118_v63, %v1104_v5  ;;  %v1083_v9 = vadd.f32 %v1593_v1, %v1082_v4 }
 0x227   :  { %v1120_v10 = vadd.f32 %v1119_v7, %v1105_v6 }
 0x240   :  { %v1596_v8 = vpop.f32.mrb[12].mxu0 }
 0x241   :  { %1070 = vst [vmem:[%s2634_s6 + $0x68] sm:$0xff] %v1596_v8  ;;  %v1038_v11 = vpop.f32.mrb[13].mxu0  ;;  %v1107_v14 = vmul.f32 %v1596_v8, %v1596_v8 }
 0x242   :  { %1069 = vst [vmem:[%s2634_s6 + $0x60] sm:$0xff] %v1038_v11  ;;  %v1084_v12 = vadd.f32 %v1083_v9, %v1038_v11  ;;  %v1106_v13 = vmul.f32 %v1038_v11, %v1038_v11 }
 0x244   :  { %v1121_v15 = vadd.f32 %v1120_v10, %v1106_v13  ;;  %v1085_v46 = vadd.f32 %v1596_v8, %v1084_v12 }
 0x246   :  { %v1122_v16 = vadd.f32 %v1121_v15, %v1107_v14 }
 0x24d   :  { %v1599_v17 = vpop.f32.mrb[14].mxu0 }
 0x24e   :  { %1072 = vst [vmem:[%s2634_s6 + $0x78] sm:$0xff] %v1599_v17  ;;  %v1048_v18 = vpop.f32.mrb[15].mxu0  ;;  %v1109_v22 = vmul.f32 %v1599_v17, %v1599_v17 }
 0x24f   :  { %1071 = vst [vmem:[%s2634_s6 + $0x70] sm:$0xff] %v1048_v18  ;;  %v1086_v19 = vadd.f32 %v1085_v46, %v1048_v18  ;;  %v1108_v21 = vmul.f32 %v1048_v18, %v1048_v18 }
 0x251   :  { %v1087_v49 = vadd.f32 %v1599_v17, %v1086_v19  ;;  %v1123_v24 = vadd.f32 %v1122_v16, %v1108_v21 }
 0x253   :  { %v1088_v25 = vrot.slane %v1087_v49, 4  ;;  %v1124_v26 = vadd.f32 %v1123_v24, %v1109_v22 }
 0x255   :  { %v1089_v27 = vadd.f32 %v1088_v25, %v1087_v49  ;;  %v1125_v29 = vrot.slane %v1124_v26, 4 }
 0x257   :  { %v1090_v33 = vrot.slane %v1089_v27, 2  ;;  %v1126_v34 = vadd.f32 %v1125_v29, %v1124_v26 }
 0x259   :  { %v1091_v30 = vadd.f32 %v1090_v33, %v1089_v27  ;;  %v1127_v35 = vrot.slane %v1126_v34, 2 }
 0x25b   :  { %v1092_v36 = vrot.slane %v1091_v30, 1  ;;  %v1128_v37 = vadd.f32 %v1127_v35, %v1126_v34 }
 0x25d   :  { %v1129_v38 = vrot.slane %v1128_v37, 1  ;;  %v1093_v39 = vadd.f32 %v1092_v36, %v1091_v30 }
 0x25f   :  { %v1130_v31 = vadd.f32 %v1129_v38, %v1128_v37 }
 0x261   :  { %v1132_v40 = vsel %vm1131_vm10, %v1093_v39, %v1130_v31 }
 0x262   :  { %1133 = vst [vmem:[%s2637_s7] sm:$0x3] %v1132_v40 }

</bundles_post_ra>
